<compile_context>
chip_gen: v6e
topology: v6e:2x2x1
jax: 0.10.0
libtpu: 0.0.40
codegen_flags: <defaults>
</compile_context>

<pallas_src>
import jax
import jax.numpy as jnp
from jax.experimental import pallas as pl
from jax.experimental.pallas import tpu as pltpu

_FEAT = 784
_FEAT_PAD = 896  # 784 rounded up to a multiple of 128


def _round_up(n, m):
    return ((n + m - 1) // m) * m


def _leaky_relu(x, slope=0.2):
    return jnp.where(x > 0, x, slope * x)


def discriminator_kernel(x_ref,
                         w0_ref, b0_ref,
                         w1_ref, b1_ref,
                         w2_ref, b2_ref,
                         w3_ref, b3_ref,
                         o_ref):
    # Layer 0: Linear(784 -> 1024) + LeakyReLU(0.2). (Dropout(0.3) = identity in eval.)
    # K is padded to 896 (zero rows in w0) so the MXU contraction is lane-aligned.
    h = jnp.dot(x_ref[...].astype(jnp.bfloat16), w0_ref[...],
                preferred_element_type=jnp.float32)
    h = _leaky_relu(h + b0_ref[...])

    # Layer 1: Linear(1024 -> 512) + LeakyReLU(0.2)
    h = jnp.dot(h.astype(jnp.bfloat16), w1_ref[...],
                preferred_element_type=jnp.float32)
    h = _leaky_relu(h + b1_ref[...])

    # Layer 2: Linear(512 -> 256) + LeakyReLU(0.2)
    h = jnp.dot(h.astype(jnp.bfloat16), w2_ref[...],
                preferred_element_type=jnp.float32)
    h = _leaky_relu(h + b2_ref[...])

    # Output: Linear(256 -> 1) + Sigmoid, computed as w3(1,256) @ h.T(256,tb) so the
    # result is a lane-dense (1, tb) row (unmasked stores); done in f32 (tiny op).
    logits = jnp.dot(w3_ref[...], h.T, preferred_element_type=jnp.float32) + b3_ref[...]
    o_ref[...] = jax.nn.sigmoid(logits)


def prepare_params(params):
    """One-time conversion of f32 (W, b) pairs into the kernel's resident layout:
    bf16 weights, f32 biases, W0 zero-padded 784 -> 896 rows, w3 as a (1, 256) row."""
    (w0, b0), (w1, b1), (w2, b2), (w3, b3) = params
    w0p = jnp.pad(w0.astype(jnp.float32),
                  ((0, _FEAT_PAD - _FEAT), (0, 0))).astype(jnp.bfloat16)   # (896, 1024)
    return (
        w0p, b0.reshape(1, 1024).astype(jnp.float32),
        w1.astype(jnp.bfloat16), b1.reshape(1, 512).astype(jnp.float32),
        w2.astype(jnp.bfloat16), b2.reshape(1, 256).astype(jnp.float32),
        w3.reshape(1, 256).astype(jnp.float32), b3.reshape(1, 1).astype(jnp.float32),
    )


def _pick_batch_tile(B, batch_tile):
    tb = min(batch_tile, _round_up(B, 8))
    tb = _round_up(tb, 8)
    # Shrink the tile (keeping it a multiple of 8) while >50% of it would be padding.
    while tb > 8 and _round_up(B, tb) - B > tb // 2:
        tb = _round_up(tb // 2, 8)
    return tb


def _vmem_limit_bytes():
    # Per-generation VMEM budget: <=40 MiB on v7x (64 MiB physical), 48 MiB otherwise.
    try:
        cap = pltpu.get_tpu_info().vmem_capacity_bytes
    except Exception:
        cap = 64 << 20
    return int(min(48 << 20, (cap * 5) // 8))


def discriminator_forward(x, kernel_params, *, batch_tile=512):
    """x: (B, 784) float32 or bfloat16; kernel_params: output of prepare_params()."""
    B, F = x.shape
    assert F == _FEAT, F
    (w0p, b0r, w1b, b1r, w2b, b2r, w3r, b3r) = kernel_params

    tb = _pick_batch_tile(B, batch_tile)
    Bp = _round_up(B, tb)
    steps = Bp // tb

    # Single pad covers both batch rows (-> Bp) and feature columns (784 -> 896).
    if Bp != B or _FEAT_PAD != F:
        x = jnp.pad(x, ((0, Bp - B), (0, _FEAT_PAD - F)))

    # Megacore only pays once the streamed x traffic dominates the fixed weight load;
    # for small grids, "parallel" would duplicate the ~3 MiB weight DMA per core.
    semantics = ("parallel",) if (steps > 1 and Bp >= 4096) else ("arbitrary",)

    const = lambda i: (0, 0)   # weights/biases: same block every step -> VMEM-resident
    out = pl.pallas_call(
        discriminator_kernel,
        out_shape=jax.ShapeDtypeStruct((steps, tb), jnp.float32),
        grid=(steps,),
        in_specs=[
            pl.BlockSpec((tb, _FEAT_PAD), lambda i: (i, 0)),           # x tile streams
            pl.BlockSpec((_FEAT_PAD, 1024), const), pl.BlockSpec((1, 1024), const),
            pl.BlockSpec((1024, 512), const), pl.BlockSpec((1, 512), const),
            pl.BlockSpec((512, 256), const), pl.BlockSpec((1, 256), const),
            pl.BlockSpec((1, 256), const), pl.BlockSpec((1, 1), const),
        ],
        out_specs=pl.BlockSpec((1, tb), lambda i: (i, 0)),             # lane-dense rows
        compiler_params=pltpu.CompilerParams(
            dimension_semantics=semantics,
            vmem_limit_bytes=_vmem_limit_bytes(),
        ),
    )(x, w0p, b0r, w1b, b1r, w2b, b2r, w3r, b3r)
    return out.reshape(Bp, 1)[:B]


def init_params(key):
    """Deterministic init mimicking torch.nn.Linear default U[-1/sqrt(fan_in), +1/sqrt(fan_in)]."""
    dims = [(784, 1024), (1024, 512), (512, 256), (256, 1)]
    params = []
    for (fan_in, fan_out) in dims:
        key, kw, kb = jax.random.split(key, 3)
        bound = 1.0 / (fan_in ** 0.5)
        w = jax.random.uniform(kw, (fan_in, fan_out), jnp.float32, -bound, bound)
        b = jax.random.uniform(kb, (1, fan_out), jnp.float32, -bound, bound)
        params.append((w, b))
    return params


def reference_forward(x, params):
    """Pure-JAX reference with the same bf16-weight / f32-accumulate numerics."""
    (w0, b0), (w1, b1), (w2, b2), (w3, b3) = params
    h = x.astype(jnp.float32)
    for w, b in ((w0, b0), (w1, b1), (w2, b2)):
        h = jnp.dot(h.astype(jnp.bfloat16), w.astype(jnp.bfloat16),
                    preferred_element_type=jnp.float32) + b.reshape(1, -1)
        h = jnp.where(h > 0, h, 0.2 * h)
    logits = jnp.dot(h, w3.reshape(256, 1)) + b3.reshape(1, 1)
    return jax.nn.sigmoid(logits)


if __name__ == "__main__":
    key = jax.random.PRNGKey(0)
    key, kx = jax.random.split(key)

    B = 16
    x = jax.random.normal(kx, (B, 784), jnp.float32)
    params = init_params(key)
    kparams = prepare_params(params)

    ref = reference_forward(x, params)

    # 1) default tiling: single grid step, lane-dense (1, 16) output block.
    out = jax.block_until_ready(discriminator_forward(x, kparams))
    assert out.shape == (B, 1), out.shape
    assert jnp.allclose(out, ref, atol=1e-3, rtol=1e-3), (
        f"max abs diff = {jnp.max(jnp.abs(out - ref))}")

    # 2) small batch tile: exercises the batch grid (2 steps) + resident weights.
    out2 = jax.block_until_ready(discriminator_forward(x, kparams, batch_tile=8))
    assert out2.shape == (B, 1), out2.shape
    assert jnp.allclose(out2, ref, atol=1e-3, rtol=1e-3), (
        f"max abs diff = {jnp.max(jnp.abs(out2 - ref))}")

    # 3) bf16 producer + non-tile-multiple batch: exercises dtype passthrough,
    #    batch padding and the tile-waste clamp (B=40, tb=16 -> 3 grid steps).
    B3 = 40
    key, kx3 = jax.random.split(key)
    x3 = jax.random.normal(kx3, (B3, 784), jnp.float32).astype(jnp.bfloat16)
    ref3 = reference_forward(x3, params)
    out3 = jax.block_until_ready(discriminator_forward(x3, kparams, batch_tile=16))
    assert out3.shape == (B3, 1), out3.shape
    assert jnp.allclose(out3, ref3, atol=1e-3, rtol=1e-3), (
        f"max abs diff = {jnp.max(jnp.abs(out3 - ref3))}")

    print("KERNEL_OK")
</pallas_src>

<mosaic_0001>
module attributes {stable_mosaic.version = 11 : i64} {
  func.func @discriminator_kernel(%arg0: i32, %arg1: memref<16x896xf32, #tpu.memory_space<vmem>>, %arg2: memref<896x1024xbf16, #tpu.memory_space<vmem>>, %arg3: memref<1x1024xf32, #tpu.memory_space<vmem>>, %arg4: memref<1024x512xbf16, #tpu.memory_space<vmem>>, %arg5: memref<1x512xf32, #tpu.memory_space<vmem>>, %arg6: memref<512x256xbf16, #tpu.memory_space<vmem>>, %arg7: memref<1x256xf32, #tpu.memory_space<vmem>>, %arg8: memref<1x256xf32, #tpu.memory_space<vmem>>, %arg9: memref<1x1xf32, #tpu.memory_space<vmem>>, %arg10: memref<1x16xf32, #tpu.memory_space<vmem>>) attributes {dimension_semantics = [#tpu.dimension_semantics<arbitrary>], iteration_bounds = array<i64: 1>, scalar_prefetch = 0 : i64, scratch_operands = 0 : i64, tpu.core_type = #tpu.core_type<tc>, window_params = [{transform_indices = @transform_0, window_bounds = array<i64: 16, 896>}, {pipeline_mode = #tpu.pipeline_mode<synchronous>, transform_indices = @transform_1, window_bounds = array<i64: 896, 1024>}, {pipeline_mode = #tpu.pipeline_mode<synchronous>, transform_indices = @transform_2, window_bounds = array<i64: 1, 1024>}, {pipeline_mode = #tpu.pipeline_mode<synchronous>, transform_indices = @transform_3, window_bounds = array<i64: 1024, 512>}, {pipeline_mode = #tpu.pipeline_mode<synchronous>, transform_indices = @transform_4, window_bounds = array<i64: 1, 512>}, {pipeline_mode = #tpu.pipeline_mode<synchronous>, transform_indices = @transform_5, window_bounds = array<i64: 512, 256>}, {pipeline_mode = #tpu.pipeline_mode<synchronous>, transform_indices = @transform_6, window_bounds = array<i64: 1, 256>}, {pipeline_mode = #tpu.pipeline_mode<synchronous>, transform_indices = @transform_7, window_bounds = array<i64: 1, 256>}, {pipeline_mode = #tpu.pipeline_mode<synchronous>, transform_indices = @transform_8, window_bounds = array<i64: 1, 1>}, {transform_indices = @transform_9, window_bounds = array<i64: 1, 16>}]} {
    %c0 = arith.constant 0 : index
    %c0_0 = arith.constant 0 : index
    %0 = vector.load %arg1[%c0, %c0_0] : memref<16x896xf32, #tpu.memory_space<vmem>>, vector<16x896xf32>
    %1 = arith.truncf %0 : vector<16x896xf32> to vector<16x896xbf16>
    %c0_1 = arith.constant 0 : index
    %c0_2 = arith.constant 0 : index
    %2 = vector.load %arg2[%c0_1, %c0_2] : memref<896x1024xbf16, #tpu.memory_space<vmem>>, vector<896x1024xbf16>
    %cst = arith.constant dense<0.000000e+00> : vector<16x1024xf32>
    %3 = tpu.matmul %1, %2, %cst {dimension_numbers = #tpu.dot_dimension_numbers<[1], [0], [0], [1], [0, 0, 1, 1], [], []>} : vector<16x896xbf16>, vector<896x1024xbf16>, vector<16x1024xf32> -> vector<16x1024xf32>
    %c0_3 = arith.constant 0 : index
    %c0_4 = arith.constant 0 : index
    %4 = vector.load %arg3[%c0_3, %c0_4] : memref<1x1024xf32, #tpu.memory_space<vmem>>, vector<1x1024xf32>
    %5 = vector.broadcast %4 : vector<1x1024xf32> to vector<16x1024xf32>
    %6 = arith.addf %3, %5 : vector<16x1024xf32>
    %cst_5 = arith.constant 0.000000e+00 : f32
    %7 = vector.broadcast %cst_5 : f32 to vector<16x1024xf32>
    %8 = arith.cmpf ogt, %6, %7 : vector<16x1024xf32>
    %cst_6 = arith.constant 2.000000e-01 : f32
    %9 = vector.broadcast %cst_6 : f32 to vector<16x1024xf32>
    %10 = arith.mulf %9, %6 : vector<16x1024xf32>
    %11 = arith.select %8, %6, %10 : vector<16x1024xi1>, vector<16x1024xf32>
    %12 = arith.truncf %11 : vector<16x1024xf32> to vector<16x1024xbf16>
    %c0_7 = arith.constant 0 : index
    %c0_8 = arith.constant 0 : index
    %13 = vector.load %arg4[%c0_7, %c0_8] : memref<1024x512xbf16, #tpu.memory_space<vmem>>, vector<1024x512xbf16>
    %cst_9 = arith.constant dense<0.000000e+00> : vector<16x512xf32>
    %14 = tpu.matmul %12, %13, %cst_9 {dimension_numbers = #tpu.dot_dimension_numbers<[1], [0], [0], [1], [0, 0, 1, 1], [], []>} : vector<16x1024xbf16>, vector<1024x512xbf16>, vector<16x512xf32> -> vector<16x512xf32>
    %c0_10 = arith.constant 0 : index
    %c0_11 = arith.constant 0 : index
    %15 = vector.load %arg5[%c0_10, %c0_11] : memref<1x512xf32, #tpu.memory_space<vmem>>, vector<1x512xf32>
    %16 = vector.broadcast %15 : vector<1x512xf32> to vector<16x512xf32>
    %17 = arith.addf %14, %16 : vector<16x512xf32>
    %cst_12 = arith.constant 0.000000e+00 : f32
    %18 = vector.broadcast %cst_12 : f32 to vector<16x512xf32>
    %19 = arith.cmpf ogt, %17, %18 : vector<16x512xf32>
    %cst_13 = arith.constant 2.000000e-01 : f32
    %20 = vector.broadcast %cst_13 : f32 to vector<16x512xf32>
    %21 = arith.mulf %20, %17 : vector<16x512xf32>
    %22 = arith.select %19, %17, %21 : vector<16x512xi1>, vector<16x512xf32>
    %23 = arith.truncf %22 : vector<16x512xf32> to vector<16x512xbf16>
    %c0_14 = arith.constant 0 : index
    %c0_15 = arith.constant 0 : index
    %24 = vector.load %arg6[%c0_14, %c0_15] : memref<512x256xbf16, #tpu.memory_space<vmem>>, vector<512x256xbf16>
    %cst_16 = arith.constant dense<0.000000e+00> : vector<16x256xf32>
    %25 = tpu.matmul %23, %24, %cst_16 {dimension_numbers = #tpu.dot_dimension_numbers<[1], [0], [0], [1], [0, 0, 1, 1], [], []>} : vector<16x512xbf16>, vector<512x256xbf16>, vector<16x256xf32> -> vector<16x256xf32>
    %c0_17 = arith.constant 0 : index
    %c0_18 = arith.constant 0 : index
    %26 = vector.load %arg7[%c0_17, %c0_18] : memref<1x256xf32, #tpu.memory_space<vmem>>, vector<1x256xf32>
    %27 = vector.broadcast %26 : vector<1x256xf32> to vector<16x256xf32>
    %28 = arith.addf %25, %27 : vector<16x256xf32>
    %cst_19 = arith.constant 0.000000e+00 : f32
    %29 = vector.broadcast %cst_19 : f32 to vector<16x256xf32>
    %30 = arith.cmpf ogt, %28, %29 : vector<16x256xf32>
    %cst_20 = arith.constant 2.000000e-01 : f32
    %31 = vector.broadcast %cst_20 : f32 to vector<16x256xf32>
    %32 = arith.mulf %31, %28 : vector<16x256xf32>
    %33 = arith.select %30, %28, %32 : vector<16x256xi1>, vector<16x256xf32>
    %c0_21 = arith.constant 0 : index
    %c0_22 = arith.constant 0 : index
    %34 = vector.load %arg8[%c0_21, %c0_22] : memref<1x256xf32, #tpu.memory_space<vmem>>, vector<1x256xf32>
    %35 = tpu.transpose %33, [1, 0] : vector<16x256xf32> -> vector<256x16xf32>
    %cst_23 = arith.constant dense<0.000000e+00> : vector<1x16xf32>
    %36 = tpu.matmul %34, %35, %cst_23 {dimension_numbers = #tpu.dot_dimension_numbers<[1], [0], [0], [1], [0, 0, 1, 1], [], []>} : vector<1x256xf32>, vector<256x16xf32>, vector<1x16xf32> -> vector<1x16xf32>
    %c0_24 = arith.constant 0 : index
    %c0_25 = arith.constant 0 : index
    %37 = vector.load %arg9[%c0_24, %c0_25] : memref<1x1xf32, #tpu.memory_space<vmem>>, vector<1x1xf32>
    %38 = vector.broadcast %37 : vector<1x1xf32> to vector<1x16xf32>
    %39 = arith.addf %36, %38 : vector<1x16xf32>
    %40 = arith.negf %39 : vector<1x16xf32>
    %41 = math.exp %40 : vector<1x16xf32>
    %cst_26 = arith.constant 1.000000e+00 : f32
    %42 = vector.broadcast %cst_26 : f32 to vector<1x16xf32>
    %43 = arith.addf %42, %41 : vector<1x16xf32>
    %44 = arith.divf %42, %43 : vector<1x16xf32>
    %c0_27 = arith.constant 0 : index
    %c0_28 = arith.constant 0 : index
    %45 = vector.load %arg10[%c0_27, %c0_28] : memref<1x16xf32, #tpu.memory_space<vmem>>, vector<1x16xf32>
    tpu.vector_store %arg10[%c0_27, %c0_28], %44 {strides = array<i32>} : memref<1x16xf32, #tpu.memory_space<vmem>>, vector<1x16xf32>,
    return
  }
  func.func @transform_0(%arg0: i32) -> (i32, i32) {
    %c0_i32 = arith.constant 0 : i32
    %c0_i32_0 = arith.constant 0 : i32
    return %arg0, %c0_i32 : i32, i32
  }
  func.func @transform_1(%arg0: i32) -> (i32, i32) {
    %c0_i32 = arith.constant 0 : i32
    %c0_i32_0 = arith.constant 0 : i32
    %c0_i32_1 = arith.constant 0 : i32
    return %c0_i32, %c0_i32_0 : i32, i32
  }
  func.func @transform_2(%arg0: i32) -> (i32, i32) {
    %c0_i32 = arith.constant 0 : i32
    %c0_i32_0 = arith.constant 0 : i32
    %c0_i32_1 = arith.constant 0 : i32
    return %c0_i32, %c0_i32_0 : i32, i32
  }
  func.func @transform_3(%arg0: i32) -> (i32, i32) {
    %c0_i32 = arith.constant 0 : i32
    %c0_i32_0 = arith.constant 0 : i32
    %c0_i32_1 = arith.constant 0 : i32
    return %c0_i32, %c0_i32_0 : i32, i32
  }
  func.func @transform_4(%arg0: i32) -> (i32, i32) {
    %c0_i32 = arith.constant 0 : i32
    %c0_i32_0 = arith.constant 0 : i32
    %c0_i32_1 = arith.constant 0 : i32
    return %c0_i32, %c0_i32_0 : i32, i32
  }
  func.func @transform_5(%arg0: i32) -> (i32, i32) {
    %c0_i32 = arith.constant 0 : i32
    %c0_i32_0 = arith.constant 0 : i32
    %c0_i32_1 = arith.constant 0 : i32
    return %c0_i32, %c0_i32_0 : i32, i32
  }
  func.func @transform_6(%arg0: i32) -> (i32, i32) {
    %c0_i32 = arith.constant 0 : i32
    %c0_i32_0 = arith.constant 0 : i32
    %c0_i32_1 = arith.constant 0 : i32
    return %c0_i32, %c0_i32_0 : i32, i32
  }
  func.func @transform_7(%arg0: i32) -> (i32, i32) {
    %c0_i32 = arith.constant 0 : i32
    %c0_i32_0 = arith.constant 0 : i32
    %c0_i32_1 = arith.constant 0 : i32
    return %c0_i32, %c0_i32_0 : i32, i32
  }
  func.func @transform_8(%arg0: i32) -> (i32, i32) {
    %c0_i32 = arith.constant 0 : i32
    %c0_i32_0 = arith.constant 0 : i32
    %c0_i32_1 = arith.constant 0 : i32
    return %c0_i32, %c0_i32_0 : i32, i32
  }
  func.func @transform_9(%arg0: i32) -> (i32, i32) {
    %c0_i32 = arith.constant 0 : i32
    %c0_i32_0 = arith.constant 0 : i32
    return %arg0, %c0_i32 : i32, i32
  }
}

</mosaic_0001>

<bundles_post_ra>
// kernel: tpu_custom_call.1
= control target key start
LH: loop header
LB: loop body
LE: loop exit
PB: predicated region body
PF: predicated region fallthrough
CT: control target
= control target key end

     0   :  { %s7932_s0 = inlined_call_operand.hbm [shape: f32[16,896], index: 0, kind: input, shape index: {}]   ;;  %s7933_s1 = inlined_call_operand.hbm [shape: bf16[896,1024], index: 1, kind: input, shape index: {}]   ;;  %s7934_s2 = inlined_call_operand.hbm [shape: f32[1,1024], index: 2, kind: input, shape index: {}]   ;;  %s7935_s3 = inlined_call_operand.hbm [shape: bf16[1024,512], index: 3, kind: input, shape index: {}]   ;;  %s7936_s4 = inlined_call_operand.hbm [shape: f32[1,512], index: 4, kind: input, shape index: {}]   ;;  %s7937_s5 = inlined_call_operand.hbm [shape: bf16[512,256], index: 5, kind: input, shape index: {}]   ;;  %s7938_s6 = inlined_call_operand.hbm [shape: f32[1,256], index: 6, kind: input, shape index: {}]   ;;  %s7939_s7 = inlined_call_operand.hbm [shape: f32[1,256], index: 7, kind: input, shape index: {}]   ;;  %s7940_s8 = inlined_call_operand.<no memory space> [shape: f32[1,1], index: 8, kind: input, shape index: {}]   ;;  %s7941_s9 = inlined_call_operand.hbm [shape: f32[1,16], index: 9, kind: output, shape index: {}]  }
   0x1   :  { %v14_v0 = vstv %s7940_s8 }
   0x2   :  { %15 = vst [vmem:[#allocation2] sm:$0x1] %v14_v0 }
   0x3   :  { %16 = vsyncpa [#allocation4], 0 }
   0x4   :  { %17 = vsyncpa [#allocation7], 0 }
   0x5   :  { %18 = vsyncpa [#allocation10], 0 }
   0x6   :  { %19 = vsyncpa [#allocation13], 0 }
   0x7   :  { %20 = vsyncpa [#allocation16], 0 }
   0x8   :  { %21 = vsyncpa [#allocation5], 0  ;;  %s7640_s11 = smov [#allocation6]  }
   0x9   :  { %s39_s12 = sshll.u32 %s7640_s11, 4  ;;  %s40_s12 = int_to_ptr.vmem [resolvable:$true] %s39_s12 }
   0xa   :  { %s7456_s13 = scalar_lea.vmem %s40_s12, 57344  ;;  %p7461_p1 = scmp.lt.s32.totalorder %s40_s12, %s40_s12 }
   0xb   :  { %p7457_p0 = scmp.ne.s32.totalorder %s40_s12, %s7456_s13  ;;  %p7462_p2 = scmp.lt.s32.totalorder %s7456_s13, %s7456_s13 }
   0xd   :  { %p7463_p3 = por %p7462_p2, %p7461_p1 }
   0xf   :  { %p7464_p4 = pnand %p7463_p3, %p7457_p0 }
  0x11   :  { %7467 = shalt.err (!%p7464_p4)
}
  0x12   :  { %s7641_s14 = smov 512   ;;  %s7642_s15 = smov 32  }
  0x13   :  { %45 = dma.hbm_to_vmem [thread:$0]  %s7933_s1, 57344, %s40_s12, [#allocation7], %s7641_s14, %s7641_s14, %s7642_s15  }
  0x14   :  { %s7643_s17 = smov [#allocation9]  }
  0x15   :  { %s61_s18 = sshll.u32 %s7643_s17, 4  ;;  %s62_s18 = int_to_ptr.vmem [resolvable:$true] %s61_s18 }
  0x16   :  { %s7476_s19 = scalar_lea.vmem %s62_s18, 32768  ;;  %p7481_p6 = scmp.lt.s32.totalorder %s62_s18, %s62_s18 }
  0x17   :  { %p7477_p5 = scmp.ne.s32.totalorder %s62_s18, %s7476_s19  ;;  %p7482_p7 = scmp.lt.s32.totalorder %s7476_s19, %s7476_s19 }
  0x19   :  { %p7483_p8 = por %p7482_p7, %p7481_p6 }
  0x1b   :  { %p7484_p9 = pnand %p7483_p8, %p7477_p5 }
  0x1d   :  { %7487 = shalt.err (!%p7484_p9)
}
  0x1e   :  { %s7644_s20 = smov 256   ;;  %s7645_s21 = smov 16  }
  0x1f   :  { %67 = dma.hbm_to_vmem [thread:$0]  %s7935_s3, 32768, %s62_s18, [#allocation10], %s7644_s20, %s7644_s20, %s7645_s21  }
  0x20   :  { %s7646_s24 = smov [#allocation12]  }
  0x21   :  { %s83_s25 = sshll.u32 %s7646_s24, 4  ;;  %s84_s25 = int_to_ptr.vmem [resolvable:$true] %s83_s25 }
  0x22   :  { %s7496_s1 = scalar_lea.vmem %s84_s25, 8192  ;;  %p7501_p11 = scmp.lt.s32.totalorder %s84_s25, %s84_s25 }
  0x23   :  { %p7497_p10 = scmp.ne.s32.totalorder %s84_s25, %s7496_s1  ;;  %p7502_p12 = scmp.lt.s32.totalorder %s7496_s1, %s7496_s1 }
  0x25   :  { %p7503_p13 = por %p7502_p12, %p7501_p11 }
  0x27   :  { %p7504_p0 = pnand %p7503_p13, %p7497_p10 }
  0x29   :  { %7507 = shalt.err (!%p7504_p0)
}
  0x2a   :  { %s7647_s26 = smov 128   ;;  %s7648_s27 = smov 8  }
  0x2b   :  { %89 = dma.hbm_to_vmem [thread:$0]  %s7937_s5, 8192, %s84_s25, [#allocation13], %s7647_s26, %s7647_s26, %s7648_s27  }
  0x2c   :  { %s7649_s30 = smov [#allocation3]  }
  0x2d   :  { %s27_s10 = sshll.u32 %s7649_s30, 4  ;;  %s28_s10 = int_to_ptr.vmem [resolvable:$true] %s27_s10 }
  0x2e   :  { %s7516_s3 = scalar_lea.vmem %s28_s10, 1792  ;;  %p7521_p2 = scmp.lt.s32.totalorder %s28_s10, %s28_s10 }
  0x2f   :  { %p7517_p1 = scmp.ne.s32.totalorder %s28_s10, %s7516_s3  ;;  %p7522_p3 = scmp.lt.s32.totalorder %s7516_s3, %s7516_s3 }
  0x31   :  { %p7523_p4 = por %p7522_p3, %p7521_p2 }
  0x33   :  { %p7524_p5 = pnand %p7523_p4, %p7517_p1 }
  0x35   :  { %7527 = shalt.err (!%p7524_p5)
}
  0x36   :  { %s7650_s11 = smov 896   ;;  %s7651_s12 = smov 56  }
  0x37   :  { %33 = dma.hbm_to_vmem [thread:$0]  %s7932_s0, 1792, %s28_s10, [#allocation4], %s7650_s11, %s7650_s11, %s7651_s12  }
  0x38   :  { %s7652_s15 = smov [#allocation8]   ;;  %s7653_s16 = smov [#allocation11]  }
  0x39   :  { %s52_s8 = sshll.u32 %s7652_s15, 4  ;;  %s74_s5 = sshll.u32 %s7653_s16, 4  ;;  %s53_s8 = int_to_ptr.vmem [resolvable:$true] %s52_s8  ;;  %s75_s5 = int_to_ptr.vmem [resolvable:$true] %s74_s5 }
  0x3a   :  { %s7536_s17 = scalar_lea.vmem %s53_s8, 128  ;;  %p7541_p7 = scmp.lt.s32.totalorder %s53_s8, %s53_s8 }
  0x3b   :  { %p7537_p6 = scmp.ne.s32.totalorder %s53_s8, %s7536_s17  ;;  %p7542_p8 = scmp.lt.s32.totalorder %s7536_s17, %s7536_s17 }
  0x3d   :  { %p7543_p9 = por %p7542_p8, %p7541_p7 }
  0x3f   :  { %p7544_p10 = pnand %p7543_p9, %p7537_p6 }
  0x41   :  { %7547 = shalt.err (!%p7544_p10)
}
  0x42   :  { %55 = dma.hbm_to_vmem [thread:$0]  %s7934_s2, 128, %s53_s8, [#allocation7]  }
  0x43   :  { %s7556_s20 = scalar_lea.vmem %s75_s5, 64  ;;  %p7561_p12 = scmp.lt.s32.totalorder %s75_s5, %s75_s5 }
  0x44   :  { %p7557_p11 = scmp.ne.s32.totalorder %s75_s5, %s7556_s20  ;;  %p7562_p13 = scmp.lt.s32.totalorder %s7556_s20, %s7556_s20 }
  0x46   :  { %p7563_p0 = por %p7562_p13, %p7561_p12 }
  0x48   :  { %p7564_p1 = pnand %p7563_p0, %p7557_p11 }
  0x4a   :  { %7567 = shalt.err (!%p7564_p1)
}
  0x4b   :  { %77 = dma.hbm_to_vmem [thread:$0]  %s7936_s4, 64, %s75_s5, [#allocation10]  }
  0x4c   :  { %s7654_s22 = smov [#allocation14]   ;;  %s7655_s24 = smov [#allocation15]  }
  0x4d   :  { %s96_s23 = sshll.u32 %s7654_s22, 4  ;;  %s106_s25 = sshll.u32 %s7655_s24, 4  ;;  %s97_s23 = int_to_ptr.vmem [resolvable:$true] %s96_s23  ;;  %s107_s25 = int_to_ptr.vmem [resolvable:$true] %s106_s25 }
  0x4e   :  { %s7576_s1 = scalar_lea.vmem %s97_s23, 32  ;;  %p7581_p3 = scmp.lt.s32.totalorder %s97_s23, %s97_s23 }
  0x4f   :  { %p7577_p2 = scmp.ne.s32.totalorder %s97_s23, %s7576_s1  ;;  %p7582_p4 = scmp.lt.s32.totalorder %s7576_s1, %s7576_s1 }
  0x51   :  { %p7583_p5 = por %p7582_p4, %p7581_p3 }
  0x53   :  { %p7584_p6 = pnand %p7583_p5, %p7577_p2 }
  0x55   :  { %7587 = shalt.err (!%p7584_p6)
}
  0x56   :  { %99 = dma.hbm_to_vmem [thread:$0]  %s7938_s6, 32, %s97_s23, [#allocation13]  }
  0x57   :  { %s7596_s27 = scalar_lea.vmem %s107_s25, 32  ;;  %p7601_p8 = scmp.lt.s32.totalorder %s107_s25, %s107_s25 }
  0x58   :  { %p7597_p7 = scmp.ne.s32.totalorder %s107_s25, %s7596_s27  ;;  %p7602_p9 = scmp.lt.s32.totalorder %s7596_s27, %s7596_s27 }
  0x5a   :  { %p7603_p10 = por %p7602_p9, %p7601_p8 }
  0x5c   :  { %p7604_p11 = pnand %p7603_p10, %p7597_p7 }
  0x5e   :  { %7607 = shalt.err (!%p7604_p11)
}
  0x5f   :  { %109 = dma.hbm_to_vmem [thread:$0]  %s7939_s7, 32, %s107_s25, [#allocation16]  }
  0x60   :  { %7628 = dma.done.wait [#allocation4], 1792  }
  0x61   :  { %7629 = vsyncadd [#allocation4], 4294965504 }
  0x62   :  { %7630 = dma.done.wait [#allocation7], 57472  }
  0x63   :  { %7631 = vsyncadd [#allocation7], 4294909824 }
  0x64   :  { %7632 = dma.done.wait [#allocation10], 32832  }
  0x65   :  { %7633 = vsyncadd [#allocation10], 4294934464 }
  0x66   :  { %7634 = dma.done.wait [#allocation13], 8224  }
  0x67   :  { %7635 = vsyncadd [#allocation13], 4294959072 }
  0x68   :  { %7636 = dma.done.wait [#allocation16], 32  }
  0x69   :  { %7637 = vsyncadd [#allocation16], 4294967264  ;;  %v7656_v1 = vmov 0   ;;  %v214_v2 = vld [vmem:[#allocation6 + $0x1c0] sm:$0xff]  ;;  %v138_v56 = vld [vmem:[#allocation3 + $0x8] sm:$0xff]  ;;  %s7657_s6 = smov [#allocation17]  }
  0x6a   :  { %6962 = vset.pattern.permute.xlu0 %v7656_v1  ;;  %v218_v3 = vld [vmem:[#allocation6 + $0x1e0] sm:$0xff]  ;;  %v145_v57 = vld [vmem:[#allocation3 + $0x40] sm:$0xff]  ;;  %v140_v61 = vld [vmem:[#allocation3 + $0x18] sm:$0xff]  ;;  %s6162_s7 = sshll.u32 %s7657_s6, 4  ;;  %s6163_s7 = int_to_ptr.vmem [resolvable:$true] %s6162_s7 }
  0x6b   :  { %v342_v4 = vld [vmem:[#allocation6 + $0x5c0] sm:$0xff]  ;;  %v6232_v5 = vcombine.high %v214_v2, %v218_v3  ;;  %v6231_v7 = vcombine.low %v214_v2, %v218_v3  ;;  %v7736_v60 = vpack.c.bf16 %v145_v57, %v138_v56  ;;  %s7608_s29 = scalar_lea.vmem %s6163_s7, 16  ;;  %s7612_s30 = scalar_lea.vmem %s6163_s7, 32 }
  0x6c   :  { %v346_v6 = vld [vmem:[#allocation6 + $0x5e0] sm:$0xff]  ;;  %p7609_p12 = scmp.ne.s32.totalorder %s6163_s7, %s7608_s29  ;;  %p7613_p13 = scmp.lt.s32.totalorder %s6163_s7, %s6163_s7 }
  0x6d   :  { %v206_v8 = vld [vmem:[#allocation6 + $0x180] sm:$0xff]  ;;  %v6360_v10 = vcombine.high %v342_v4, %v346_v6  ;;  %v6359_v11 = vcombine.low %v342_v4, %v346_v6  ;;  %2888 = vmatprep.subr.bf16.mxu0 %v6232_v5  ;;  %2920 = vmatprep.mubr.bf16.mxu0 %v7736_v60  ;;  %p7614_p0 = scmp.lt.s32.totalorder %s7612_s30, %s7608_s29 }
  0x6e   :  { %v210_v9 = vld [vmem:[#allocation6 + $0x1a0] sm:$0xff]  ;;  %2889 = vmatpush1.bf16.msra.mxu0 %v6231_v7 }
  0x6f   :  { %v6224_v12 = vcombine.high %v206_v8, %v210_v9  ;;  %v334_v13 = vld [vmem:[#allocation6 + $0x580] sm:$0xff]  ;;  %2931 = vmatprep.subr.bf16.mxu1 %v6360_v10  ;;  %v6223_v20 = vcombine.low %v206_v8, %v210_v9  ;;  %p7615_p1 = por %p7614_p0, %p7613_p13 }
  0x70   :  { %v338_v14 = vld [vmem:[#allocation6 + $0x5a0] sm:$0xff]  ;;  %2932 = vmatpush1.bf16.msra.mxu1 %v6359_v11 }
  0x71   :  { %v198_v15 = vld [vmem:[#allocation6 + $0x140] sm:$0xff]  ;;  %v6352_v16 = vcombine.high %v334_v13, %v338_v14  ;;  %2890 = vmatprep.subr.bf16.mxu0 %v6224_v12  ;;  %v6351_v21 = vcombine.low %v334_v13, %v338_v14  ;;  %p7616_p2 = pnand %p7615_p1, %p7609_p12 }
  0x72   :  { %v202_v17 = vld [vmem:[#allocation6 + $0x160] sm:$0xff]  ;;  %2891 = vmatpush1.bf16.msra.mxu0 %v6223_v20 }
  0x73   :  { %v326_v18 = vld [vmem:[#allocation6 + $0x540] sm:$0xff]  ;;  %v6216_v22 = vcombine.high %v198_v15, %v202_v17  ;;  %2933 = vmatprep.subr.bf16.mxu1 %v6352_v16  ;;  %v6215_v28 = vcombine.low %v198_v15, %v202_v17 }
  0x74   :  { %v330_v19 = vld [vmem:[#allocation6 + $0x560] sm:$0xff]  ;;  %2934 = vmatpush1.bf16.msra.mxu1 %v6351_v21 }
  0x75   :  { %v6344_v23 = vcombine.high %v326_v18, %v330_v19  ;;  %v190_v24 = vld [vmem:[#allocation6 + $0x100] sm:$0xff]  ;;  %2892 = vmatprep.subr.bf16.mxu0 %v6216_v22  ;;  %v6343_v29 = vcombine.low %v326_v18, %v330_v19 }
  0x76   :  { %v194_v25 = vld [vmem:[#allocation6 + $0x120] sm:$0xff]  ;;  %2893 = vmatpush1.bf16.msra.mxu0 %v6215_v28 }
  0x77   :  { %v318_v26 = vld [vmem:[#allocation6 + $0x500] sm:$0xff]  ;;  %v6208_v30 = vcombine.high %v190_v24, %v194_v25  ;;  %2935 = vmatprep.subr.bf16.mxu1 %v6344_v23  ;;  %v6207_v36 = vcombine.low %v190_v24, %v194_v25 }
  0x78   :  { %v322_v27 = vld [vmem:[#allocation6 + $0x520] sm:$0xff]  ;;  %2936 = vmatpush1.bf16.msra.mxu1 %v6343_v29 }
  0x79   :  { %v6336_v31 = vcombine.high %v318_v26, %v322_v27  ;;  %v182_v32 = vld [vmem:[#allocation6 + $0xc0] sm:$0xff]  ;;  %2894 = vmatprep.subr.bf16.mxu0 %v6208_v30  ;;  %v6335_v37 = vcombine.low %v318_v26, %v322_v27 }
  0x7a   :  { %v186_v33 = vld [vmem:[#allocation6 + $0xe0] sm:$0xff]  ;;  %2895 = vmatpush1.bf16.msra.mxu0 %v6207_v36 }
  0x7b   :  { %v310_v34 = vld [vmem:[#allocation6 + $0x4c0] sm:$0xff]  ;;  %v6200_v38 = vcombine.high %v182_v32, %v186_v33  ;;  %2937 = vmatprep.subr.bf16.mxu1 %v6336_v31  ;;  %v6199_v44 = vcombine.low %v182_v32, %v186_v33 }
  0x7c   :  { %v314_v35 = vld [vmem:[#allocation6 + $0x4e0] sm:$0xff]  ;;  %2938 = vmatpush1.bf16.msra.mxu1 %v6335_v37 }
  0x7d   :  { %v6328_v39 = vcombine.high %v310_v34, %v314_v35  ;;  %v174_v40 = vld [vmem:[#allocation6 + $0x80] sm:$0xff]  ;;  %2896 = vmatprep.subr.bf16.mxu0 %v6200_v38  ;;  %v6327_v45 = vcombine.low %v310_v34, %v314_v35 }
  0x7e   :  { %v178_v41 = vld [vmem:[#allocation6 + $0xa0] sm:$0xff]  ;;  %2897 = vmatpush1.bf16.msra.mxu0 %v6199_v44 }
  0x7f   :  { %v302_v42 = vld [vmem:[#allocation6 + $0x480] sm:$0xff]  ;;  %v6192_v46 = vcombine.high %v174_v40, %v178_v41  ;;  %2939 = vmatprep.subr.bf16.mxu1 %v6328_v39  ;;  %v6191_v52 = vcombine.low %v174_v40, %v178_v41 }
  0x80   :  { %v306_v43 = vld [vmem:[#allocation6 + $0x4a0] sm:$0xff]  ;;  %2940 = vmatpush1.bf16.msra.mxu1 %v6327_v45 }
  0x81   :  { %v6320_v47 = vcombine.high %v302_v42, %v306_v43  ;;  %v166_v48 = vld [vmem:[#allocation6 + $0x40] sm:$0xff]  ;;  %2898 = vmatprep.subr.bf16.mxu0 %v6192_v46  ;;  %v6319_v53 = vcombine.low %v302_v42, %v306_v43 }
  0x82   :  { %v170_v49 = vld [vmem:[#allocation6 + $0x60] sm:$0xff]  ;;  %2899 = vmatpush1.bf16.msra.mxu0 %v6191_v52 }
  0x83   :  { %v294_v50 = vld [vmem:[#allocation6 + $0x440] sm:$0xff]  ;;  %v6184_v54 = vcombine.high %v166_v48, %v170_v49  ;;  %2941 = vmatprep.subr.bf16.mxu1 %v6320_v47  ;;  %v6183_v3 = vcombine.low %v166_v48, %v170_v49 }
  0x84   :  { %v298_v51 = vld [vmem:[#allocation6 + $0x460] sm:$0xff]  ;;  %2942 = vmatpush1.bf16.msra.mxu1 %v6319_v53 }
  0x85   :  { %v158_v55 = vld [vmem:[#allocation6] sm:$0xff]  ;;  %v6312_v58 = vcombine.high %v294_v50, %v298_v51  ;;  %2900 = vmatprep.subr.bf16.mxu0 %v6184_v54  ;;  %v6311_v4 = vcombine.low %v294_v50, %v298_v51 }
  0x86   :  { %v162_v59 = vld [vmem:[#allocation6 + $0x20] sm:$0xff]  ;;  %2901 = vmatpush1.bf16.msra.mxu0 %v6183_v3 }
  0x87   :  { %v147_v62 = vld [vmem:[#allocation3 + $0x50] sm:$0xff]  ;;  %v6176_v5 = vcombine.high %v158_v55, %v162_v59  ;;  %2943 = vmatprep.subr.bf16.mxu1 %v6312_v58  ;;  %v6175_v11 = vcombine.low %v158_v55, %v162_v59 }
  0x88   :  { %v286_v63 = vld [vmem:[#allocation6 + $0x400] sm:$0xff]  ;;  %v7738_v2 = vpack.c.bf16 %v147_v62, %v140_v61  ;;  %2944 = vmatpush1.bf16.msra.mxu1 %v6311_v4 }
  0x89   :  { %v290_v0 = vld [vmem:[#allocation6 + $0x420] sm:$0xff]  ;;  %2902 = vmatprep.subr.bf16.mxu0 %v6176_v5 }
  0x8a   :  { %v6304_v6 = vcombine.high %v286_v63, %v290_v0  ;;  %v278_v7 = vld [vmem:[#allocation6 + $0x3c0] sm:$0xff]  ;;  %2963 = vmatprep.mubr.bf16.mxu1 %v7738_v2  ;;  %v6303_v12 = vcombine.low %v286_v63, %v290_v0  ;;  %2903 = vmatpush1.bf16.msra.mxu0 %v6175_v11 }
  0x8b   :  { %v282_v8 = vld [vmem:[#allocation6 + $0x3e0] sm:$0xff] }
  0x8c   :  { %v406_v9 = vld [vmem:[#allocation6 + $0x7c0] sm:$0xff]  ;;  %v6296_v13 = vcombine.high %v278_v7, %v282_v8  ;;  %2945 = vmatprep.subr.bf16.mxu1 %v6304_v6  ;;  %v6295_v19 = vcombine.low %v278_v7, %v282_v8 }
  0x8d   :  { %v410_v10 = vld [vmem:[#allocation6 + $0x7e0] sm:$0xff]  ;;  %2946 = vmatpush1.bf16.msra.mxu1 %v6303_v12 }
  0x8e   :  { %v6424_v14 = vcombine.high %v406_v9, %v410_v10  ;;  %v270_v15 = vld [vmem:[#allocation6 + $0x380] sm:$0xff]  ;;  %2904 = vmatprep.subr.bf16.mxu0 %v6296_v13  ;;  %v6423_v20 = vcombine.low %v406_v9, %v410_v10 }
  0x8f   :  { %v274_v16 = vld [vmem:[#allocation6 + $0x3a0] sm:$0xff]  ;;  %2905 = vmatpush2.bf16.msra.mxu0 %v6295_v19  ;;  %v146_v19 = vld [vmem:[#allocation3 + $0x48] sm:$0xff] }
  0x90   :  { %v398_v17 = vld [vmem:[#allocation6 + $0x780] sm:$0xff]  ;;  %v6288_v21 = vcombine.high %v270_v15, %v274_v16  ;;  %2947 = vmatprep.subr.bf16.mxu1 %v6424_v14  ;;  %v6287_v27 = vcombine.low %v270_v15, %v274_v16  ;;  %v137_v15 = vld [vmem:[#allocation3] sm:$0xff]  ;;  %v144_v16 = vld [vmem:[#allocation3 + $0x38] sm:$0xff] }
  0x91   :  { %v402_v18 = vld [vmem:[#allocation6 + $0x7a0] sm:$0xff]  ;;  %2948 = vmatpush2.bf16.msra.mxu1 %v6423_v20 }
  0x92   :  { %v6416_v22 = vcombine.high %v398_v17, %v402_v18  ;;  %v262_v23 = vld [vmem:[#allocation6 + $0x340] sm:$0xff]  ;;  %2906 = vmatprep.subr.bf16.mxu0 %v6288_v21  ;;  %v6415_v28 = vcombine.low %v398_v17, %v402_v18 }
  0x93   :  { %v266_v24 = vld [vmem:[#allocation6 + $0x360] sm:$0xff]  ;;  %2907 = vmatpush2.bf16.msra.mxu0 %v6287_v27 }
  0x94   :  { %v390_v25 = vld [vmem:[#allocation6 + $0x740] sm:$0xff]  ;;  %v6280_v29 = vcombine.high %v262_v23, %v266_v24  ;;  %2949 = vmatprep.subr.bf16.mxu1 %v6416_v22  ;;  %v6279_v35 = vcombine.low %v262_v23, %v266_v24  ;;  %v7742_v24 = vpack.c.bf16 %v144_v16, %v137_v15 }
  0x95   :  { %v394_v26 = vld [vmem:[#allocation6 + $0x760] sm:$0xff]  ;;  %2950 = vmatpush2.bf16.msra.mxu1 %v6415_v28 }
  0x96   :  { %v6408_v30 = vcombine.high %v390_v25, %v394_v26  ;;  %v254_v31 = vld [vmem:[#allocation6 + $0x300] sm:$0xff]  ;;  %2908 = vmatprep.subr.bf16.mxu0 %v6280_v29  ;;  %v6407_v36 = vcombine.low %v390_v25, %v394_v26  ;;  %v142_v29 = vld [vmem:[#allocation3 + $0x28] sm:$0xff] }
  0x97   :  { %v258_v32 = vld [vmem:[#allocation6 + $0x320] sm:$0xff]  ;;  %2909 = vmatpush2.bf16.msra.mxu0 %v6279_v35 }
  0x98   :  { %v382_v33 = vld [vmem:[#allocation6 + $0x700] sm:$0xff]  ;;  %v6272_v37 = vcombine.high %v254_v31, %v258_v32  ;;  %2951 = vmatprep.subr.bf16.mxu1 %v6408_v30  ;;  %v6271_v43 = vcombine.low %v254_v31, %v258_v32  ;;  %v149_v30 = vld [vmem:[#allocation3 + $0x60] sm:$0xff] }
  0x99   :  { %v386_v34 = vld [vmem:[#allocation6 + $0x720] sm:$0xff]  ;;  %2952 = vmatpush2.bf16.msra.mxu1 %v6407_v36 }
  0x9a   :  { %v6400_v38 = vcombine.high %v382_v33, %v386_v34  ;;  %v246_v39 = vld [vmem:[#allocation6 + $0x2c0] sm:$0xff]  ;;  %2910 = vmatprep.subr.bf16.mxu0 %v6272_v37  ;;  %v6399_v44 = vcombine.low %v382_v33, %v386_v34 }
  0x9b   :  { %v250_v40 = vld [vmem:[#allocation6 + $0x2e0] sm:$0xff]  ;;  %2911 = vmatpush2.bf16.msra.mxu0 %v6271_v43 }
  0x9c   :  { %v374_v41 = vld [vmem:[#allocation6 + $0x6c0] sm:$0xff]  ;;  %v6264_v45 = vcombine.high %v246_v39, %v250_v40  ;;  %2953 = vmatprep.subr.bf16.mxu1 %v6400_v38  ;;  %v6263_v51 = vcombine.low %v246_v39, %v250_v40  ;;  %v7747_v38 = vpack.c.bf16 %v149_v30, %v142_v29  ;;  %v150_v29 = vld [vmem:[#allocation3 + $0x68] sm:$0xff] }
  0x9d   :  { %v378_v42 = vld [vmem:[#allocation6 + $0x6e0] sm:$0xff]  ;;  %2954 = vmatpush2.bf16.msra.mxu1 %v6399_v44 }
  0x9e   :  { %v6392_v46 = vcombine.high %v374_v41, %v378_v42  ;;  %v238_v47 = vld [vmem:[#allocation6 + $0x280] sm:$0xff]  ;;  %2912 = vmatprep.subr.bf16.mxu0 %v6264_v45  ;;  %v6391_v52 = vcombine.low %v374_v41, %v378_v42 }
  0x9f   :  { %v242_v48 = vld [vmem:[#allocation6 + $0x2a0] sm:$0xff]  ;;  %2913 = vmatpush2.bf16.msra.mxu0 %v6263_v51 }
  0xa0   :  { %v366_v49 = vld [vmem:[#allocation6 + $0x680] sm:$0xff]  ;;  %v6256_v53 = vcombine.high %v238_v47, %v242_v48  ;;  %2955 = vmatprep.subr.bf16.mxu1 %v6392_v46  ;;  %v6255_v59 = vcombine.low %v238_v47, %v242_v48 }
  0xa1   :  { %v370_v50 = vld [vmem:[#allocation6 + $0x6a0] sm:$0xff]  ;;  %2956 = vmatpush2.bf16.msra.mxu1 %v6391_v52 }
  0xa2   :  { %v6384_v54 = vcombine.high %v366_v49, %v370_v50  ;;  %v230_v55 = vld [vmem:[#allocation6 + $0x240] sm:$0xff]  ;;  %2914 = vmatprep.subr.bf16.mxu0 %v6256_v53  ;;  %v6383_v61 = vcombine.low %v366_v49, %v370_v50 }
  0xa3   :  { %v234_v56 = vld [vmem:[#allocation6 + $0x260] sm:$0xff]  ;;  %2915 = vmatpush2.bf16.msra.mxu0 %v6255_v59 }
  0xa4   :  { %v358_v57 = vld [vmem:[#allocation6 + $0x640] sm:$0xff]  ;;  %v6248_v62 = vcombine.high %v230_v55, %v234_v56  ;;  %2957 = vmatprep.subr.bf16.mxu1 %v6384_v54  ;;  %v6247_v6 = vcombine.low %v230_v55, %v234_v56 }
  0xa5   :  { %v362_v58 = vld [vmem:[#allocation6 + $0x660] sm:$0xff]  ;;  %2958 = vmatpush2.bf16.msra.mxu1 %v6383_v61 }
  0xa6   :  { %v6376_v63 = vcombine.high %v358_v57, %v362_v58  ;;  %v222_v0 = vld [vmem:[#allocation6 + $0x200] sm:$0xff]  ;;  %2916 = vmatprep.subr.bf16.mxu0 %v6248_v62  ;;  %v6375_v7 = vcombine.low %v358_v57, %v362_v58 }
  0xa7   :  { %v226_v3 = vld [vmem:[#allocation6 + $0x220] sm:$0xff]  ;;  %2917 = vmatpush2.bf16.msra.mxu0 %v6247_v6 }
  0xa8   :  { %v350_v4 = vld [vmem:[#allocation6 + $0x600] sm:$0xff]  ;;  %v6240_v8 = vcombine.high %v222_v0, %v226_v3  ;;  %2959 = vmatprep.subr.bf16.mxu1 %v6376_v63  ;;  %v6239_v14 = vcombine.low %v222_v0, %v226_v3 }
  0xa9   :  { %v354_v5 = vld [vmem:[#allocation6 + $0x620] sm:$0xff]  ;;  %2960 = vmatpush2.bf16.msra.mxu1 %v6375_v7 }
  0xaa   :  { %v6368_v9 = vcombine.high %v350_v4, %v354_v5  ;;  %v470_v10 = vld [vmem:[#allocation6 + $0x9c0] sm:$0xff]  ;;  %2918 = vmatprep.subr.bf16.mxu0 %v6240_v8  ;;  %v6367_v17 = vcombine.low %v350_v4, %v354_v5 }
  0xab   :  { %v474_v11 = vld [vmem:[#allocation6 + $0x9e0] sm:$0xff]  ;;  %2919 = vmatpush2.bf16.msra.mxu0 %v6239_v14 }
  0xac   :  { %v598_v12 = vld [vmem:[#allocation6 + $0xdc0] sm:$0xff]  ;;  %v6488_v20 = vcombine.high %v470_v10, %v474_v11  ;;  %2961 = vmatprep.subr.bf16.mxu1 %v6368_v9  ;;  %v6487_v28 = vcombine.low %v470_v10, %v474_v11 }
  0xad   :  { %v602_v13 = vld [vmem:[#allocation6 + $0xde0] sm:$0xff]  ;;  %2962 = vmatpush2.bf16.msra.mxu1 %v6367_v17 }
  0xae   :  { %v139_v18 = vld [vmem:[#allocation3 + $0x10] sm:$0xff]  ;;  %v6616_v21 = vcombine.high %v598_v12, %v602_v13  ;;  %2974 = vmatprep.subr.bf16.mxu0 %v6488_v20  ;;  %v6615_v31 = vcombine.low %v598_v12, %v602_v13  ;;  %2921 = vmatmul.mubr.bf16.vlgmr.msra.gmra.mxu0 %v7742_v24 }
  0xaf   :  { %v462_v22 = vld [vmem:[#allocation6 + $0x980] sm:$0xff]  ;;  %v7744_v27 = vpack.c.bf16 %v146_v19, %v139_v18  ;;  %2975 = vmatpush1.bf16.msra.mxu0 %v6487_v28  ;;  %3006 = vmatprep.mubr.bf16.mxu0 %v7747_v38 }
  0xb0   :  { %v466_v23 = vld [vmem:[#allocation6 + $0x9a0] sm:$0xff]  ;;  %3017 = vmatprep.subr.bf16.mxu1 %v6616_v21 }
  0xb1   :  { %v590_v25 = vld [vmem:[#allocation6 + $0xd80] sm:$0xff]  ;;  %v6480_v32 = vcombine.high %v462_v22, %v466_v23  ;;  %2964 = vmatmul.mubr.bf16.vlgmr.msra.gmra.mxu1 %v7744_v27  ;;  %v6479_v39 = vcombine.low %v462_v22, %v466_v23  ;;  %v215_v23 = vld [vmem:[#allocation6 + $0x1c8] sm:$0xff] }
  0xb2   :  { %v594_v26 = vld [vmem:[#allocation6 + $0xda0] sm:$0xff]  ;;  %3018 = vmatpush1.bf16.msra.mxu1 %v6615_v31  ;;  %3049 = vmatprep.mubr.bf16.mxu1 %v7656_v1 }
  0xb3   :  { %v6608_v33 = vcombine.high %v590_v25, %v594_v26  ;;  %v454_v34 = vld [vmem:[#allocation6 + $0x940] sm:$0xff]  ;;  %2976 = vmatprep.subr.bf16.mxu0 %v6480_v32  ;;  %v6607_v40 = vcombine.low %v590_v25, %v594_v26  ;;  %v219_v26 = vld [vmem:[#allocation6 + $0x1e8] sm:$0xff] }
  0xb4   :  { %v458_v35 = vld [vmem:[#allocation6 + $0x960] sm:$0xff]  ;;  %2977 = vmatpush1.bf16.msra.mxu0 %v6479_v39 }
  0xb5   :  { %v582_v36 = vld [vmem:[#allocation6 + $0xd40] sm:$0xff]  ;;  %v6472_v41 = vcombine.high %v454_v34, %v458_v35  ;;  %3019 = vmatprep.subr.bf16.mxu1 %v6608_v33  ;;  %v6471_v47 = vcombine.low %v454_v34, %v458_v35  ;;  %v207_v35 = vld [vmem:[#allocation6 + $0x188] sm:$0xff] }
  0xb6   :  { %v586_v37 = vld [vmem:[#allocation6 + $0xd60] sm:$0xff]  ;;  %3020 = vmatpush1.bf16.msra.mxu1 %v6607_v40 }
  0xb7   :  { %v6600_v42 = vcombine.high %v582_v36, %v586_v37  ;;  %v446_v43 = vld [vmem:[#allocation6 + $0x900] sm:$0xff]  ;;  %2978 = vmatprep.subr.bf16.mxu0 %v6472_v41  ;;  %v6599_v48 = vcombine.low %v582_v36, %v586_v37  ;;  %v6234_v36 = vcombine.high %v215_v23, %v219_v26  ;;  %v211_v37 = vld [vmem:[#allocation6 + $0x1a8] sm:$0xff]  ;;  %v6233_v41 = vcombine.low %v215_v23, %v219_v26 }
  0xb8   :  { %v450_v44 = vld [vmem:[#allocation6 + $0x920] sm:$0xff]  ;;  %2979 = vmatpush1.bf16.msra.mxu0 %v6471_v47  ;;  %v203_v47 = vld [vmem:[#allocation6 + $0x168] sm:$0xff] }
  0xb9   :  { %v574_v45 = vld [vmem:[#allocation6 + $0xd00] sm:$0xff]  ;;  %v6464_v49 = vcombine.high %v446_v43, %v450_v44  ;;  %3021 = vmatprep.subr.bf16.mxu1 %v6600_v42  ;;  %v6463_v55 = vcombine.low %v446_v43, %v450_v44 }
  0xba   :  { %v578_v46 = vld [vmem:[#allocation6 + $0xd20] sm:$0xff]  ;;  %3022 = vmatpush1.bf16.msra.mxu1 %v6599_v48 }
  0xbb   :  { %v438_v50 = vld [vmem:[#allocation6 + $0x8c0] sm:$0xff]  ;;  %v6592_v53 = vcombine.high %v574_v45, %v578_v46  ;;  %2980 = vmatprep.subr.bf16.mxu0 %v6464_v49  ;;  %v6591_v56 = vcombine.low %v574_v45, %v578_v46  ;;  %v199_v45 = vld [vmem:[#allocation6 + $0x148] sm:$0xff]  ;;  %v6226_v46 = vcombine.high %v207_v35, %v211_v37  ;;  %v6225_v49 = vcombine.low %v207_v35, %v211_v37 }
  0xbc   :  { %v442_v51 = vld [vmem:[#allocation6 + $0x8e0] sm:$0xff]  ;;  %2981 = vmatpush1.bf16.msra.mxu0 %v6463_v55  ;;  %v195_v55 = vld [vmem:[#allocation6 + $0x128] sm:$0xff] }
  0xbd   :  { %v566_v52 = vld [vmem:[#allocation6 + $0xcc0] sm:$0xff]  ;;  %v6456_v57 = vcombine.high %v438_v50, %v442_v51  ;;  %3023 = vmatprep.subr.bf16.mxu1 %v6592_v53  ;;  %v6455_v0 = vcombine.low %v438_v50, %v442_v51  ;;  %v191_v53 = vld [vmem:[#allocation6 + $0x108] sm:$0xff] }
  0xbe   :  { %v570_v54 = vld [vmem:[#allocation6 + $0xce0] sm:$0xff]  ;;  %3024 = vmatpush1.bf16.msra.mxu1 %v6591_v56  ;;  %v148_v37 = vld [vmem:[#allocation3 + $0x58] sm:$0xff] }
  0xbf   :  { %v430_v58 = vld [vmem:[#allocation6 + $0x880] sm:$0xff]  ;;  %v6584_v62 = vcombine.high %v566_v52, %v570_v54  ;;  %2982 = vmatprep.subr.bf16.mxu0 %v6456_v57  ;;  %v6583_v3 = vcombine.low %v566_v52, %v570_v54  ;;  %v6218_v54 = vcombine.high %v199_v45, %v203_v47  ;;  %v6217_v57 = vcombine.low %v199_v45, %v203_v47  ;;  %v275_v45 = vld [vmem:[#allocation6 + $0x3a8] sm:$0xff] }
  0xc0   :  { %v434_v59 = vld [vmem:[#allocation6 + $0x8a0] sm:$0xff]  ;;  %2983 = vmatpush1.bf16.msra.mxu0 %v6455_v0  ;;  %v187_v0 = vld [vmem:[#allocation6 + $0xe8] sm:$0xff] }
  0xc1   :  { %v558_v61 = vld [vmem:[#allocation6 + $0xc80] sm:$0xff]  ;;  %v6448_v4 = vcombine.high %v430_v58, %v434_v59  ;;  %3025 = vmatprep.subr.bf16.mxu1 %v6584_v62  ;;  %v6447_v10 = vcombine.low %v430_v58, %v434_v59  ;;  %v183_v62 = vld [vmem:[#allocation6 + $0xc8] sm:$0xff] }
  0xc2   :  { %v562_v63 = vld [vmem:[#allocation6 + $0xca0] sm:$0xff]  ;;  %3026 = vmatpush1.bf16.msra.mxu1 %v6583_v3 }
  0xc3   :  { %v422_v5 = vld [vmem:[#allocation6 + $0x840] sm:$0xff]  ;;  %v6576_v8 = vcombine.high %v558_v61, %v562_v63  ;;  %2984 = vmatprep.subr.bf16.mxu0 %v6448_v4  ;;  %v6575_v11 = vcombine.low %v558_v61, %v562_v63  ;;  %v6210_v63 = vcombine.high %v191_v53, %v195_v55  ;;  %v6209_v4 = vcombine.low %v191_v53, %v195_v55  ;;  %v263_v53 = vld [vmem:[#allocation6 + $0x348] sm:$0xff] }
  0xc4   :  { %v426_v6 = vld [vmem:[#allocation6 + $0x860] sm:$0xff]  ;;  %2985 = vmatpush1.bf16.msra.mxu0 %v6447_v10  ;;  %v179_v10 = vld [vmem:[#allocation6 + $0xa8] sm:$0xff] }
  0xc5   :  { %v550_v7 = vld [vmem:[#allocation6 + $0xc40] sm:$0xff]  ;;  %v6440_v12 = vcombine.high %v422_v5, %v426_v6  ;;  %3027 = vmatprep.subr.bf16.mxu1 %v6576_v8  ;;  %v6439_v18 = vcombine.low %v422_v5, %v426_v6  ;;  %v175_v8 = vld [vmem:[#allocation6 + $0x88] sm:$0xff] }
  0xc6   :  { %v554_v9 = vld [vmem:[#allocation6 + $0xc60] sm:$0xff]  ;;  %3028 = vmatpush1.bf16.msra.mxu1 %v6575_v11 }
  0xc7   :  { %v414_v13 = vld [vmem:[#allocation6 + $0x800] sm:$0xff]  ;;  %v6568_v16 = vcombine.high %v550_v7, %v554_v9  ;;  %2986 = vmatprep.subr.bf16.mxu0 %v6440_v12  ;;  %v6567_v19 = vcombine.low %v550_v7, %v554_v9  ;;  %v6202_v9 = vcombine.high %v183_v62, %v187_v0  ;;  %v6201_v12 = vcombine.low %v183_v62, %v187_v0  ;;  %v255_v62 = vld [vmem:[#allocation6 + $0x308] sm:$0xff] }
  0xc8   :  { %v418_v14 = vld [vmem:[#allocation6 + $0x820] sm:$0xff]  ;;  %2987 = vmatpush1.bf16.msra.mxu0 %v6439_v18  ;;  %v171_v18 = vld [vmem:[#allocation6 + $0x68] sm:$0xff] }
  0xc9   :  { %v542_v15 = vld [vmem:[#allocation6 + $0xc00] sm:$0xff]  ;;  %v6432_v20 = vcombine.high %v414_v13, %v418_v14  ;;  %3029 = vmatprep.subr.bf16.mxu1 %v6568_v16  ;;  %v6431_v30 = vcombine.low %v414_v13, %v418_v14  ;;  %v167_v16 = vld [vmem:[#allocation6 + $0x48] sm:$0xff] }
  0xca   :  { %v546_v17 = vld [vmem:[#allocation6 + $0xc20] sm:$0xff]  ;;  %3030 = vmatpush1.bf16.msra.mxu1 %v6567_v19  ;;  %v6186_v26 = vcombine.high %v167_v16, %v171_v18  ;;  %v319_v0 = vld [vmem:[#allocation6 + $0x508] sm:$0xff] }
  0xcb   :  { %v534_v21 = vld [vmem:[#allocation6 + $0xbc0] sm:$0xff]  ;;  %v6560_v25 = vcombine.high %v542_v15, %v546_v17  ;;  %2988 = vmatprep.subr.bf16.mxu0 %v6432_v20  ;;  %v6559_v31 = vcombine.low %v542_v15, %v546_v17  ;;  %v6194_v17 = vcombine.high %v175_v8, %v179_v10  ;;  %v6193_v20 = vcombine.low %v175_v8, %v179_v10  ;;  %v247_v8 = vld [vmem:[#allocation6 + $0x2c8] sm:$0xff] }
  0xcc   :  { %v538_v22 = vld [vmem:[#allocation6 + $0xbe0] sm:$0xff]  ;;  %2989 = vmatpush1.bf16.msra.mxu0 %v6431_v30  ;;  %v6185_v30 = vcombine.low %v167_v16, %v171_v18  ;;  %v311_v10 = vld [vmem:[#allocation6 + $0x4c8] sm:$0xff] }
  0xcd   :  { %v143_v28 = vld [vmem:[#allocation3 + $0x30] sm:$0xff]  ;;  %v6552_v32 = vcombine.high %v534_v21, %v538_v22  ;;  %3031 = vmatprep.subr.bf16.mxu1 %v6560_v25  ;;  %v6551_v39 = vcombine.low %v534_v21, %v538_v22  ;;  %v159_v25 = vld [vmem:[#allocation6 + $0x8] sm:$0xff] }
  0xce   :  { %v526_v33 = vld [vmem:[#allocation6 + $0xb80] sm:$0xff]  ;;  %v7752_v40 = vpack.c.bf16 %v150_v29, %v143_v28  ;;  %3032 = vmatpush1.bf16.msra.mxu1 %v6559_v31  ;;  %v163_v28 = vld [vmem:[#allocation6 + $0x28] sm:$0xff] }
  0xcf   :  { %v530_v34 = vld [vmem:[#allocation6 + $0xba0] sm:$0xff]  ;;  %2990 = vmatprep.subr.bf16.mxu0 %v6552_v32  ;;  %3060 = vmatprep.subr.bf16.mxu1 %v6234_v36  ;;  %v279_v32 = vld [vmem:[#allocation6 + $0x3c8] sm:$0xff]  ;;  %v6178_v35 = vcombine.high %v159_v25, %v163_v28  ;;  %v141_v36 = vld [vmem:[#allocation3 + $0x20] sm:$0xff] }
  0xd0   :  { %v6544_v42 = vcombine.high %v526_v33, %v530_v34  ;;  %v518_v43 = vld [vmem:[#allocation6 + $0xb40] sm:$0xff]  ;;  %2991 = vmatpush2.bf16.msra.mxu0 %v6551_v39  ;;  %v6543_v48 = vcombine.low %v526_v33, %v530_v34  ;;  %v283_v33 = vld [vmem:[#allocation6 + $0x3e8] sm:$0xff] }
  0xd1   :  { %v522_v44 = vld [vmem:[#allocation6 + $0xb60] sm:$0xff]  ;;  %3050 = vmatmul.mubr.bf16.vlgmr.msra.gmra.mxu1 %v7752_v40  ;;  %v343_v34 = vld [vmem:[#allocation6 + $0x5c8] sm:$0xff]  ;;  %v6298_v47 = vcombine.high %v279_v32, %v283_v33 }
  0xd2   :  { %3061 = vmatpush1.bf16.msra.mxu1 %v6233_v41  ;;  %2992 = vmatprep.subr.bf16.mxu0 %v6544_v42  ;;  %v6536_v50 = vcombine.high %v518_v43, %v522_v44  ;;  %v510_v51 = vld [vmem:[#allocation6 + $0xb00] sm:$0xff]  ;;  %v6535_v56 = vcombine.low %v518_v43, %v522_v44  ;;  %v347_v39 = vld [vmem:[#allocation6 + $0x5e8] sm:$0xff]  ;;  %v6177_v42 = vcombine.low %v159_v25, %v163_v28 }
  0xd3   :  { %v514_v52 = vld [vmem:[#allocation6 + $0xb20] sm:$0xff]  ;;  %3062 = vmatprep.subr.bf16.mxu1 %v6226_v46  ;;  %3092 = vmatprep.mubr.bf16.mxu1 %v7736_v60  ;;  %v6362_v43 = vcombine.high %v343_v34, %v347_v39  ;;  %v271_v44 = vld [vmem:[#allocation6 + $0x388] sm:$0xff] }
  0xd4   :  { %2993 = vmatpush2.bf16.msra.mxu0 %v6543_v48  ;;  %v6528_v58 = vcombine.high %v510_v51, %v514_v52  ;;  %v502_v59 = vld [vmem:[#allocation6 + $0xac0] sm:$0xff]  ;;  %v6527_v3 = vcombine.low %v510_v51, %v514_v52  ;;  %v335_v46 = vld [vmem:[#allocation6 + $0x588] sm:$0xff]  ;;  %v6297_v51 = vcombine.low %v279_v32, %v283_v33  ;;  %v6290_v55 = vcombine.high %v271_v44, %v275_v45 }
  0xd5   :  { %2994 = vmatprep.subr.bf16.mxu0 %v6536_v50  ;;  %v506_v61 = vld [vmem:[#allocation6 + $0xae0] sm:$0xff]  ;;  %v339_v48 = vld [vmem:[#allocation6 + $0x5a8] sm:$0xff]  ;;  %v6361_v50 = vcombine.low %v343_v34, %v347_v39 }
  0xd6   :  { %3063 = vmatpush1.bf16.msra.mxu1 %v6225_v49  ;;  %v6520_v5 = vcombine.high %v502_v59, %v506_v61  ;;  %v494_v6 = vld [vmem:[#allocation6 + $0xa80] sm:$0xff]  ;;  %v6519_v11 = vcombine.low %v502_v59, %v506_v61  ;;  %v7756_v49 = vpack.c.bf16 %v148_v37, %v141_v36  ;;  %v6354_v52 = vcombine.high %v335_v46, %v339_v48  ;;  %v239_v16 = vld [vmem:[#allocation6 + $0x288] sm:$0xff] }
  0xd7   :  { %3064 = vmatprep.subr.bf16.mxu1 %v6218_v54  ;;  %v498_v7 = vld [vmem:[#allocation6 + $0xaa0] sm:$0xff]  ;;  %v267_v54 = vld [vmem:[#allocation6 + $0x368] sm:$0xff]  ;;  %v6289_v59 = vcombine.low %v271_v44, %v275_v45 }
  0xd8   :  { %2995 = vmatpush2.bf16.msra.mxu0 %v6535_v56  ;;  %v6512_v13 = vcombine.high %v494_v6, %v498_v7  ;;  %v486_v14 = vld [vmem:[#allocation6 + $0xa40] sm:$0xff]  ;;  %v6511_v19 = vcombine.low %v494_v6, %v498_v7  ;;  %v327_v56 = vld [vmem:[#allocation6 + $0x548] sm:$0xff]  ;;  %v6281_v6 = vcombine.low %v263_v53, %v267_v54 }
  0xd9   :  { %2996 = vmatprep.subr.bf16.mxu0 %v6528_v58  ;;  %v490_v15 = vld [vmem:[#allocation6 + $0xa60] sm:$0xff]  ;;  %v6353_v58 = vcombine.low %v335_v46, %v339_v48  ;;  %v303_v18 = vld [vmem:[#allocation6 + $0x488] sm:$0xff] }
  0xda   :  { %3065 = vmatpush1.bf16.msra.mxu1 %v6217_v57  ;;  %v6504_v21 = vcombine.high %v486_v14, %v490_v15  ;;  %v478_v22 = vld [vmem:[#allocation6 + $0xa00] sm:$0xff]  ;;  %v6503_v29 = vcombine.low %v486_v14, %v490_v15  ;;  %v331_v57 = vld [vmem:[#allocation6 + $0x568] sm:$0xff] }
  0xdb   :  { %3066 = vmatprep.subr.bf16.mxu1 %v6210_v63  ;;  %v482_v23 = vld [vmem:[#allocation6 + $0xa20] sm:$0xff]  ;;  %v6346_v61 = vcombine.high %v327_v56, %v331_v57  ;;  %v259_v63 = vld [vmem:[#allocation6 + $0x328] sm:$0xff] }
  0xdc   :  { %2997 = vmatpush2.bf16.msra.mxu0 %v6527_v3  ;;  %v6496_v31 = vcombine.high %v478_v22, %v482_v23  ;;  %v6495_v41 = vcombine.low %v478_v22, %v482_v23  ;;  %v6282_v3 = vcombine.high %v263_v53, %v267_v54  ;;  %v6273_v14 = vcombine.low %v255_v62, %v259_v63  ;;  %v231_v25 = vld [vmem:[#allocation6 + $0x248] sm:$0xff] }
  0xdd   :  { %2998 = vmatprep.subr.bf16.mxu0 %v6520_v5  ;;  %v6345_v5 = vcombine.low %v327_v56, %v331_v57  ;;  %v295_v28 = vld [vmem:[#allocation6 + $0x448] sm:$0xff] }
  0xde   :  { %3067 = vmatpush1.bf16.msra.mxu1 %v6209_v4  ;;  %v323_v4 = vld [vmem:[#allocation6 + $0x528] sm:$0xff] }
  0xdf   :  { %3068 = vmatprep.subr.bf16.mxu1 %v6202_v9  ;;  %v6338_v7 = vcombine.high %v319_v0, %v323_v4  ;;  %v251_v9 = vld [vmem:[#allocation6 + $0x2e8] sm:$0xff] }
  0xe0   :  { %2999 = vmatpush2.bf16.msra.mxu0 %v6519_v11  ;;  %v6274_v11 = vcombine.high %v255_v62, %v259_v63  ;;  %v6265_v22 = vcombine.low %v247_v8, %v251_v9  ;;  %v223_v34 = vld [vmem:[#allocation6 + $0x208] sm:$0xff] }
  0xe1   :  { %3000 = vmatprep.subr.bf16.mxu0 %v6512_v13  ;;  %v6337_v13 = vcombine.low %v319_v0, %v323_v4  ;;  %v287_v36 = vld [vmem:[#allocation6 + $0x408] sm:$0xff] }
  0xe2   :  { %3069 = vmatpush1.bf16.msra.mxu1 %v6201_v12  ;;  %v315_v12 = vld [vmem:[#allocation6 + $0x4e8] sm:$0xff] }
  0xe3   :  { %3070 = vmatprep.subr.bf16.mxu1 %v6194_v17  ;;  %v6330_v15 = vcombine.high %v311_v10, %v315_v12  ;;  %v243_v17 = vld [vmem:[#allocation6 + $0x2a8] sm:$0xff] }
  0xe4   :  { %3001 = vmatpush2.bf16.msra.mxu0 %v6511_v19  ;;  %v6266_v19 = vcombine.high %v247_v8, %v251_v9  ;;  %v6257_v32 = vcombine.low %v239_v16, %v243_v17  ;;  %v291_v39 = vld [vmem:[#allocation6 + $0x428] sm:$0xff] }
  0xe5   :  { %3002 = vmatprep.subr.bf16.mxu0 %v6504_v21  ;;  %v6329_v21 = vcombine.low %v311_v10, %v315_v12  ;;  %v407_v44 = vld [vmem:[#allocation6 + $0x7c8] sm:$0xff] }
  0xe6   :  { %3071 = vmatpush1.bf16.msra.mxu1 %v6193_v20  ;;  %v307_v20 = vld [vmem:[#allocation6 + $0x4a8] sm:$0xff] }
  0xe7   :  { %3072 = vmatprep.subr.bf16.mxu1 %v6186_v26  ;;  %v6322_v23 = vcombine.high %v303_v18, %v307_v20  ;;  %v235_v26 = vld [vmem:[#allocation6 + $0x268] sm:$0xff] }
  0xe8   :  { %3003 = vmatpush2.bf16.msra.mxu0 %v6503_v29  ;;  %v6258_v29 = vcombine.high %v239_v16, %v243_v17  ;;  %v6250_v37 = vcombine.high %v231_v25, %v235_v26  ;;  %v411_v45 = vld [vmem:[#allocation6 + $0x7e8] sm:$0xff] }
  0xe9   :  { %3004 = vmatprep.subr.bf16.mxu0 %v6496_v31  ;;  %v6321_v31 = vcombine.low %v303_v18, %v307_v20  ;;  %v471_v46 = vld [vmem:[#allocation6 + $0x9c8] sm:$0xff] }
  0xea   :  { %3073 = vmatpush1.bf16.msra.mxu1 %v6185_v30  ;;  %v299_v30 = vld [vmem:[#allocation6 + $0x468] sm:$0xff] }
  0xeb   :  { %3074 = vmatprep.subr.bf16.mxu1 %v6178_v35  ;;  %v6314_v33 = vcombine.high %v295_v28, %v299_v30  ;;  %v227_v35 = vld [vmem:[#allocation6 + $0x228] sm:$0xff] }
  0xec   :  { %3005 = vmatpush2.bf16.msra.mxu0 %v6495_v41  ;;  %v6313_v41 = vcombine.low %v295_v28, %v299_v30  ;;  %v475_v48 = vld [vmem:[#allocation6 + $0x9e8] sm:$0xff] }
  0xed   :  { %3103 = vmatprep.subr.bf16.mxu0 %v6362_v43  ;;  %v6306_v43 = vcombine.high %v287_v36, %v291_v39  ;;  %v399_v53 = vld [vmem:[#allocation6 + $0x788] sm:$0xff]  ;;  %v6490_v56 = vcombine.high %v471_v46, %v475_v48 }
  0xee   :  { %3075 = vmatpush1.bf16.msra.mxu1 %v6177_v42  ;;  %v6249_v42 = vcombine.low %v231_v25, %v235_v26  ;;  %v403_v54 = vld [vmem:[#allocation6 + $0x7a8] sm:$0xff] }
  0xef   :  { %3076 = vmatprep.subr.bf16.mxu1 %v6298_v47  ;;  %3007 = vmatmul.mubr.bf16.vlgmr.msra.gmra.mxu0 %v7756_v49  ;;  %v6242_v47 = vcombine.high %v223_v34, %v227_v35  ;;  %v467_v57 = vld [vmem:[#allocation6 + $0x9a8] sm:$0xff] }
  0xf0   :  { %3104 = vmatpush1.bf16.msra.mxu0 %v6361_v50  ;;  %3135 = vmatprep.mubr.bf16.mxu0 %v7738_v2  ;;  %v6305_v50 = vcombine.low %v287_v36, %v291_v39  ;;  %v391_v62 = vld [vmem:[#allocation6 + $0x748] sm:$0xff] }
  0xf1   :  { %3105 = vmatprep.subr.bf16.mxu0 %v6354_v52  ;;  %v6426_v52 = vcombine.high %v407_v44, %v411_v45  ;;  %v395_v63 = vld [vmem:[#allocation6 + $0x768] sm:$0xff] }
  0xf2   :  { %3077 = vmatpush2.bf16.msra.mxu1 %v6297_v51  ;;  %v6241_v51 = vcombine.low %v223_v34, %v227_v35  ;;  %v455_v0 = vld [vmem:[#allocation6 + $0x948] sm:$0xff] }
  0xf3   :  { %3078 = vmatprep.subr.bf16.mxu1 %v6290_v55  ;;  %v463_v55 = vld [vmem:[#allocation6 + $0x988] sm:$0xff] }
  0xf4   :  { %3106 = vmatpush1.bf16.msra.mxu0 %v6353_v58  ;;  %v6425_v58 = vcombine.low %v407_v44, %v411_v45  ;;  %v459_v4 = vld [vmem:[#allocation6 + $0x968] sm:$0xff] }
  0xf5   :  { %3107 = vmatprep.subr.bf16.mxu0 %v6346_v61  ;;  %v6418_v61 = vcombine.high %v399_v53, %v403_v54  ;;  %v383_v8 = vld [vmem:[#allocation6 + $0x708] sm:$0xff] }
  0xf6   :  { %3079 = vmatpush2.bf16.msra.mxu1 %v6289_v59  ;;  %v6489_v59 = vcombine.low %v471_v46, %v475_v48  ;;  %v387_v9 = vld [vmem:[#allocation6 + $0x728] sm:$0xff] }
  0xf7   :  { %3080 = vmatprep.subr.bf16.mxu1 %v6282_v3  ;;  %v6482_v3 = vcombine.high %v463_v55, %v467_v57  ;;  %v447_v10 = vld [vmem:[#allocation6 + $0x908] sm:$0xff] }
  0xf8   :  { %3108 = vmatpush1.bf16.msra.mxu0 %v6345_v5  ;;  %v6417_v5 = vcombine.low %v399_v53, %v403_v54  ;;  %v451_v12 = vld [vmem:[#allocation6 + $0x928] sm:$0xff] }
  0xf9   :  { %3109 = vmatprep.subr.bf16.mxu0 %v6338_v7  ;;  %v6410_v7 = vcombine.high %v391_v62, %v395_v63  ;;  %v375_v16 = vld [vmem:[#allocation6 + $0x6c8] sm:$0xff] }
  0xfa   :  { %3081 = vmatpush2.bf16.msra.mxu1 %v6281_v6  ;;  %v6481_v6 = vcombine.low %v463_v55, %v467_v57  ;;  %v379_v17 = vld [vmem:[#allocation6 + $0x6e8] sm:$0xff] }
  0xfb   :  { %3082 = vmatprep.subr.bf16.mxu1 %v6274_v11  ;;  %v6474_v11 = vcombine.high %v455_v0, %v459_v4  ;;  %v439_v18 = vld [vmem:[#allocation6 + $0x8c8] sm:$0xff] }
  0xfc   :  { %3110 = vmatpush1.bf16.msra.mxu0 %v6337_v13  ;;  %v6409_v13 = vcombine.low %v391_v62, %v395_v63  ;;  %v443_v20 = vld [vmem:[#allocation6 + $0x8e8] sm:$0xff] }
  0xfd   :  { %3111 = vmatprep.subr.bf16.mxu0 %v6330_v15  ;;  %v6402_v15 = vcombine.high %v383_v8, %v387_v9  ;;  %v367_v25 = vld [vmem:[#allocation6 + $0x688] sm:$0xff] }
  0xfe   :  { %3083 = vmatpush2.bf16.msra.mxu1 %v6273_v14  ;;  %v6473_v14 = vcombine.low %v455_v0, %v459_v4  ;;  %v371_v26 = vld [vmem:[#allocation6 + $0x6a8] sm:$0xff] }
  0xff   :  { %3084 = vmatprep.subr.bf16.mxu1 %v6266_v19  ;;  %v6466_v19 = vcombine.high %v447_v10, %v451_v12  ;;  %v431_v28 = vld [vmem:[#allocation6 + $0x888] sm:$0xff] }
 0x100   :  { %3112 = vmatpush1.bf16.msra.mxu0 %v6329_v21  ;;  %v6401_v21 = vcombine.low %v383_v8, %v387_v9  ;;  %v435_v30 = vld [vmem:[#allocation6 + $0x8a8] sm:$0xff] }
 0x101   :  { %3113 = vmatprep.subr.bf16.mxu0 %v6322_v23  ;;  %v6394_v23 = vcombine.high %v375_v16, %v379_v17  ;;  %v359_v34 = vld [vmem:[#allocation6 + $0x648] sm:$0xff] }
 0x102   :  { %3085 = vmatpush2.bf16.msra.mxu1 %v6265_v22  ;;  %v6465_v22 = vcombine.low %v447_v10, %v451_v12  ;;  %v363_v35 = vld [vmem:[#allocation6 + $0x668] sm:$0xff] }
 0x103   :  { %3086 = vmatprep.subr.bf16.mxu1 %v6258_v29  ;;  %v6458_v29 = vcombine.high %v439_v18, %v443_v20  ;;  %v423_v36 = vld [vmem:[#allocation6 + $0x848] sm:$0xff] }
 0x104   :  { %3114 = vmatpush1.bf16.msra.mxu0 %v6321_v31  ;;  %v6393_v31 = vcombine.low %v375_v16, %v379_v17  ;;  %v427_v39 = vld [vmem:[#allocation6 + $0x868] sm:$0xff] }
 0x105   :  { %3115 = vmatprep.subr.bf16.mxu0 %v6314_v33  ;;  %v6386_v33 = vcombine.high %v367_v25, %v371_v26  ;;  %v351_v44 = vld [vmem:[#allocation6 + $0x608] sm:$0xff] }
 0x106   :  { %3087 = vmatpush2.bf16.msra.mxu1 %v6257_v32  ;;  %v6457_v32 = vcombine.low %v439_v18, %v443_v20  ;;  %v355_v45 = vld [vmem:[#allocation6 + $0x628] sm:$0xff] }
 0x107   :  { %3088 = vmatprep.subr.bf16.mxu1 %v6250_v37  ;;  %v6450_v37 = vcombine.high %v431_v28, %v435_v30  ;;  %v415_v46 = vld [vmem:[#allocation6 + $0x808] sm:$0xff] }
 0x108   :  { %3116 = vmatpush1.bf16.msra.mxu0 %v6313_v41  ;;  %v6385_v41 = vcombine.low %v367_v25, %v371_v26  ;;  %v419_v48 = vld [vmem:[#allocation6 + $0x828] sm:$0xff] }
 0x109   :  { %3117 = vmatprep.subr.bf16.mxu0 %v6306_v43  ;;  %v6378_v43 = vcombine.high %v359_v34, %v363_v35  ;;  %v535_v53 = vld [vmem:[#allocation6 + $0xbc8] sm:$0xff] }
 0x10a   :  { %3089 = vmatpush2.bf16.msra.mxu1 %v6249_v42  ;;  %v6449_v42 = vcombine.low %v431_v28, %v435_v30  ;;  %v539_v54 = vld [vmem:[#allocation6 + $0xbe8] sm:$0xff] }
 0x10b   :  { %3090 = vmatprep.subr.bf16.mxu1 %v6242_v47  ;;  %v6442_v47 = vcombine.high %v423_v36, %v427_v39  ;;  %v599_v55 = vld [vmem:[#allocation6 + $0xdc8] sm:$0xff] }
 0x10c   :  { %3118 = vmatpush1.bf16.msra.mxu0 %v6305_v50  ;;  %v6377_v50 = vcombine.low %v359_v34, %v363_v35  ;;  %v603_v57 = vld [vmem:[#allocation6 + $0xde8] sm:$0xff] }
 0x10d   :  { %3119 = vmatprep.subr.bf16.mxu0 %v6426_v52  ;;  %v6370_v52 = vcombine.high %v351_v44, %v355_v45  ;;  %v527_v62 = vld [vmem:[#allocation6 + $0xb88] sm:$0xff] }
 0x10e   :  { %3091 = vmatpush2.bf16.msra.mxu1 %v6241_v51  ;;  %v6441_v51 = vcombine.low %v423_v36, %v427_v39  ;;  %v531_v63 = vld [vmem:[#allocation6 + $0xba8] sm:$0xff] }
 0x10f   :  { %3146 = vmatprep.subr.bf16.mxu1 %v6490_v56  ;;  %v6434_v56 = vcombine.high %v415_v46, %v419_v48  ;;  %v591_v0 = vld [vmem:[#allocation6 + $0xd88] sm:$0xff] }
 0x110   :  { %3120 = vmatpush2.bf16.msra.mxu0 %v6425_v58  ;;  %v6369_v58 = vcombine.low %v351_v44, %v355_v45  ;;  %v595_v4 = vld [vmem:[#allocation6 + $0xda8] sm:$0xff] }
 0x111   :  { %3093 = vmatmul.mubr.bf16.vlgmr.msra.gmra.mxu1 %v7742_v24  ;;  %3121 = vmatprep.subr.bf16.mxu0 %v6418_v61  ;;  %v6618_v61 = vcombine.high %v599_v55, %v603_v57  ;;  %v519_v8 = vld [vmem:[#allocation6 + $0xb48] sm:$0xff] }
 0x112   :  { %3147 = vmatpush1.bf16.msra.mxu1 %v6489_v59  ;;  %3178 = vmatprep.mubr.bf16.mxu1 %v7747_v38  ;;  %v6433_v59 = vcombine.low %v415_v46, %v419_v48  ;;  %v523_v9 = vld [vmem:[#allocation6 + $0xb68] sm:$0xff] }
 0x113   :  { %3148 = vmatprep.subr.bf16.mxu1 %v6482_v3  ;;  %v6554_v3 = vcombine.high %v535_v53, %v539_v54  ;;  %v583_v10 = vld [vmem:[#allocation6 + $0xd48] sm:$0xff] }
 0x114   :  { %3122 = vmatpush2.bf16.msra.mxu0 %v6417_v5  ;;  %v6617_v5 = vcombine.low %v599_v55, %v603_v57  ;;  %v587_v12 = vld [vmem:[#allocation6 + $0xd68] sm:$0xff] }
 0x115   :  { %3123 = vmatprep.subr.bf16.mxu0 %v6410_v7  ;;  %v6610_v7 = vcombine.high %v591_v0, %v595_v4  ;;  %v511_v16 = vld [vmem:[#allocation6 + $0xb08] sm:$0xff] }
 0x116   :  { %3149 = vmatpush1.bf16.msra.mxu1 %v6481_v6  ;;  %v6553_v6 = vcombine.low %v535_v53, %v539_v54  ;;  %v515_v17 = vld [vmem:[#allocation6 + $0xb28] sm:$0xff] }
 0x117   :  { %3150 = vmatprep.subr.bf16.mxu1 %v6474_v11  ;;  %v6546_v11 = vcombine.high %v527_v62, %v531_v63  ;;  %v575_v18 = vld [vmem:[#allocation6 + $0xd08] sm:$0xff] }
 0x118   :  { %3124 = vmatpush2.bf16.msra.mxu0 %v6409_v13  ;;  %v6609_v13 = vcombine.low %v591_v0, %v595_v4  ;;  %v579_v20 = vld [vmem:[#allocation6 + $0xd28] sm:$0xff]  ;;  %v344_v0 = vld [vmem:[#allocation6 + $0x5d0] sm:$0xff] }
 0x119   :  { %3125 = vmatprep.subr.bf16.mxu0 %v6402_v15  ;;  %v6602_v15 = vcombine.high %v583_v10, %v587_v12  ;;  %v503_v25 = vld [vmem:[#allocation6 + $0xac8] sm:$0xff]  ;;  %v348_v4 = vld [vmem:[#allocation6 + $0x5f0] sm:$0xff] }
 0x11a   :  { %3151 = vmatpush1.bf16.msra.mxu1 %v6473_v14  ;;  %v6545_v14 = vcombine.low %v527_v62, %v531_v63  ;;  %v507_v26 = vld [vmem:[#allocation6 + $0xae8] sm:$0xff]  ;;  %v216_v62 = vld [vmem:[#allocation6 + $0x1d0] sm:$0xff] }
 0x11b   :  { %3152 = vmatprep.subr.bf16.mxu1 %v6466_v19  ;;  %v6538_v19 = vcombine.high %v519_v8, %v523_v9  ;;  %v567_v28 = vld [vmem:[#allocation6 + $0xcc8] sm:$0xff]  ;;  %v220_v63 = vld [vmem:[#allocation6 + $0x1f0] sm:$0xff] }
 0x11c   :  { %3126 = vmatpush2.bf16.msra.mxu0 %v6401_v21  ;;  %v6601_v21 = vcombine.low %v583_v10, %v587_v12  ;;  %v571_v30 = vld [vmem:[#allocation6 + $0xce8] sm:$0xff]  ;;  %v336_v10 = vld [vmem:[#allocation6 + $0x590] sm:$0xff] }
 0x11d   :  { %3127 = vmatprep.subr.bf16.mxu0 %v6394_v23  ;;  %v6594_v23 = vcombine.high %v575_v18, %v579_v20  ;;  %v495_v34 = vld [vmem:[#allocation6 + $0xa88] sm:$0xff]  ;;  %v340_v12 = vld [vmem:[#allocation6 + $0x5b0] sm:$0xff] }
 0x11e   :  { %3153 = vmatpush1.bf16.msra.mxu1 %v6465_v22  ;;  %v6537_v22 = vcombine.low %v519_v8, %v523_v9  ;;  %v499_v35 = vld [vmem:[#allocation6 + $0xaa8] sm:$0xff]  ;;  %v208_v8 = vld [vmem:[#allocation6 + $0x190] sm:$0xff] }
 0x11f   :  { %3154 = vmatprep.subr.bf16.mxu1 %v6458_v29  ;;  %v6530_v29 = vcombine.high %v511_v16, %v515_v17  ;;  %v559_v36 = vld [vmem:[#allocation6 + $0xc88] sm:$0xff]  ;;  %v212_v9 = vld [vmem:[#allocation6 + $0x1b0] sm:$0xff] }
 0x120   :  { %3128 = vmatpush2.bf16.msra.mxu0 %v6393_v31  ;;  %v6593_v31 = vcombine.low %v575_v18, %v579_v20  ;;  %v563_v39 = vld [vmem:[#allocation6 + $0xca8] sm:$0xff]  ;;  %v328_v18 = vld [vmem:[#allocation6 + $0x550] sm:$0xff] }
 0x121   :  { %3129 = vmatprep.subr.bf16.mxu0 %v6386_v33  ;;  %v6586_v33 = vcombine.high %v567_v28, %v571_v30  ;;  %v487_v44 = vld [vmem:[#allocation6 + $0xa48] sm:$0xff]  ;;  %v332_v20 = vld [vmem:[#allocation6 + $0x570] sm:$0xff] }
 0x122   :  { %3155 = vmatpush1.bf16.msra.mxu1 %v6457_v32  ;;  %v6529_v32 = vcombine.low %v511_v16, %v515_v17  ;;  %v491_v45 = vld [vmem:[#allocation6 + $0xa68] sm:$0xff]  ;;  %v200_v16 = vld [vmem:[#allocation6 + $0x150] sm:$0xff] }
 0x123   :  { %3156 = vmatprep.subr.bf16.mxu1 %v6450_v37  ;;  %v6522_v37 = vcombine.high %v503_v25, %v507_v26  ;;  %v551_v46 = vld [vmem:[#allocation6 + $0xc48] sm:$0xff]  ;;  %v204_v17 = vld [vmem:[#allocation6 + $0x170] sm:$0xff] }
 0x124   :  { %3130 = vmatpush2.bf16.msra.mxu0 %v6385_v41  ;;  %v6585_v41 = vcombine.low %v567_v28, %v571_v30  ;;  %v555_v48 = vld [vmem:[#allocation6 + $0xc68] sm:$0xff]  ;;  %v6348_v28 = vcombine.high %v328_v18, %v332_v20  ;;  %v324_v30 = vld [vmem:[#allocation6 + $0x530] sm:$0xff] }
 0x125   :  { %3131 = vmatprep.subr.bf16.mxu0 %v6378_v43  ;;  %v6578_v43 = vcombine.high %v559_v36, %v563_v39  ;;  %v479_v53 = vld [vmem:[#allocation6 + $0xa08] sm:$0xff] }
 0x126   :  { %3157 = vmatpush1.bf16.msra.mxu1 %v6449_v42  ;;  %v6521_v42 = vcombine.low %v503_v25, %v507_v26  ;;  %v483_v54 = vld [vmem:[#allocation6 + $0xa28] sm:$0xff]  ;;  %v192_v25 = vld [vmem:[#allocation6 + $0x110] sm:$0xff] }
 0x127   :  { %3158 = vmatprep.subr.bf16.mxu1 %v6442_v47  ;;  %v6514_v47 = vcombine.high %v495_v34, %v499_v35  ;;  %v543_v55 = vld [vmem:[#allocation6 + $0xc08] sm:$0xff]  ;;  %v196_v26 = vld [vmem:[#allocation6 + $0x130] sm:$0xff] }
 0x128   :  { %3132 = vmatpush2.bf16.msra.mxu0 %v6377_v50  ;;  %v6577_v50 = vcombine.low %v559_v36, %v563_v39  ;;  %v547_v57 = vld [vmem:[#allocation6 + $0xc28] sm:$0xff]  ;;  %v188_v36 = vld [vmem:[#allocation6 + $0xf0] sm:$0xff] }
 0x129   :  { %3133 = vmatprep.subr.bf16.mxu0 %v6370_v52  ;;  %v6570_v52 = vcombine.high %v551_v46, %v555_v48  ;;  %v316_v39 = vld [vmem:[#allocation6 + $0x4f0] sm:$0xff] }
 0x12a   :  { %3159 = vmatpush1.bf16.msra.mxu1 %v6441_v51  ;;  %v6513_v51 = vcombine.low %v495_v34, %v499_v35  ;;  %v184_v35 = vld [vmem:[#allocation6 + $0xd0] sm:$0xff] }
 0x12b   :  { %3160 = vmatprep.subr.bf16.mxu1 %v6434_v56  ;;  %v6506_v56 = vcombine.high %v487_v44, %v491_v45 }
 0x12c   :  { %3134 = vmatpush2.bf16.msra.mxu0 %v6369_v58  ;;  %v6569_v58 = vcombine.low %v551_v46, %v555_v48  ;;  %v180_v46 = vld [vmem:[#allocation6 + $0xb0] sm:$0xff] }
 0x12d   :  { %3189 = vmatprep.subr.bf16.mxu0 %v6618_v61  ;;  %v6562_v61 = vcombine.high %v543_v55, %v547_v57  ;;  %v308_v48 = vld [vmem:[#allocation6 + $0x4b0] sm:$0xff] }
 0x12e   :  { %3161 = vmatpush1.bf16.msra.mxu1 %v6433_v59  ;;  %v6505_v59 = vcombine.low %v487_v44, %v491_v45  ;;  %v176_v45 = vld [vmem:[#allocation6 + $0x90] sm:$0xff] }
 0x12f   :  { %3162 = vmatprep.subr.bf16.mxu1 %v6554_v3  ;;  %3136 = vmatmul.mubr.bf16.vlgmr.msra.gmra.mxu0 %v7744_v27  ;;  %v6498_v3 = vcombine.high %v479_v53, %v483_v54 }
 0x130   :  { %3190 = vmatpush1.bf16.msra.mxu0 %v6617_v5  ;;  %3221 = vmatprep.mubr.bf16.mxu0 %v7656_v1  ;;  %v6561_v5 = vcombine.low %v543_v55, %v547_v57  ;;  %v172_v55 = vld [vmem:[#allocation6 + $0x70] sm:$0xff] }
 0x131   :  { %3191 = vmatprep.subr.bf16.mxu0 %v6610_v7  ;;  %v6236_v7 = vcombine.high %v216_v62, %v220_v63  ;;  %v300_v57 = vld [vmem:[#allocation6 + $0x470] sm:$0xff] }
 0x132   :  { %3163 = vmatpush2.bf16.msra.mxu1 %v6553_v6  ;;  %v6497_v6 = vcombine.low %v479_v53, %v483_v54  ;;  %v168_v54 = vld [vmem:[#allocation6 + $0x50] sm:$0xff] }
 0x133   :  { %3164 = vmatprep.subr.bf16.mxu1 %v6546_v11  ;;  %v6364_v11 = vcombine.high %v344_v0, %v348_v4 }
 0x134   :  { %3192 = vmatpush1.bf16.msra.mxu0 %v6609_v13  ;;  %v6235_v13 = vcombine.low %v216_v62, %v220_v63  ;;  %v6188_v62 = vcombine.high %v168_v54, %v172_v55 }
 0x135   :  { %3193 = vmatprep.subr.bf16.mxu0 %v6602_v15  ;;  %v6228_v15 = vcombine.high %v208_v8, %v212_v9 }
 0x136   :  { %3165 = vmatpush2.bf16.msra.mxu1 %v6545_v14  ;;  %v6363_v14 = vcombine.low %v344_v0, %v348_v4  ;;  %v160_v0 = vld [vmem:[#allocation6 + $0x10] sm:$0xff] }
 0x137   :  { %3166 = vmatprep.subr.bf16.mxu1 %v6538_v19  ;;  %v6356_v19 = vcombine.high %v336_v10, %v340_v12  ;;  %v288_v4 = vld [vmem:[#allocation6 + $0x410] sm:$0xff] }
 0x138   :  { %3194 = vmatpush1.bf16.msra.mxu0 %v6601_v21  ;;  %v6227_v21 = vcombine.low %v208_v8, %v212_v9 }
 0x139   :  { %3195 = vmatprep.subr.bf16.mxu0 %v6594_v23  ;;  %v6220_v23 = vcombine.high %v200_v16, %v204_v17 }
 0x13a   :  { %3167 = vmatpush2.bf16.msra.mxu1 %v6537_v22  ;;  %v6355_v22 = vcombine.low %v336_v10, %v340_v12  ;;  %v284_v12 = vld [vmem:[#allocation6 + $0x3f0] sm:$0xff] }
 0x13b   :  { %3168 = vmatprep.subr.bf16.mxu1 %v6530_v29  ;;  %v320_v29 = vld [vmem:[#allocation6 + $0x510] sm:$0xff] }
 0x13c   :  { %3196 = vmatpush1.bf16.msra.mxu0 %v6593_v31  ;;  %v6219_v31 = vcombine.low %v200_v16, %v204_v17  ;;  %v6340_v34 = vcombine.high %v320_v29, %v324_v30 }
 0x13d   :  { %3197 = vmatprep.subr.bf16.mxu0 %v6586_v33  ;;  %v6212_v33 = vcombine.high %v192_v25, %v196_v26 }
 0x13e   :  { %3169 = vmatpush2.bf16.msra.mxu1 %v6529_v32  ;;  %v6347_v32 = vcombine.low %v328_v18, %v332_v20  ;;  %v7773_v18 = vld [vmem:[#allocation8] sm:$0xff] }
 0x13f   :  { %3170 = vmatprep.subr.bf16.mxu1 %v6522_v37  ;;  %v312_v37 = vld [vmem:[#allocation6 + $0x4d0] sm:$0xff] }
 0x140   :  { %3198 = vmatpush1.bf16.msra.mxu0 %v6585_v41  ;;  %v6211_v41 = vcombine.low %v192_v25, %v196_v26  ;;  %v6332_v44 = vcombine.high %v312_v37, %v316_v39  ;;  %v404_v25 = vld [vmem:[#allocation6 + $0x7b0] sm:$0xff] }
 0x141   :  { %3199 = vmatprep.subr.bf16.mxu0 %v6578_v43  ;;  %v6204_v43 = vcombine.high %v184_v35, %v188_v36 }
 0x142   :  { %3171 = vmatpush2.bf16.msra.mxu1 %v6521_v42  ;;  %v6339_v42 = vcombine.low %v320_v29, %v324_v30 }
 0x143   :  { %3172 = vmatprep.subr.bf16.mxu1 %v6514_v47  ;;  %v304_v47 = vld [vmem:[#allocation6 + $0x490] sm:$0xff] }
 0x144   :  { %3200 = vmatpush1.bf16.msra.mxu0 %v6577_v50  ;;  %v6203_v50 = vcombine.low %v184_v35, %v188_v36  ;;  %v6324_v53 = vcombine.high %v304_v47, %v308_v48  ;;  %v392_v35 = vld [vmem:[#allocation6 + $0x750] sm:$0xff] }
 0x145   :  { %3201 = vmatprep.subr.bf16.mxu0 %v6570_v52  ;;  %v6196_v52 = vcombine.high %v176_v45, %v180_v46  ;;  %v396_v36 = vld [vmem:[#allocation6 + $0x770] sm:$0xff] }
 0x146   :  { %3173 = vmatpush2.bf16.msra.mxu1 %v6513_v51  ;;  %v6331_v51 = vcombine.low %v312_v37, %v316_v39 }
 0x147   :  { %3174 = vmatprep.subr.bf16.mxu1 %v6506_v56  ;;  %v296_v56 = vld [vmem:[#allocation6 + $0x450] sm:$0xff] }
 0x148   :  { %3202 = vmatpush1.bf16.msra.mxu0 %v6569_v58  ;;  %v6195_v58 = vcombine.low %v176_v45, %v180_v46  ;;  %v6316_v63 = vcombine.high %v296_v56, %v300_v57  ;;  %v6315_v8 = vcombine.low %v296_v56, %v300_v57  ;;  %v6411_v57 = vcombine.low %v392_v35, %v396_v36 }
 0x149   :  { %3203 = vmatprep.subr.bf16.mxu0 %v6562_v61  ;;  %v6323_v61 = vcombine.low %v304_v47, %v308_v48  ;;  %v6412_v47 = vcombine.high %v392_v35, %v396_v36  ;;  %v256_v48 = vld [vmem:[#allocation6 + $0x310] sm:$0xff] }
 0x14a   :  { %3175 = vmatpush2.bf16.msra.mxu1 %v6505_v59  ;;  %v608_v59 = vlaneseq }
 0x14b   :  { %3176 = vmatprep.subr.bf16.mxu1 %v6498_v3  ;;  %v164_v3 = vld [vmem:[#allocation6 + $0x30] sm:$0xff] }
 0x14c   :  { %3204 = vmatpush1.bf16.msra.mxu0 %v6561_v5  ;;  %v292_v5 = vld [vmem:[#allocation6 + $0x430] sm:$0xff]  ;;  %v6180_v9 = vcombine.high %v160_v0, %v164_v3 }
 0x14d   :  { %3232 = vmatprep.subr.bf16.mxu0 %v6236_v7  ;;  %v7768_v7 = vshrl.u32 %v608_v59, 7  ;;  %v6308_v10 = vcombine.high %v288_v4, %v292_v5  ;;  %v6307_v17 = vcombine.low %v288_v4, %v292_v5 }
 0x14e   :  { %3177 = vmatpush2.bf16.msra.mxu1 %v6497_v6  ;;  %v6187_v6 = vcombine.low %v168_v54, %v172_v55 }
 0x14f   :  { %3275 = vmatprep.subr.bf16.mxu1 %v6364_v11  ;;  %3222 = vmatmul.mubr.bf16.vlgmr.msra.gmra.mxu0 %v7752_v40  ;;  %v280_v11 = vld [vmem:[#allocation6 + $0x3d0] sm:$0xff]  ;;  %v7771_v16 = vsub.s32 0, %v7768_v7 }
 0x150   :  { %3233 = vmatpush1.bf16.msra.mxu0 %v6235_v13  ;;  %3264 = vmatprep.mubr.bf16.mxu0 %v7736_v60  ;;  %v408_v13 = vld [vmem:[#allocation6 + $0x7d0] sm:$0xff] }
 0x151   :  { %3179 = vmatmul.mubr.bf16.vlgmr.msra.gmra.mxu1 %v7756_v49  ;;  %3234 = vmatprep.subr.bf16.mxu0 %v6228_v15  ;;  %v6179_v15 = vcombine.low %v160_v0, %v164_v3  ;;  %v611_v26 = vrot.slane %v7773_v18, %v7771_v16  ;;  %v376_v0 = vld [vmem:[#allocation6 + $0x6d0] sm:$0xff] }
 0x152   :  { %3276 = vmatpush1.bf16.msra.mxu1 %v6363_v14  ;;  %3307 = vmatprep.mubr.bf16.mxu1 %v7738_v2  ;;  %v412_v14 = vld [vmem:[#allocation6 + $0x7f0] sm:$0xff] }
 0x153   :  { %3277 = vmatprep.subr.bf16.mxu1 %v6356_v19  ;;  %v6300_v19 = vcombine.high %v280_v11, %v284_v12  ;;  %v6428_v20 = vcombine.high %v408_v13, %v412_v14  ;;  %v6427_v29 = vcombine.low %v408_v13, %v412_v14  ;;  %v380_v3 = vld [vmem:[#allocation6 + $0x6f0] sm:$0xff] }
 0x154   :  { %3235 = vmatpush1.bf16.msra.mxu0 %v6227_v21  ;;  %v272_v21 = vld [vmem:[#allocation6 + $0x390] sm:$0xff]  ;;  %v6395_v14 = vcombine.low %v376_v0, %v380_v3 }
 0x155   :  { %3236 = vmatprep.subr.bf16.mxu0 %v6220_v23  ;;  %v400_v23 = vld [vmem:[#allocation6 + $0x790] sm:$0xff] }
 0x156   :  { %3278 = vmatpush1.bf16.msra.mxu1 %v6355_v22  ;;  %v276_v22 = vld [vmem:[#allocation6 + $0x3b0] sm:$0xff] }
 0x157   :  { %3279 = vmatprep.subr.bf16.mxu1 %v6348_v28  ;;  %v6299_v28 = vcombine.low %v280_v11, %v284_v12  ;;  %v6292_v30 = vcombine.high %v272_v21, %v276_v22  ;;  %v368_v11 = vld [vmem:[#allocation6 + $0x690] sm:$0xff] }
 0x158   :  { %3237 = vmatpush1.bf16.msra.mxu0 %v6219_v31  ;;  %v6420_v31 = vcombine.high %v400_v23, %v404_v25  ;;  %v372_v12 = vld [vmem:[#allocation6 + $0x6b0] sm:$0xff] }
 0x159   :  { %3238 = vmatprep.subr.bf16.mxu0 %v6212_v33  ;;  %v268_v33 = vld [vmem:[#allocation6 + $0x370] sm:$0xff] }
 0x15a   :  { %3280 = vmatpush1.bf16.msra.mxu1 %v6347_v32  ;;  %v264_v32 = vld [vmem:[#allocation6 + $0x350] sm:$0xff] }
 0x15b   :  { %3281 = vmatprep.subr.bf16.mxu1 %v6340_v34  ;;  %v6283_v55 = vcombine.low %v264_v32, %v268_v33 }
 0x15c   :  { %3239 = vmatpush1.bf16.msra.mxu0 %v6211_v41  ;;  %v6291_v41 = vcombine.low %v272_v21, %v276_v22  ;;  %v360_v21 = vld [vmem:[#allocation6 + $0x650] sm:$0xff] }
 0x15d   :  { %3240 = vmatprep.subr.bf16.mxu0 %v6204_v43  ;;  %v6419_v43 = vcombine.low %v400_v23, %v404_v25  ;;  %v364_v22 = vld [vmem:[#allocation6 + $0x670] sm:$0xff]  ;;  %v6387_v25 = vcombine.low %v368_v11, %v372_v12 }
 0x15e   :  { %3282 = vmatpush1.bf16.msra.mxu1 %v6339_v42 }
 0x15f   :  { %3283 = vmatprep.subr.bf16.mxu1 %v6332_v44  ;;  %v6284_v44 = vcombine.high %v264_v32, %v268_v33  ;;  %v356_v32 = vld [vmem:[#allocation6 + $0x630] sm:$0xff] }
 0x160   :  { %3241 = vmatpush1.bf16.msra.mxu0 %v6203_v50  ;;  %v260_v50 = vld [vmem:[#allocation6 + $0x330] sm:$0xff] }
 0x161   :  { %3242 = vmatprep.subr.bf16.mxu0 %v6196_v52  ;;  %v384_v52 = vld [vmem:[#allocation6 + $0x710] sm:$0xff]  ;;  %v6275_v4 = vcombine.low %v256_v48, %v260_v50 }
 0x162   :  { %3284 = vmatpush1.bf16.msra.mxu1 %v6331_v51 }
 0x163   :  { %3285 = vmatprep.subr.bf16.mxu1 %v6324_v53  ;;  %v388_v53 = vld [vmem:[#allocation6 + $0x730] sm:$0xff] }
 0x164   :  { %3243 = vmatpush1.bf16.msra.mxu0 %v6195_v58  ;;  %v6276_v58 = vcombine.high %v256_v48, %v260_v50  ;;  %v6403_v5 = vcombine.low %v384_v52, %v388_v53 }
 0x165   :  { %3244 = vmatprep.subr.bf16.mxu0 %v6188_v62  ;;  %v248_v62 = vld [vmem:[#allocation6 + $0x2d0] sm:$0xff] }
 0x166   :  { %3286 = vmatpush1.bf16.msra.mxu1 %v6323_v61  ;;  %v6404_v61 = vcombine.high %v384_v52, %v388_v53  ;;  %v468_v52 = vld [vmem:[#allocation6 + $0x9b0] sm:$0xff] }
 0x167   :  { %3287 = vmatprep.subr.bf16.mxu1 %v6316_v63  ;;  %v252_v63 = vld [vmem:[#allocation6 + $0x2f0] sm:$0xff] }
 0x168   :  { %3245 = vmatpush1.bf16.msra.mxu0 %v6187_v6  ;;  %v6268_v6 = vcombine.high %v248_v62, %v252_v63  ;;  %v6267_v13 = vcombine.low %v248_v62, %v252_v63  ;;  %v592_v53 = vld [vmem:[#allocation6 + $0xd90] sm:$0xff] }
 0x169   :  { %3246 = vmatprep.subr.bf16.mxu0 %v6180_v9  ;;  %v240_v9 = vld [vmem:[#allocation6 + $0x290] sm:$0xff] }
 0x16a   :  { %3288 = vmatpush1.bf16.msra.mxu1 %v6315_v8  ;;  %v6396_v8 = vcombine.high %v376_v0, %v380_v3  ;;  %v460_v62 = vld [vmem:[#allocation6 + $0x970] sm:$0xff] }
 0x16b   :  { %3289 = vmatprep.subr.bf16.mxu1 %v6308_v10  ;;  %v244_v10 = vld [vmem:[#allocation6 + $0x2b0] sm:$0xff] }
 0x16c   :  { %3247 = vmatpush1.bf16.msra.mxu0 %v6179_v15  ;;  %v6260_v15 = vcombine.high %v240_v9, %v244_v10  ;;  %v6259_v23 = vcombine.low %v240_v9, %v244_v10  ;;  %v584_v63 = vld [vmem:[#allocation6 + $0xd50] sm:$0xff] }
 0x16d   :  { %3248 = vmatprep.subr.bf16.mxu0 %v6300_v19  ;;  %v232_v19 = vld [vmem:[#allocation6 + $0x250] sm:$0xff] }
 0x16e   :  { %3290 = vmatpush1.bf16.msra.mxu1 %v6307_v17  ;;  %v2922_v34 = vpop.f32.mrf.mxu0  ;;  %v6388_v17 = vcombine.high %v368_v11, %v372_v12  ;;  %v588_v0 = vld [vmem:[#allocation6 + $0xd70] sm:$0xff] }
 0x16f   :  { %3291 = vmatprep.subr.bf16.mxu1 %v6428_v20  ;;  %v2923_v37 = vadd.f32 %v2922_v34, %v611_v26  ;;  %v236_v20 = vld [vmem:[#allocation6 + $0x270] sm:$0xff]  ;;  %v6379_v34 = vcombine.low %v360_v21, %v364_v22 }
 0x170   :  { %3249 = vmatpush2.bf16.msra.mxu0 %v6299_v28  ;;  %v7777_v42 = vpop.f32.mrf.mxu0  ;;  %v6380_v28 = vcombine.high %v360_v21, %v364_v22  ;;  %v6251_v33 = vcombine.low %v232_v19, %v236_v20  ;;  %v452_v9 = vld [vmem:[#allocation6 + $0x930] sm:$0xff] }
 0x171   :  { %v2965_v39 = vpop.f32.mrf.mxu1  ;;  %3250 = vmatprep.subr.bf16.mxu0 %v6292_v30  ;;  %v228_v30 = vld [vmem:[#allocation6 + $0x230] sm:$0xff] }
 0x172   :  { %3292 = vmatpush2.bf16.msra.mxu1 %v6427_v29  ;;  %v7779_v45 = vadd.f32 %v2965_v39, %v2923_v37  ;;  %v2926_v51 = vpop.f32.mrf.mxu0  ;;  %v224_v29 = vld [vmem:[#allocation6 + $0x210] sm:$0xff] }
 0x173   :  { %v7781_v46 = vpop.f32.mrf.mxu1  ;;  %3293 = vmatprep.subr.bf16.mxu1 %v6420_v31  ;;  %v2927_v54 = vadd.f32 %v2926_v51, %v611_v26  ;;  %v6252_v26 = vcombine.high %v232_v19, %v236_v20  ;;  %v352_v31 = vld [vmem:[#allocation6 + $0x610] sm:$0xff]  ;;  %v6244_v35 = vcombine.high %v224_v29, %v228_v30 }
 0x174   :  { %3251 = vmatpush2.bf16.msra.mxu0 %v6291_v41  ;;  %v6372_v36 = vcombine.high %v352_v31, %v356_v32  ;;  %v472_v37 = vld [vmem:[#allocation6 + $0x9d0] sm:$0xff] }
 0x175   :  { %v2969_v56 = vpop.f32.mrf.mxu1  ;;  %3252 = vmatprep.subr.bf16.mxu0 %v6284_v44  ;;  %v476_v39 = vld [vmem:[#allocation6 + $0x9f0] sm:$0xff]  ;;  %v6243_v44 = vcombine.low %v224_v29, %v228_v30 }
 0x176   :  { %3294 = vmatpush2.bf16.msra.mxu1 %v6419_v43  ;;  %v7783_v59 = vadd.f32 %v2969_v56, %v2927_v54  ;;  %v600_v41 = vld [vmem:[#allocation6 + $0xdd0] sm:$0xff]  ;;  %v6492_v48 = vcombine.high %v472_v37, %v476_v39 }
 0x177   :  { %3295 = vmatprep.subr.bf16.mxu1 %v6412_v47  ;;  %v604_v43 = vld [vmem:[#allocation6 + $0xdf0] sm:$0xff]  ;;  %v6371_v47 = vcombine.low %v352_v31, %v356_v32 }
 0x178   :  { %3253 = vmatpush2.bf16.msra.mxu0 %v6283_v55  ;;  %v6620_v50 = vcombine.high %v600_v41, %v604_v43  ;;  %v464_v51 = vld [vmem:[#allocation6 + $0x990] sm:$0xff]  ;;  %v6491_v55 = vcombine.low %v472_v37, %v476_v39  ;;  %v6619_v56 = vcombine.low %v600_v41, %v604_v43 }
 0x179   :  { %3254 = vmatprep.subr.bf16.mxu0 %v6276_v58  ;;  %v596_v54 = vld [vmem:[#allocation6 + $0xdb0] sm:$0xff]  ;;  %v6483_v3 = vcombine.low %v464_v51, %v468_v52 }
 0x17a   :  { %3296 = vmatpush2.bf16.msra.mxu1 %v6411_v57  ;;  %v6484_v57 = vcombine.high %v464_v51, %v468_v52  ;;  %v6612_v58 = vcombine.high %v592_v53, %v596_v54  ;;  %v576_v10 = vld [vmem:[#allocation6 + $0xd10] sm:$0xff] }
 0x17b   :  { %3297 = vmatprep.subr.bf16.mxu1 %v6404_v61  ;;  %v456_v61 = vld [vmem:[#allocation6 + $0x950] sm:$0xff] }
 0x17c   :  { %3255 = vmatpush2.bf16.msra.mxu0 %v6275_v4  ;;  %v6611_v4 = vcombine.low %v592_v53, %v596_v54  ;;  %v580_v11 = vld [vmem:[#allocation6 + $0xd30] sm:$0xff]  ;;  %v6475_v12 = vcombine.low %v456_v61, %v460_v62 }
 0x17d   :  { %3256 = vmatprep.subr.bf16.mxu0 %v6268_v6  ;;  %v6604_v6 = vcombine.high %v584_v63, %v588_v0  ;;  %v444_v19 = vld [vmem:[#allocation6 + $0x8f0] sm:$0xff] }
 0x17e   :  { %3298 = vmatpush2.bf16.msra.mxu1 %v6403_v5  ;;  %v6476_v5 = vcombine.high %v456_v61, %v460_v62  ;;  %v568_v20 = vld [vmem:[#allocation6 + $0xcd0] sm:$0xff]  ;;  %v217_v62 = vld [vmem:[#allocation6 + $0x1d8] sm:$0xff] }
 0x17f   :  { %3299 = vmatprep.subr.bf16.mxu1 %v6396_v8  ;;  %v448_v8 = vld [vmem:[#allocation6 + $0x910] sm:$0xff] }
 0x180   :  { %3257 = vmatpush2.bf16.msra.mxu0 %v6267_v13  ;;  %v6603_v13 = vcombine.low %v584_v63, %v588_v0  ;;  %v572_v21 = vld [vmem:[#allocation6 + $0xcf0] sm:$0xff]  ;;  %v6467_v22 = vcombine.low %v448_v8, %v452_v9  ;;  %v221_v63 = vld [vmem:[#allocation6 + $0x1f8] sm:$0xff] }
 0x181   :  { %3258 = vmatprep.subr.bf16.mxu0 %v6260_v15  ;;  %v6596_v15 = vcombine.high %v576_v10, %v580_v11  ;;  %v436_v29 = vld [vmem:[#allocation6 + $0x8b0] sm:$0xff] }
 0x182   :  { %3300 = vmatpush2.bf16.msra.mxu1 %v6395_v14  ;;  %v6468_v14 = vcombine.high %v448_v8, %v452_v9  ;;  %v560_v30 = vld [vmem:[#allocation6 + $0xc90] sm:$0xff]  ;;  %v7789_v9 = vpop.f32.mrf.mxu1 }
 0x183   :  { %3301 = vmatprep.subr.bf16.mxu1 %v6388_v17  ;;  %v440_v17 = vld [vmem:[#allocation6 + $0x8d0] sm:$0xff] }
 0x184   :  { %3259 = vmatpush2.bf16.msra.mxu0 %v6259_v23  ;;  %v6595_v23 = vcombine.low %v576_v10, %v580_v11  ;;  %v564_v31 = vld [vmem:[#allocation6 + $0xcb0] sm:$0xff]  ;;  %v6459_v32 = vcombine.low %v440_v17, %v444_v19  ;;  %v209_v10 = vld [vmem:[#allocation6 + $0x198] sm:$0xff] }
 0x185   :  { %3260 = vmatprep.subr.bf16.mxu0 %v6252_v26  ;;  %v6588_v26 = vcombine.high %v568_v20, %v572_v21  ;;  %v428_v37 = vld [vmem:[#allocation6 + $0x870] sm:$0xff]  ;;  %v213_v11 = vld [vmem:[#allocation6 + $0x1b8] sm:$0xff] }
 0x186   :  { %3302 = vmatpush2.bf16.msra.mxu1 %v6387_v25  ;;  %v6460_v25 = vcombine.high %v440_v17, %v444_v19  ;;  %v552_v39 = vld [vmem:[#allocation6 + $0xc50] sm:$0xff]  ;;  %v6230_v19 = vcombine.high %v209_v10, %v213_v11 }
 0x187   :  { %3303 = vmatprep.subr.bf16.mxu1 %v6380_v28  ;;  %v432_v28 = vld [vmem:[#allocation6 + $0x890] sm:$0xff] }
 0x188   :  { %3261 = vmatpush2.bf16.msra.mxu0 %v6251_v33  ;;  %v6587_v33 = vcombine.low %v568_v20, %v572_v21  ;;  %v556_v41 = vld [vmem:[#allocation6 + $0xc70] sm:$0xff]  ;;  %v6451_v43 = vcombine.low %v432_v28, %v436_v29 }
 0x189   :  { %3262 = vmatprep.subr.bf16.mxu0 %v6244_v35  ;;  %v6580_v35 = vcombine.high %v560_v30, %v564_v31  ;;  %v420_v51 = vld [vmem:[#allocation6 + $0x830] sm:$0xff] }
 0x18a   :  { %3304 = vmatpush2.bf16.msra.mxu1 %v6379_v34  ;;  %v6452_v34 = vcombine.high %v432_v28, %v436_v29  ;;  %v544_v52 = vld [vmem:[#allocation6 + $0xc10] sm:$0xff] }
 0x18b   :  { %3305 = vmatprep.subr.bf16.mxu1 %v6372_v36  ;;  %v424_v36 = vld [vmem:[#allocation6 + $0x850] sm:$0xff] }
 0x18c   :  { %3263 = vmatpush2.bf16.msra.mxu0 %v6243_v44  ;;  %v6579_v44 = vcombine.low %v560_v30, %v564_v31  ;;  %v548_v53 = vld [vmem:[#allocation6 + $0xc30] sm:$0xff]  ;;  %v6443_v54 = vcombine.low %v424_v36, %v428_v37  ;;  %v6229_v31 = vcombine.low %v209_v10, %v213_v11 }
 0x18d   :  { %3318 = vmatprep.subr.bf16.mxu0 %v6492_v48  ;;  %v6572_v48 = vcombine.high %v552_v39, %v556_v41  ;;  %v540_v61 = vld [vmem:[#allocation6 + $0xbf0] sm:$0xff] }
 0x18e   :  { %3306 = vmatpush2.bf16.msra.mxu1 %v6371_v47  ;;  %v6444_v47 = vcombine.high %v424_v36, %v428_v37  ;;  %v532_v8 = vld [vmem:[#allocation6 + $0xbb0] sm:$0xff]  ;;  %v193_v37 = vld [vmem:[#allocation6 + $0x118] sm:$0xff] }
 0x18f   :  { %3361 = vmatprep.subr.bf16.mxu1 %v6620_v50  ;;  %3265 = vmatmul.mubr.bf16.vlgmr.msra.gmra.mxu0 %v7742_v24  ;;  %v416_v50 = vld [vmem:[#allocation6 + $0x810] sm:$0xff] }
 0x190   :  { %3319 = vmatpush1.bf16.msra.mxu0 %v6491_v55  ;;  %3350 = vmatprep.mubr.bf16.mxu0 %v7747_v38  ;;  %v6571_v55 = vcombine.low %v552_v39, %v556_v41  ;;  %v6435_v0 = vcombine.low %v416_v50, %v420_v51  ;;  %v520_v20 = vld [vmem:[#allocation6 + $0xb50] sm:$0xff]  ;;  %v197_v39 = vld [vmem:[#allocation6 + $0x138] sm:$0xff] }
 0x191   :  { %3308 = vmatmul.mubr.bf16.vlgmr.msra.gmra.mxu1 %v7744_v27  ;;  %3320 = vmatprep.subr.bf16.mxu0 %v6484_v57  ;;  %v6564_v57 = vcombine.high %v544_v52, %v548_v53  ;;  %v524_v21 = vld [vmem:[#allocation6 + $0xb70] sm:$0xff] }
 0x192   :  { %3362 = vmatpush1.bf16.msra.mxu1 %v6619_v56  ;;  %3393 = vmatprep.mubr.bf16.mxu1 %v7656_v1  ;;  %v6436_v56 = vcombine.high %v416_v50, %v420_v51  ;;  %v516_v36 = vld [vmem:[#allocation6 + $0xb30] sm:$0xff] }
 0x193   :  { %3363 = vmatprep.subr.bf16.mxu1 %v6612_v58  ;;  %v536_v58 = vld [vmem:[#allocation6 + $0xbd0] sm:$0xff] }
 0x194   :  { %3321 = vmatpush1.bf16.msra.mxu0 %v6483_v3  ;;  %v6563_v3 = vcombine.low %v544_v52, %v548_v53  ;;  %v6214_v52 = vcombine.high %v193_v37, %v197_v39  ;;  %v504_v53 = vld [vmem:[#allocation6 + $0xad0] sm:$0xff] }
 0x195   :  { %3322 = vmatprep.subr.bf16.mxu0 %v6476_v5  ;;  %v6238_v5 = vcombine.high %v217_v62, %v221_v63 }
 0x196   :  { %3364 = vmatpush1.bf16.msra.mxu1 %v6611_v4  ;;  %v6556_v4 = vcombine.high %v536_v58, %v540_v61 }
 0x197   :  { %3365 = vmatprep.subr.bf16.mxu1 %v6604_v6  ;;  %v528_v6 = vld [vmem:[#allocation6 + $0xb90] sm:$0xff] }
 0x198   :  { %3323 = vmatpush1.bf16.msra.mxu0 %v6475_v12  ;;  %v6555_v12 = vcombine.low %v536_v58, %v540_v61  ;;  %v6548_v17 = vcombine.high %v528_v6, %v532_v8  ;;  %v6547_v28 = vcombine.low %v528_v6, %v532_v8 }
 0x199   :  { %3324 = vmatprep.subr.bf16.mxu0 %v6468_v14  ;;  %v3051_v14 = vpop.f32.mrf.mxu1 }
 0x19a   :  { %3366 = vmatpush1.bf16.msra.mxu1 %v6603_v13  ;;  %v7791_v13 = vpop.f32.mrf.mxu0 }
 0x19b   :  { %3367 = vmatprep.subr.bf16.mxu1 %v6596_v15  ;;  %v6237_v15 = vcombine.low %v217_v62, %v221_v63  ;;  %v7795_v29 = vpop.f32.mrf.mxu1 }
 0x19c   :  { %3325 = vmatpush1.bf16.msra.mxu0 %v6467_v22 }
 0x19d   :  { %3326 = vmatprep.subr.bf16.mxu0 %v6460_v25  ;;  %v205_v25 = vld [vmem:[#allocation6 + $0x178] sm:$0xff] }
 0x19e   :  { %3368 = vmatpush1.bf16.msra.mxu1 %v6595_v23  ;;  %v201_v23 = vld [vmem:[#allocation6 + $0x158] sm:$0xff] }
 0x19f   :  { %3369 = vmatprep.subr.bf16.mxu1 %v6588_v26 }
 0x1a0   :  { %3327 = vmatpush1.bf16.msra.mxu0 %v6459_v32  ;;  %v6540_v32 = vcombine.high %v520_v20, %v524_v21 }
 0x1a1   :  { %3328 = vmatprep.subr.bf16.mxu0 %v6452_v34  ;;  %v6222_v34 = vcombine.high %v201_v23, %v205_v25 }
 0x1a2   :  { %3370 = vmatpush1.bf16.msra.mxu1 %v6587_v33 }
 0x1a3   :  { %3371 = vmatprep.subr.bf16.mxu1 %v6580_v35  ;;  %v512_v35 = vld [vmem:[#allocation6 + $0xb10] sm:$0xff] }
 0x1a4   :  { %3329 = vmatpush1.bf16.msra.mxu0 %v6451_v43  ;;  %v6539_v43 = vcombine.low %v520_v20, %v524_v21 }
 0x1a5   :  { %3330 = vmatprep.subr.bf16.mxu0 %v6444_v47  ;;  %v6221_v47 = vcombine.low %v201_v23, %v205_v25  ;;  %v480_v25 = vld [vmem:[#allocation6 + $0xa10] sm:$0xff] }
 0x1a6   :  { %3372 = vmatpush1.bf16.msra.mxu1 %v6579_v44  ;;  %v3055_v44 = vpop.f32.mrf.mxu1 }
 0x1a7   :  { %3373 = vmatprep.subr.bf16.mxu1 %v6572_v48  ;;  %v6532_v48 = vcombine.high %v512_v35, %v516_v36 }
 0x1a8   :  { %3331 = vmatpush1.bf16.msra.mxu0 %v6443_v54  ;;  %v508_v54 = vld [vmem:[#allocation6 + $0xaf0] sm:$0xff] }
 0x1a9   :  { %3332 = vmatprep.subr.bf16.mxu0 %v6436_v56  ;;  %v6524_v58 = vcombine.high %v504_v53, %v508_v54  ;;  %v6523_v8 = vcombine.low %v504_v53, %v508_v54 }
 0x1aa   :  { %3374 = vmatpush1.bf16.msra.mxu1 %v6571_v55  ;;  %v189_v55 = vld [vmem:[#allocation6 + $0xf8] sm:$0xff] }
 0x1ab   :  { %3375 = vmatprep.subr.bf16.mxu1 %v6564_v57  ;;  %v6213_v57 = vcombine.low %v193_v37, %v197_v39  ;;  %v281_v37 = vld [vmem:[#allocation6 + $0x3d8] sm:$0xff] }
 0x1ac   :  { %3333 = vmatpush1.bf16.msra.mxu0 %v6435_v0  ;;  %v496_v0 = vld [vmem:[#allocation6 + $0xa90] sm:$0xff]  ;;  %v285_v39 = vld [vmem:[#allocation6 + $0x3f8] sm:$0xff] }
 0x1ad   :  { %3334 = vmatprep.subr.bf16.mxu0 %v6556_v4  ;;  %v177_v4 = vld [vmem:[#allocation6 + $0x98] sm:$0xff]  ;;  %v6301_v54 = vcombine.low %v281_v37, %v285_v39 }
 0x1ae   :  { %3376 = vmatpush1.bf16.msra.mxu1 %v6563_v3  ;;  %v500_v3 = vld [vmem:[#allocation6 + $0xab0] sm:$0xff] }
 0x1af   :  { %3404 = vmatprep.subr.bf16.mxu1 %v6238_v5  ;;  %v3008_v22 = vpop.f32.mrf.mxu0  ;;  %v181_v5 = vld [vmem:[#allocation6 + $0xb8] sm:$0xff]  ;;  %v6516_v11 = vcombine.high %v496_v0, %v500_v3  ;;  %v6515_v20 = vcombine.low %v496_v0, %v500_v3 }
 0x1b0   :  { %v3009_v26 = vadd.f32 %v3008_v22, %v7779_v45  ;;  %3335 = vmatpush2.bf16.msra.mxu0 %v6555_v12  ;;  %v6198_v12 = vcombine.high %v177_v4, %v181_v5  ;;  %v6197_v21 = vcombine.low %v177_v4, %v181_v5  ;;  %v321_v3 = vld [vmem:[#allocation6 + $0x518] sm:$0xff] }
 0x1b1   :  { %3394 = vmatmul.mubr.bf16.vlgmr.msra.gmra.mxu1 %v7752_v40  ;;  %v7797_v30 = vpop.f32.mrf.mxu0  ;;  %3336 = vmatprep.subr.bf16.mxu0 %v6548_v17  ;;  %v169_v17 = vld [vmem:[#allocation6 + $0x58] sm:$0xff] }
 0x1b2   :  { %3405 = vmatpush1.bf16.msra.mxu1 %v6237_v15  ;;  %v3052_v33 = vadd.f32 %v3051_v14, %v3009_v26  ;;  %3436 = vmatprep.mubr.bf16.mxu1 %v7736_v60  ;;  %v185_v60 = vld [vmem:[#allocation6 + $0xd8] sm:$0xff]  ;;  %v488_v14 = vld [vmem:[#allocation6 + $0xa50] sm:$0xff] }
 0x1b3   :  { %3406 = vmatprep.subr.bf16.mxu1 %v6230_v19  ;;  %v3012_v45 = vpop.f32.mrf.mxu0  ;;  %v6206_v63 = vcombine.high %v185_v60, %v189_v55  ;;  %v6205_v10 = vcombine.low %v185_v60, %v189_v55  ;;  %v492_v15 = vld [vmem:[#allocation6 + $0xa70] sm:$0xff]  ;;  %v173_v19 = vld [vmem:[#allocation6 + $0x78] sm:$0xff] }
 0x1b4   :  { %v3013_v41 = vadd.f32 %v3012_v45, %v7783_v59  ;;  %3337 = vmatpush2.bf16.msra.mxu0 %v6547_v28  ;;  %v3592_v50 = vmul.f32 0.2, %v3052_v33  ;;  %vm3576_vm0 = vcmp.gt.f32.partialorder %v3052_v33, 0.0  ;;  %v6531_v59 = vcombine.low %v512_v35, %v516_v36  ;;  %v484_v26 = vld [vmem:[#allocation6 + $0xa30] sm:$0xff]  ;;  %v161_v28 = vld [vmem:[#allocation6 + $0x18] sm:$0xff] }
 0x1b5   :  { %3338 = vmatprep.subr.bf16.mxu0 %v6540_v32  ;;  %v6508_v22 = vcombine.high %v488_v14, %v492_v15  ;;  %v6190_v23 = vcombine.high %v169_v17, %v173_v19  ;;  %v6507_v32 = vcombine.low %v488_v14, %v492_v15  ;;  %v345_v36 = vld [vmem:[#allocation6 + $0x5d8] sm:$0xff] }
 0x1b6   :  { %3407 = vmatpush1.bf16.msra.mxu1 %v6229_v31  ;;  %v3056_v51 = vadd.f32 %v3055_v44, %v3013_v41  ;;  %v3608_v61 = vsel %vm3576_vm0, %v3052_v33, %v3592_v50  ;;  %v165_v31 = vld [vmem:[#allocation6 + $0x38] sm:$0xff]  ;;  %v6189_v33 = vcombine.low %v169_v17, %v173_v19  ;;  %v6499_v41 = vcombine.low %v480_v25, %v484_v26 }
 0x1b7   :  { %3408 = vmatprep.subr.bf16.mxu1 %v6222_v34  ;;  %v6500_v34 = vcombine.high %v480_v25, %v484_v26  ;;  %v6182_v35 = vcombine.high %v161_v28, %v165_v31  ;;  %v349_v45 = vld [vmem:[#allocation6 + $0x5f8] sm:$0xff] }
 0x1b8   :  { %vm3584_vm1 = vcmp.gt.f32.partialorder %v3056_v51, 0.0  ;;  %v3600_v56 = vmul.f32 0.2, %v3056_v51  ;;  %3339 = vmatpush2.bf16.msra.mxu0 %v6539_v43  ;;  %v6181_v43 = vcombine.low %v161_v28, %v165_v31  ;;  %v6366_v44 = vcombine.high %v345_v36, %v349_v45  ;;  %v341_v50 = vld [vmem:[#allocation6 + $0x5b8] sm:$0xff] }
 0x1b9   :  { %3340 = vmatprep.subr.bf16.mxu0 %v6532_v48  ;;  %v337_v48 = vld [vmem:[#allocation6 + $0x598] sm:$0xff]  ;;  %v6365_v53 = vcombine.low %v345_v36, %v349_v45 }
 0x1ba   :  { %3409 = vmatpush1.bf16.msra.mxu1 %v6221_v47  ;;  %v3616_v62 = vsel %vm3584_vm1, %v3056_v51, %v3600_v56  ;;  %v6302_v47 = vcombine.high %v281_v37, %v285_v39  ;;  %v273_v51 = vld [vmem:[#allocation6 + $0x398] sm:$0xff]  ;;  %v6358_v60 = vcombine.high %v337_v48, %v341_v50 }
 0x1bb   :  { %3410 = vmatprep.subr.bf16.mxu1 %v6214_v52  ;;  %v7801_v6 = vpack.c.bf16 %v3616_v62, %v3608_v61  ;;  %v277_v52 = vld [vmem:[#allocation6 + $0x3b8] sm:$0xff]  ;;  %v6357_v61 = vcombine.low %v337_v48, %v341_v50 }
 0x1bc   :  { %3341 = vmatpush2.bf16.msra.mxu0 %v6531_v59  ;;  %v6294_v55 = vcombine.high %v273_v51, %v277_v52  ;;  %v329_v56 = vld [vmem:[#allocation6 + $0x558] sm:$0xff]  ;;  %v6293_v62 = vcombine.low %v273_v51, %v277_v52 }
 0x1bd   :  { %3342 = vmatprep.subr.bf16.mxu0 %v6524_v58  ;;  %v333_v59 = vld [vmem:[#allocation6 + $0x578] sm:$0xff] }
 0x1be   :  { %3411 = vmatpush1.bf16.msra.mxu1 %v6213_v57  ;;  %v265_v57 = vld [vmem:[#allocation6 + $0x358] sm:$0xff] }
 0x1bf   :  { %3412 = vmatprep.subr.bf16.mxu1 %v6206_v63  ;;  %v269_v58 = vld [vmem:[#allocation6 + $0x378] sm:$0xff]  ;;  %v6350_v63 = vcombine.high %v329_v56, %v333_v59 }
 0x1c0   :  { %3343 = vmatpush2.bf16.msra.mxu0 %v6523_v8  ;;  %v6286_v0 = vcombine.high %v265_v57, %v269_v58  ;;  %v325_v4 = vld [vmem:[#allocation6 + $0x538] sm:$0xff] }
 0x1c1   :  { %3344 = vmatprep.subr.bf16.mxu0 %v6516_v11  ;;  %v257_v5 = vld [vmem:[#allocation6 + $0x318] sm:$0xff]  ;;  %v6285_v11 = vcombine.low %v265_v57, %v269_v58 }
 0x1c2   :  { %3413 = vmatpush1.bf16.msra.mxu1 %v6205_v10  ;;  %v261_v8 = vld [vmem:[#allocation6 + $0x338] sm:$0xff]  ;;  %v6349_v10 = vcombine.low %v329_v56, %v333_v59  ;;  %v618_v56 = vsub.s32 2, %v7768_v7 }
 0x1c3   :  { %3414 = vmatprep.subr.bf16.mxu1 %v6198_v12  ;;  %v6342_v12 = vcombine.high %v321_v3, %v325_v4  ;;  %v6278_v14 = vcombine.high %v257_v5, %v261_v8  ;;  %v313_v15 = vld [vmem:[#allocation6 + $0x4d8] sm:$0xff] }
 0x1c4   :  { %3345 = vmatpush2.bf16.msra.mxu0 %v6515_v20  ;;  %v249_v17 = vld [vmem:[#allocation6 + $0x2d8] sm:$0xff]  ;;  %v6341_v20 = vcombine.low %v321_v3, %v325_v4 }
 0x1c5   :  { %3346 = vmatprep.subr.bf16.mxu0 %v6508_v22  ;;  %v253_v19 = vld [vmem:[#allocation6 + $0x2f8] sm:$0xff] }
 0x1c6   :  { %3415 = vmatpush1.bf16.msra.mxu1 %v6197_v21  ;;  %v6277_v21 = vcombine.low %v257_v5, %v261_v8  ;;  %v305_v25 = vld [vmem:[#allocation6 + $0x498] sm:$0xff]  ;;  %v619_v5 = vrot.slane %v7773_v18, %v618_v56 }
 0x1c7   :  { %3416 = vmatprep.subr.bf16.mxu1 %v6190_v23  ;;  %v6270_v23 = vcombine.high %v249_v17, %v253_v19  ;;  %v309_v26 = vld [vmem:[#allocation6 + $0x4b8] sm:$0xff] }
 0x1c8   :  { %3347 = vmatpush2.bf16.msra.mxu0 %v6507_v32  ;;  %v241_v28 = vld [vmem:[#allocation6 + $0x298] sm:$0xff] }
 0x1c9   :  { %3348 = vmatprep.subr.bf16.mxu0 %v6500_v34  ;;  %v245_v31 = vld [vmem:[#allocation6 + $0x2b8] sm:$0xff]  ;;  %v6326_v34 = vcombine.high %v305_v25, %v309_v26 }
 0x1ca   :  { %3417 = vmatpush1.bf16.msra.mxu1 %v6189_v33  ;;  %v6269_v33 = vcombine.low %v249_v17, %v253_v19  ;;  %v297_v36 = vld [vmem:[#allocation6 + $0x458] sm:$0xff]  ;;  %v7813_v17 = vpop.f32.mrf.mxu0 }
 0x1cb   :  { %3418 = vmatprep.subr.bf16.mxu1 %v6182_v35  ;;  %v6262_v35 = vcombine.high %v241_v28, %v245_v31  ;;  %v301_v45 = vld [vmem:[#allocation6 + $0x478] sm:$0xff] }
 0x1cc   :  { %3349 = vmatpush2.bf16.msra.mxu0 %v6499_v41  ;;  %v233_v37 = vld [vmem:[#allocation6 + $0x258] sm:$0xff]  ;;  %v6325_v41 = vcombine.low %v305_v25, %v309_v26 }
 0x1cd   :  { %3447 = vmatprep.subr.bf16.mxu0 %v6366_v44  ;;  %v237_v39 = vld [vmem:[#allocation6 + $0x278] sm:$0xff]  ;;  %v6318_v44 = vcombine.high %v297_v36, %v301_v45 }
 0x1ce   :  { %3419 = vmatpush1.bf16.msra.mxu1 %v6181_v43  ;;  %v6261_v43 = vcombine.low %v241_v28, %v245_v31  ;;  %v289_v48 = vld [vmem:[#allocation6 + $0x418] sm:$0xff] }
 0x1cf   :  { %3420 = vmatprep.subr.bf16.mxu1 %v6302_v47  ;;  %3351 = vmatmul.mubr.bf16.vlgmr.msra.gmra.mxu0 %v7756_v49  ;;  %v6254_v47 = vcombine.high %v233_v37, %v237_v39  ;;  %v293_v50 = vld [vmem:[#allocation6 + $0x438] sm:$0xff] }
 0x1d0   :  { %3448 = vmatpush1.bf16.msra.mxu0 %v6365_v53  ;;  %3479 = vmatprep.mubr.bf16.mxu0 %v7738_v2  ;;  %v317_v2 = vld [vmem:[#allocation6 + $0x4f8] sm:$0xff]  ;;  %v6317_v53 = vcombine.low %v297_v36, %v301_v45 }
 0x1d1   :  { %3449 = vmatprep.subr.bf16.mxu0 %v6358_v60  ;;  %v6334_v22 = vcombine.high %v313_v15, %v317_v2  ;;  %v6333_v32 = vcombine.low %v313_v15, %v317_v2  ;;  %v225_v51 = vld [vmem:[#allocation6 + $0x218] sm:$0xff]  ;;  %v6253_v60 = vcombine.low %v233_v37, %v237_v39 }
 0x1d2   :  { %3421 = vmatpush2.bf16.msra.mxu1 %v6301_v54  ;;  %v229_v52 = vld [vmem:[#allocation6 + $0x238] sm:$0xff]  ;;  %v7805_v54 = vpop.f32.mrf.mxu1 }
 0x1d3   :  { %3422 = vmatprep.subr.bf16.mxu1 %v6294_v55  ;;  %v6310_v55 = vcombine.high %v289_v48, %v293_v50  ;;  %v6246_v59 = vcombine.high %v225_v51, %v229_v52  ;;  %v409_v57 = vld [vmem:[#allocation6 + $0x7d8] sm:$0xff]  ;;  %v6245_v3 = vcombine.low %v225_v51, %v229_v52 }
 0x1d4   :  { %3450 = vmatpush1.bf16.msra.mxu0 %v6357_v61  ;;  %v413_v58 = vld [vmem:[#allocation6 + $0x7f8] sm:$0xff]  ;;  %v3094_v61 = vpop.f32.mrf.mxu1 }
 0x1d5   :  { %3451 = vmatprep.subr.bf16.mxu0 %v6350_v63  ;;  %v477_v63 = vld [vmem:[#allocation6 + $0x9f8] sm:$0xff]  ;;  %v6430_v4 = vcombine.high %v409_v57, %v413_v58  ;;  %v6429_v2 = vcombine.low %v409_v57, %v413_v58 }
 0x1d6   :  { %3423 = vmatpush2.bf16.msra.mxu1 %v6293_v62  ;;  %v473_v62 = vld [vmem:[#allocation6 + $0x9d8] sm:$0xff] }
 0x1d7   :  { %3424 = vmatprep.subr.bf16.mxu1 %v6286_v0  ;;  %v6309_v0 = vcombine.low %v289_v48, %v293_v50  ;;  %v6494_v8 = vcombine.high %v473_v62, %v477_v63  ;;  %v469_v15 = vld [vmem:[#allocation6 + $0x9b8] sm:$0xff]  ;;  %v6493_v19 = vcombine.low %v473_v62, %v477_v63 }
 0x1d8   :  { %3452 = vmatpush1.bf16.msra.mxu0 %v6349_v10  ;;  %v401_v10 = vld [vmem:[#allocation6 + $0x798] sm:$0xff] }
 0x1d9   :  { %3453 = vmatprep.subr.bf16.mxu0 %v6342_v12  ;;  %v7811_v12 = vpop.f32.mrf.mxu1  ;;  %v393_v18 = vld [vmem:[#allocation6 + $0x758] sm:$0xff] }
 0x1da   :  { %3425 = vmatpush2.bf16.msra.mxu1 %v6285_v11  ;;  %v405_v11 = vld [vmem:[#allocation6 + $0x7b8] sm:$0xff] }
 0x1db   :  { %3426 = vmatprep.subr.bf16.mxu1 %v6278_v14  ;;  %v465_v14 = vld [vmem:[#allocation6 + $0x998] sm:$0xff]  ;;  %v3098_v25 = vpop.f32.mrf.mxu1 }
 0x1dc   :  { %3454 = vmatpush1.bf16.msra.mxu0 %v6341_v20  ;;  %v6422_v20 = vcombine.high %v401_v10, %v405_v11  ;;  %v457_v28 = vld [vmem:[#allocation6 + $0x958] sm:$0xff]  ;;  %v3099_v45 = vadd.f32 %v3098_v25, %v619_v5 }
 0x1dd   :  { %3455 = vmatprep.subr.bf16.mxu0 %v6334_v22  ;;  %v6486_v22 = vcombine.high %v465_v14, %v469_v15  ;;  %v461_v31 = vld [vmem:[#allocation6 + $0x978] sm:$0xff] }
 0x1de   :  { %3427 = vmatpush2.bf16.msra.mxu1 %v6277_v21  ;;  %v3095_v21 = vadd.f32 %v3094_v61, %v619_v5  ;;  %v6478_v37 = vcombine.high %v457_v28, %v461_v31  ;;  %v385_v39 = vld [vmem:[#allocation6 + $0x718] sm:$0xff]  ;;  %v6477_v50 = vcombine.low %v457_v28, %v461_v31 }
 0x1df   :  { %3428 = vmatprep.subr.bf16.mxu1 %v6270_v23  ;;  %v397_v23 = vld [vmem:[#allocation6 + $0x778] sm:$0xff] }
 0x1e0   :  { %3456 = vmatpush1.bf16.msra.mxu0 %v6333_v32  ;;  %v6414_v36 = vcombine.high %v393_v18, %v397_v23  ;;  %v369_v62 = vld [vmem:[#allocation6 + $0x698] sm:$0xff] }
 0x1e1   :  { %3457 = vmatprep.subr.bf16.mxu0 %v6326_v34  ;;  %v373_v63 = vld [vmem:[#allocation6 + $0x6b8] sm:$0xff] }
 0x1e2   :  { %3429 = vmatpush2.bf16.msra.mxu1 %v6269_v33  ;;  %v6421_v33 = vcombine.low %v401_v10, %v405_v11  ;;  %v361_v11 = vld [vmem:[#allocation6 + $0x658] sm:$0xff] }
 0x1e3   :  { %3430 = vmatprep.subr.bf16.mxu1 %v6262_v35  ;;  %v6485_v35 = vcombine.low %v465_v14, %v469_v15  ;;  %v365_v14 = vld [vmem:[#allocation6 + $0x678] sm:$0xff] }
 0x1e4   :  { %3458 = vmatpush1.bf16.msra.mxu0 %v6325_v41  ;;  %v389_v41 = vld [vmem:[#allocation6 + $0x738] sm:$0xff]  ;;  %v6381_v28 = vcombine.low %v361_v11, %v365_v14 }
 0x1e5   :  { %3459 = vmatprep.subr.bf16.mxu0 %v6318_v44  ;;  %v449_v44 = vld [vmem:[#allocation6 + $0x918] sm:$0xff]  ;;  %v6406_v51 = vcombine.high %v385_v39, %v389_v41  ;;  %v6405_v57 = vcombine.low %v385_v39, %v389_v41 }
 0x1e6   :  { %3431 = vmatpush2.bf16.msra.mxu1 %v6261_v43  ;;  %v425_v15 = vld [vmem:[#allocation6 + $0x858] sm:$0xff] }
 0x1e7   :  { %3432 = vmatprep.subr.bf16.mxu1 %v6254_v47  ;;  %v453_v47 = vld [vmem:[#allocation6 + $0x938] sm:$0xff] }
 0x1e8   :  { %3460 = vmatpush1.bf16.msra.mxu0 %v6317_v53  ;;  %v6470_v52 = vcombine.high %v449_v44, %v453_v47  ;;  %v377_v53 = vld [vmem:[#allocation6 + $0x6d8] sm:$0xff] }
 0x1e9   :  { %3461 = vmatprep.subr.bf16.mxu0 %v6310_v55  ;;  %v441_v55 = vld [vmem:[#allocation6 + $0x8d8] sm:$0xff] }
 0x1ea   :  { %3433 = vmatpush2.bf16.msra.mxu1 %v6253_v60  ;;  %v381_v60 = vld [vmem:[#allocation6 + $0x6f8] sm:$0xff] }
 0x1eb   :  { %3434 = vmatprep.subr.bf16.mxu1 %v6246_v59  ;;  %v445_v59 = vld [vmem:[#allocation6 + $0x8f8] sm:$0xff]  ;;  %v6398_v58 = vcombine.high %v377_v53, %v381_v60 }
 0x1ec   :  { %3462 = vmatpush1.bf16.msra.mxu0 %v6309_v0  ;;  %v6462_v61 = vcombine.high %v441_v55, %v445_v59  ;;  %v433_v0 = vld [vmem:[#allocation6 + $0x898] sm:$0xff]  ;;  %v6461_v5 = vcombine.low %v441_v55, %v445_v59 }
 0x1ed   :  { %3463 = vmatprep.subr.bf16.mxu0 %v6430_v4  ;;  %v6397_v4 = vcombine.low %v377_v53, %v381_v60  ;;  %v417_v25 = vld [vmem:[#allocation6 + $0x818] sm:$0xff] }
 0x1ee   :  { %3435 = vmatpush2.bf16.msra.mxu1 %v6245_v3  ;;  %v437_v3 = vld [vmem:[#allocation6 + $0x8b8] sm:$0xff] }
 0x1ef   :  { %3490 = vmatprep.subr.bf16.mxu1 %v6494_v8  ;;  %v3137_v26 = vpop.f32.mrf.mxu0  ;;  %v6390_v8 = vcombine.high %v369_v62, %v373_v63  ;;  %v6454_v10 = vcombine.high %v433_v0, %v437_v3  ;;  %v541_v39 = vld [vmem:[#allocation6 + $0xbf8] sm:$0xff] }
 0x1f0   :  { %v7815_v32 = vadd.f32 %v3137_v26, %v3095_v21  ;;  %3464 = vmatpush2.bf16.msra.mxu0 %v6429_v2  ;;  %v429_v2 = vld [vmem:[#allocation6 + $0x878] sm:$0xff]  ;;  %v6382_v21 = vcombine.high %v361_v11, %v365_v14 }
 0x1f1   :  { %3437 = vmatmul.mubr.bf16.vlgmr.msra.gmra.mxu1 %v7742_v24  ;;  %v7818_v34 = vpop.f32.mrf.mxu0  ;;  %3465 = vmatprep.subr.bf16.mxu0 %v6422_v20  ;;  %v6413_v24 = vcombine.low %v393_v18, %v397_v23  ;;  %v6453_v20 = vcombine.low %v433_v0, %v437_v3  ;;  %v353_v18 = vld [vmem:[#allocation6 + $0x618] sm:$0xff]  ;;  %v6445_v31 = vcombine.low %v425_v15, %v429_v2 }
 0x1f2   :  { %3491 = vmatpush1.bf16.msra.mxu1 %v6493_v19  ;;  %3522 = vmatprep.mubr.bf16.mxu1 %v7747_v38  ;;  %v6469_v38 = vcombine.low %v449_v44, %v453_v47  ;;  %v6389_v19 = vcombine.low %v369_v62, %v373_v63  ;;  %v357_v23 = vld [vmem:[#allocation6 + $0x638] sm:$0xff] }
 0x1f3   :  { %3492 = vmatprep.subr.bf16.mxu1 %v6486_v22  ;;  %v3141_v43 = vpop.f32.mrf.mxu0  ;;  %v6446_v22 = vcombine.high %v425_v15, %v429_v2  ;;  %v421_v26 = vld [vmem:[#allocation6 + $0x838] sm:$0xff]  ;;  %v6373_v41 = vcombine.low %v353_v18, %v357_v23 }
 0x1f4   :  { %v7821_v48 = vadd.f32 %v3141_v43, %v3099_v45  ;;  %3466 = vmatpush2.bf16.msra.mxu0 %v6421_v33  ;;  %v6374_v33 = vcombine.high %v353_v18, %v357_v23  ;;  %v605_v45 = vld [vmem:[#allocation6 + $0xdf8] sm:$0xff]  ;;  %v6437_v43 = vcombine.low %v417_v25, %v421_v26 }
 0x1f5   :  { %3467 = vmatprep.subr.bf16.mxu0 %v6414_v36  ;;  %v601_v36 = vld [vmem:[#allocation6 + $0xdd8] sm:$0xff]  ;;  %v7823_v60 = vpop.f32.mrf.mxu0 }
 0x1f6   :  { %3493 = vmatpush1.bf16.msra.mxu1 %v6485_v35  ;;  %v6438_v35 = vcombine.high %v417_v25, %v421_v26  ;;  %v6622_v44 = vcombine.high %v601_v36, %v605_v45  ;;  %v6621_v53 = vcombine.low %v601_v36, %v605_v45  ;;  %v521_v63 = vld [vmem:[#allocation6 + $0xb58] sm:$0xff] }
 0x1f7   :  { %3494 = vmatprep.subr.bf16.mxu1 %v6478_v37  ;;  %v537_v37 = vld [vmem:[#allocation6 + $0xbd8] sm:$0xff] }
 0x1f8   :  { %3468 = vmatpush2.bf16.msra.mxu0 %v6413_v24  ;;  %v6558_v47 = vcombine.high %v537_v37, %v541_v39  ;;  %v593_v24 = vld [vmem:[#allocation6 + $0xd98] sm:$0xff]  ;;  %v6557_v55 = vcombine.low %v537_v37, %v541_v39 }
 0x1f9   :  { %3469 = vmatprep.subr.bf16.mxu0 %v6406_v51  ;;  %v529_v51 = vld [vmem:[#allocation6 + $0xb98] sm:$0xff] }
 0x1fa   :  { %3495 = vmatpush1.bf16.msra.mxu1 %v6477_v50  ;;  %v597_v50 = vld [vmem:[#allocation6 + $0xdb8] sm:$0xff] }
 0x1fb   :  { %3496 = vmatprep.subr.bf16.mxu1 %v6470_v52  ;;  %v533_v52 = vld [vmem:[#allocation6 + $0xbb8] sm:$0xff]  ;;  %v6614_v59 = vcombine.high %v593_v24, %v597_v50 }
 0x1fc   :  { %3470 = vmatpush2.bf16.msra.mxu0 %v6405_v57  ;;  %v7825_v57 = vpop.f32.mrf.mxu1  ;;  %v525_v0 = vld [vmem:[#allocation6 + $0xb78] sm:$0xff] }
 0x1fd   :  { %3471 = vmatprep.subr.bf16.mxu0 %v6398_v58  ;;  %v585_v58 = vld [vmem:[#allocation6 + $0xd58] sm:$0xff]  ;;  %v6542_v15 = vcombine.high %v521_v63, %v525_v0  ;;  %v6541_v23 = vcombine.low %v521_v63, %v525_v0 }
 0x1fe   :  { %3497 = vmatpush1.bf16.msra.mxu1 %v6469_v38  ;;  %v6550_v38 = vcombine.high %v529_v51, %v533_v52  ;;  %v581_v2 = vld [vmem:[#allocation6 + $0xd38] sm:$0xff] }
 0x1ff   :  { %3498 = vmatprep.subr.bf16.mxu1 %v6462_v61  ;;  %v589_v61 = vld [vmem:[#allocation6 + $0xd78] sm:$0xff] }
 0x200   :  { %3472 = vmatpush2.bf16.msra.mxu0 %v6397_v4  ;;  %v6613_v4 = vcombine.low %v593_v24, %v597_v50  ;;  %v505_v37 = vld [vmem:[#allocation6 + $0xad8] sm:$0xff] }
 0x201   :  { %3473 = vmatprep.subr.bf16.mxu0 %v6390_v8  ;;  %v6549_v8 = vcombine.low %v529_v51, %v533_v52  ;;  %v509_v39 = vld [vmem:[#allocation6 + $0xaf8] sm:$0xff] }
 0x202   :  { %3499 = vmatpush1.bf16.msra.mxu1 %v6461_v5  ;;  %v6526_v51 = vcombine.high %v505_v37, %v509_v39  ;;  %v561_v52 = vld [vmem:[#allocation6 + $0xc98] sm:$0xff] }
 0x203   :  { %3500 = vmatprep.subr.bf16.mxu1 %v6454_v10  ;;  %v6606_v10 = vcombine.high %v585_v58, %v589_v61 }
 0x204   :  { %3474 = vmatpush2.bf16.msra.mxu0 %v6389_v19 }
 0x205   :  { %3475 = vmatprep.subr.bf16.mxu0 %v6382_v21  ;;  %v517_v21 = vld [vmem:[#allocation6 + $0xb38] sm:$0xff] }
 0x206   :  { %3501 = vmatpush1.bf16.msra.mxu1 %v6453_v20  ;;  %v513_v20 = vld [vmem:[#allocation6 + $0xb18] sm:$0xff] }
 0x207   :  { %3502 = vmatprep.subr.bf16.mxu1 %v6446_v22  ;;  %v7835_v22 = vsub.s32 1, %v7768_v7 }
 0x208   :  { %3476 = vmatpush2.bf16.msra.mxu0 %v6381_v28  ;;  %v6534_v28 = vcombine.high %v513_v20, %v517_v21 }
 0x209   :  { %3477 = vmatprep.subr.bf16.mxu0 %v6374_v33  ;;  %v573_v33 = vld [vmem:[#allocation6 + $0xcf8] sm:$0xff] }
 0x20a   :  { %3503 = vmatpush1.bf16.msra.mxu1 %v6445_v31  ;;  %v569_v31 = vld [vmem:[#allocation6 + $0xcd8] sm:$0xff] }
 0x20b   :  { %3504 = vmatprep.subr.bf16.mxu1 %v6438_v35  ;;  %v622_v35 = vsub.s32 3, %v7768_v7  ;;  %v6590_v24 = vcombine.high %v569_v31, %v573_v33  ;;  %v6589_v0 = vcombine.low %v569_v31, %v573_v33  ;;  %v485_v31 = vld [vmem:[#allocation6 + $0xa38] sm:$0xff] }
 0x20c   :  { %3478 = vmatpush2.bf16.msra.mxu0 %v6373_v41  ;;  %v7839_v41 = vld [vmem:[#allocation8] sm:$0xff] }
 0x20d   :  { %3533 = vmatprep.subr.bf16.mxu0 %v6622_v44 }
 0x20e   :  { %3505 = vmatpush1.bf16.msra.mxu1 %v6437_v43 }
 0x20f   :  { %3506 = vmatprep.subr.bf16.mxu1 %v6558_v47  ;;  %v3223_v62 = vpop.f32.mrf.mxu0  ;;  %3480 = vmatmul.mubr.bf16.vlgmr.msra.gmra.mxu0 %v7744_v27  ;;  %v577_v27 = vld [vmem:[#allocation6 + $0xd18] sm:$0xff]  ;;  %v6533_v47 = vcombine.low %v513_v20, %v517_v21 }
 0x210   :  { %3534 = vmatpush1.bf16.msra.mxu0 %v6621_v53  ;;  %3565 = vmatprep.mubr.bf16.mxu0 %v7656_v1  ;;  %v6598_v25 = vcombine.high %v577_v27, %v581_v2  ;;  %v6597_v43 = vcombine.low %v577_v27, %v581_v2  ;;  %v565_v53 = vld [vmem:[#allocation6 + $0xcb8] sm:$0xff] }
 0x211   :  { %v3180_v3 = vpop.f32.mrf.mxu1  ;;  %3535 = vmatprep.subr.bf16.mxu0 %v6614_v59  ;;  %v7832_v14 = vpop.f32.mrf.mxu0  ;;  %v557_v27 = vld [vmem:[#allocation6 + $0xc78] sm:$0xff] }
 0x212   :  { %v3181_v5 = vadd.f32 %v3180_v3, %v7815_v32  ;;  %3507 = vmatpush2.bf16.msra.mxu1 %v6557_v55  ;;  %v6605_v32 = vcombine.low %v585_v58, %v589_v61  ;;  %v623_v55 = vrot.slane %v7839_v41, %v622_v35  ;;  %v497_v58 = vld [vmem:[#allocation6 + $0xa98] sm:$0xff]  ;;  %v6525_v3 = vcombine.low %v505_v37, %v509_v39 }
 0x213   :  { %v7830_v11 = vpop.f32.mrf.mxu1  ;;  %3508 = vmatprep.subr.bf16.mxu1 %v6550_v38  ;;  %v3227_v26 = vpop.f32.mrf.mxu0  ;;  %v501_v61 = vld [vmem:[#allocation6 + $0xab8] sm:$0xff] }
 0x214   :  { %v3224_v19 = vadd.f32 %v3223_v62, %v3181_v5  ;;  %3536 = vmatpush1.bf16.msra.mxu0 %v6613_v4  ;;  %v6582_v4 = vcombine.high %v561_v52, %v565_v53  ;;  %v3097_v2 = vadd.f32 %v7811_v12, %v623_v55  ;;  %v493_v20 = vld [vmem:[#allocation6 + $0xa78] sm:$0xff] }
 0x215   :  { %v3184_v1 = vpop.f32.mrf.mxu1  ;;  %3537 = vmatprep.subr.bf16.mxu0 %v6606_v10  ;;  %v6518_v10 = vcombine.high %v497_v58, %v501_v61  ;;  %v3229_v33 = vpop.f32.mrf.mxu0 }
 0x216   :  { %v3185_v18 = vadd.f32 %v3184_v1, %v7821_v48  ;;  %3509 = vmatpush2.bf16.msra.mxu1 %v6549_v8  ;;  %v3594_v36 = vmul.f32 0.2, %v3224_v19  ;;  %v615_v48 = vrot.slane %v7839_v41, %v7835_v22  ;;  %vm3578_vm2 = vcmp.gt.f32.partialorder %v3224_v19, 0.0 }
 0x217   :  { %3510 = vmatprep.subr.bf16.mxu1 %v6542_v15  ;;  %v3186_v8 = vpop.f32.mrf.mxu1  ;;  %v553_v15 = vld [vmem:[#allocation6 + $0xc58] sm:$0xff]  ;;  %v6517_v1 = vcombine.low %v497_v58, %v501_v61 }
 0x218   :  { %v3228_v45 = vadd.f32 %v3227_v26, %v3185_v18  ;;  %3538 = vmatpush1.bf16.msra.mxu0 %v6605_v32  ;;  %v2929_v50 = vadd.f32 %v7791_v13, %v615_v48  ;;  %v3610_v59 = vsel %vm3578_vm2, %v3224_v19, %v3594_v36  ;;  %v2925_v62 = vadd.f32 %v7777_v42, %v615_v48  ;;  %v489_v19 = vld [vmem:[#allocation6 + $0xa58] sm:$0xff] }
 0x219   :  { %3539 = vmatprep.subr.bf16.mxu0 %v6598_v25  ;;  %v3101_v13 = vadd.f32 %v7825_v57, %v623_v55  ;;  %v6581_v32 = vcombine.low %v561_v52, %v565_v53  ;;  %v6510_v12 = vcombine.high %v489_v19, %v493_v20  ;;  %v549_v26 = vld [vmem:[#allocation6 + $0xc38] sm:$0xff]  ;;  %v6573_v36 = vcombine.low %v553_v15, %v557_v27 }
 0x21a   :  { %vm3586_vm3 = vcmp.gt.f32.partialorder %v3228_v45, 0.0  ;;  %v3602_v44 = vmul.f32 0.2, %v3228_v45  ;;  %3511 = vmatpush2.bf16.msra.mxu1 %v6541_v23  ;;  %v2972_v5 = vadd.f32 %v7789_v9, %v2929_v50  ;;  %v2968_v21 = vadd.f32 %v7781_v46, %v2925_v62  ;;  %v481_v46 = vld [vmem:[#allocation6 + $0xa18] sm:$0xff] }
 0x21b   :  { %3512 = vmatprep.subr.bf16.mxu1 %v6534_v28  ;;  %v3144_v42 = vadd.f32 %v7823_v60, %v3101_v13  ;;  %v3140_v9 = vadd.f32 %v7818_v34, %v3097_v2  ;;  %v6574_v23 = vcombine.high %v553_v15, %v557_v27  ;;  %v545_v60 = vld [vmem:[#allocation6 + $0xc18] sm:$0xff]  ;;  %v6502_v39 = vcombine.high %v481_v46, %v485_v31 }
 0x21c   :  { %v3618_v38 = vsel %vm3586_vm3, %v3228_v45, %v3602_v44  ;;  %3540 = vmatpush1.bf16.msra.mxu0 %v6597_v43  ;;  %v3015_v57 = vadd.f32 %v7813_v17, %v2972_v5  ;;  %v3011_v25 = vadd.f32 %v7797_v30, %v2968_v21  ;;  %v6509_v45 = vcombine.low %v489_v19, %v493_v20  ;;  %v6968_v50 = vld [vmem:[#allocation9 + $0x2e4] ss:$16 sps:$4 sm:$0xff]   ;;  %v6972_v13 = vld [vmem:[#allocation9 + $0x2c0] ss:$16 sps:$4 sm:$0xff]  }
 0x21d   :  { %v7848_v63 = vpack.c.bf16 %v3618_v38, %v3610_v59  ;;  %3541 = vmatprep.subr.bf16.mxu0 %v6590_v24  ;;  %v3187_v18 = vadd.f32 %v3186_v8, %v3144_v42  ;;  %v3183_v28 = vadd.f32 %v7830_v11, %v3140_v9  ;;  %v6566_v37 = vcombine.high %v545_v60, %v549_v26  ;;  %v6971_v59 = vld [vmem:[#allocation9 + $0xc4] ss:$16 sps:$4 sm:$0xff]   ;;  %v6978_v5 = vld [vmem:[#allocation9 + $0x2a0] ss:$16 sps:$4 sm:$0xff]  }
 0x21e   :  { %3513 = vmatpush2.bf16.msra.mxu1 %v6533_v47  ;;  %v3058_v17 = vadd.f32 %v7805_v54, %v3015_v57  ;;  %v3054_v30 = vadd.f32 %v7795_v29, %v3011_v25  ;;  %v6565_v11 = vcombine.low %v545_v60, %v549_v26  ;;  %v6501_v54 = vcombine.low %v481_v46, %v485_v31  ;;  %v6965_v47 = vld [vmem:[#allocation9 + $0xe4] ss:$16 sps:$4 sm:$0xff]   ;;  %v6963_v29 = vld [vmem:[#allocation9 + $0xe0] ss:$16 sps:$4 sm:$0xff]  }
 0x21f   :  { %3514 = vmatprep.subr.bf16.mxu1 %v6526_v51  ;;  %v3230_v34 = vadd.f32 %v3229_v33, %v3187_v18  ;;  %v3226_v48 = vadd.f32 %v7832_v14, %v3183_v28  ;;  %v6966_v14 = vld [vmem:[#allocation9 + $0x2e0] ss:$16 sps:$4 sm:$0xff]   ;;  %v6974_v61 = vld [vmem:[#allocation9 + $0x2c4] ss:$16 sps:$4 sm:$0xff]  }
 0x220   :  { %3542 = vmatpush1.bf16.msra.mxu0 %v6589_v0  ;;  %v3601_v43 = vmul.f32 0.2, %v3058_v17  ;;  %vm3585_vm4 = vcmp.gt.f32.partialorder %v3058_v17, 0.0  ;;  %v3593_v24 = vmul.f32 0.2, %v3054_v30  ;;  %vm3577_vm6 = vcmp.gt.f32.partialorder %v3054_v30, 0.0 }
 0x221   :  { %3543 = vmatprep.subr.bf16.mxu0 %v6582_v4  ;;  %v3603_v44 = vmul.f32 0.2, %v3230_v34  ;;  %vm3587_vm5 = vcmp.gt.f32.partialorder %v3230_v34, 0.0  ;;  %v3595_v51 = vmul.f32 0.2, %v3226_v48  ;;  %vm3579_vm7 = vcmp.gt.f32.partialorder %v3226_v48, 0.0 }
 0x222   :  { %3515 = vmatpush2.bf16.msra.mxu1 %v6525_v3  ;;  %v3617_v52 = vsel %vm3585_vm4, %v3058_v17, %v3601_v43  ;;  %v3609_v55 = vsel %vm3577_vm6, %v3054_v30, %v3593_v24  ;;  %v6969_v0 = vld [vmem:[#allocation9 + $0xc0] ss:$16 sps:$4 sm:$0xff]   ;;  %v6977_v3 = vld [vmem:[#allocation9 + $0xa4] ss:$16 sps:$4 sm:$0xff]  }
 0x223   :  { %3516 = vmatprep.subr.bf16.mxu1 %v6518_v10  ;;  %v3619_v53 = vsel %vm3587_vm5, %v3230_v34, %v3603_v44  ;;  %v7863_v38 = vpack.c.bf16 %v3617_v52, %v3609_v55  ;;  %v3611_v58 = vsel %vm3579_vm7, %v3226_v48, %v3595_v51  ;;  %v6980_v4 = vld [vmem:[#allocation9 + $0x2a4] ss:$16 sps:$4 sm:$0xff]   ;;  %v6981_v10 = vld [vmem:[#allocation9 + $0x80] ss:$16 sps:$4 sm:$0xff]  }
 0x224   :  { %3544 = vmatpush1.bf16.msra.mxu0 %v6581_v32  ;;  %v7866_v62 = vpack.c.bf16 %v3619_v53, %v3611_v58  ;;  %v6986_v8 = vld [vmem:[#allocation9 + $0x284] ss:$16 sps:$4 sm:$0xff]   ;;  %v6984_v15 = vld [vmem:[#allocation9 + $0x280] ss:$16 sps:$4 sm:$0xff]  }
 0x225   :  { %3545 = vmatprep.subr.bf16.mxu0 %v6574_v23  ;;  %v6989_v27 = vld [vmem:[#allocation9 + $0x64] ss:$16 sps:$4 sm:$0xff]   ;;  %v6987_v42 = vld [vmem:[#allocation9 + $0x60] ss:$16 sps:$4 sm:$0xff]  }
 0x226   :  { %3517 = vmatpush2.bf16.msra.mxu1 %v6517_v1  ;;  %v6992_v2 = vld [vmem:[#allocation9 + $0x264] ss:$16 sps:$4 sm:$0xff]   ;;  %v6990_v19 = vld [vmem:[#allocation9 + $0x260] ss:$16 sps:$4 sm:$0xff]  }
 0x227   :  { %3518 = vmatprep.subr.bf16.mxu1 %v6510_v12  ;;  %v6995_v20 = vld [vmem:[#allocation9 + $0x44] ss:$16 sps:$4 sm:$0xff]   ;;  %v6993_v57 = vld [vmem:[#allocation9 + $0x40] ss:$16 sps:$4 sm:$0xff]  }
 0x228   :  { %3546 = vmatpush1.bf16.msra.mxu0 %v6573_v36  ;;  %v6998_v21 = vld [vmem:[#allocation9 + $0x244] ss:$16 sps:$4 sm:$0xff]   ;;  %v6996_v1 = vld [vmem:[#allocation9 + $0x240] ss:$16 sps:$4 sm:$0xff]  }
 0x229   :  { %3547 = vmatprep.subr.bf16.mxu0 %v6566_v37  ;;  %v7001_v32 = vld [vmem:[#allocation9 + $0x24] ss:$16 sps:$4 sm:$0xff]   ;;  %v6999_v18 = vld [vmem:[#allocation9 + $0x20] ss:$16 sps:$4 sm:$0xff]  }
 0x22a   :  { %3519 = vmatpush2.bf16.msra.mxu1 %v6509_v45  ;;  %v7004_v9 = vld [vmem:[#allocation9 + $0x224] ss:$16 sps:$4 sm:$0xff]   ;;  %v7002_v23 = vld [vmem:[#allocation9 + $0x220] ss:$16 sps:$4 sm:$0xff]  }
 0x22b   :  { %3520 = vmatprep.subr.bf16.mxu1 %v6502_v39  ;;  %v7007_v25 = vld [vmem:[#allocation9 + $0x4] ss:$16 sps:$4 sm:$0xff]   ;;  %v7005_v60 = vld [vmem:[#allocation9] ss:$16 sps:$4 sm:$0xff]  }
 0x22c   :  { %3548 = vmatpush1.bf16.msra.mxu0 %v6565_v11  ;;  %v7010_v12 = vld [vmem:[#allocation9 + $0x204] ss:$16 sps:$4 sm:$0xff]   ;;  %v7008_v26 = vld [vmem:[#allocation9 + $0x200] ss:$16 sps:$4 sm:$0xff]  }
 0x22d   :  { %5190 = vmatprep.subr.bf16.mxu0 %v6965_v47  ;;  %v7013_v28 = vld [vmem:[#allocation9 + $0x1e4] ss:$16 sps:$4 sm:$0xff]   ;;  %v7011_v31 = vld [vmem:[#allocation9 + $0x1e0] ss:$16 sps:$4 sm:$0xff]  }
 0x22e   :  { %3521 = vmatpush2.bf16.msra.mxu1 %v6501_v54  ;;  %v7016_v46 = vld [vmem:[#allocation9 + $0x3e4] ss:$16 sps:$4 sm:$0xff]   ;;  %v7014_v17 = vld [vmem:[#allocation9 + $0x3e0] ss:$16 sps:$4 sm:$0xff]  }
 0x22f   :  { %5233 = vmatprep.subr.bf16.mxu1 %v6968_v50  ;;  %3566 = vmatmul.mubr.bf16.vlgmr.msra.gmra.mxu0 %v7752_v40  ;;  %v6975_v40 = vld [vmem:[#allocation9 + $0xa0] ss:$16 sps:$4 sm:$0xff]   ;;  %v7019_v33 = vld [vmem:[#allocation9 + $0x1c4] ss:$16 sps:$4 sm:$0xff]  }
 0x230   :  { %5191 = vmatpush1.bf16.msra.mxu0 %v6963_v29  ;;  %5222 = vmatprep.mubr.bf16.mxu0 %v7863_v38  ;;  %v7022_v36 = vld [vmem:[#allocation9 + $0x3c4] ss:$16 sps:$4 sm:$0xff]   ;;  %v7017_v34 = vld [vmem:[#allocation9 + $0x1c0] ss:$16 sps:$4 sm:$0xff]  }
 0x231   :  { %3523 = vmatmul.mubr.bf16.vlgmr.msra.gmra.mxu1 %v7756_v49  ;;  %5192 = vmatprep.subr.bf16.mxu0 %v6971_v59  ;;  %v6983_v49 = vld [vmem:[#allocation9 + $0x84] ss:$16 sps:$4 sm:$0xff]   ;;  %v7020_v45 = vld [vmem:[#allocation9 + $0x3c0] ss:$16 sps:$4 sm:$0xff]  }
 0x232   :  { %5234 = vmatpush1.bf16.msra.mxu1 %v6966_v14  ;;  %5265 = vmatprep.mubr.bf16.mxu1 %v7866_v62  ;;  %v7025_v37 = vld [vmem:[#allocation9 + $0x1a4] ss:$16 sps:$4 sm:$0xff]   ;;  %v7023_v39 = vld [vmem:[#allocation9 + $0x1a0] ss:$16 sps:$4 sm:$0xff]  }
 0x233   :  { %5235 = vmatprep.subr.bf16.mxu1 %v6974_v61  ;;  %v7028_v30 = vld [vmem:[#allocation9 + $0x3a4] ss:$16 sps:$4 sm:$0xff]   ;;  %v7026_v48 = vld [vmem:[#allocation9 + $0x3a0] ss:$16 sps:$4 sm:$0xff]  }
 0x234   :  { %5193 = vmatpush1.bf16.msra.mxu0 %v6969_v0  ;;  %v7031_v43 = vld [vmem:[#allocation9 + $0x184] ss:$16 sps:$4 sm:$0xff]   ;;  %v7029_v44 = vld [vmem:[#allocation9 + $0x180] ss:$16 sps:$4 sm:$0xff]  }
 0x235   :  { %5194 = vmatprep.subr.bf16.mxu0 %v6977_v3  ;;  %v7034_v11 = vld [vmem:[#allocation9 + $0x384] ss:$16 sps:$4 sm:$0xff]   ;;  %v7032_v54 = vld [vmem:[#allocation9 + $0x380] ss:$16 sps:$4 sm:$0xff]  }
 0x236   :  { %5236 = vmatpush1.bf16.msra.mxu1 %v6972_v13  ;;  %v7037_v47 = vld [vmem:[#allocation9 + $0x164] ss:$16 sps:$4 sm:$0xff]   ;;  %v7035_v50 = vld [vmem:[#allocation9 + $0x160] ss:$16 sps:$4 sm:$0xff]  }
 0x237   :  { %5237 = vmatprep.subr.bf16.mxu1 %v6980_v4  ;;  %v7040_v24 = vld [vmem:[#allocation9 + $0x364] ss:$16 sps:$4 sm:$0xff]   ;;  %v7038_v51 = vld [vmem:[#allocation9 + $0x360] ss:$16 sps:$4 sm:$0xff]  }
 0x238   :  { %5195 = vmatpush1.bf16.msra.mxu0 %v6975_v40  ;;  %v7043_v29 = vld [vmem:[#allocation9 + $0x144] ss:$16 sps:$4 sm:$0xff]   ;;  %v7041_v14 = vld [vmem:[#allocation9 + $0x140] ss:$16 sps:$4 sm:$0xff]  }
 0x239   :  { %5196 = vmatprep.subr.bf16.mxu0 %v6983_v49  ;;  %v7046_v52 = vld [vmem:[#allocation9 + $0x344] ss:$16 sps:$4 sm:$0xff]   ;;  %v7044_v53 = vld [vmem:[#allocation9 + $0x340] ss:$16 sps:$4 sm:$0xff]  }
 0x23a   :  { %5238 = vmatpush1.bf16.msra.mxu1 %v6978_v5  ;;  %v7049_v55 = vld [vmem:[#allocation9 + $0x124] ss:$16 sps:$4 sm:$0xff]   ;;  %v7047_v58 = vld [vmem:[#allocation9 + $0x120] ss:$16 sps:$4 sm:$0xff]  }
 0x23b   :  { %5239 = vmatprep.subr.bf16.mxu1 %v6986_v8  ;;  %v7052_v59 = vld [vmem:[#allocation9 + $0x324] ss:$16 sps:$4 sm:$0xff]   ;;  %v7050_v61 = vld [vmem:[#allocation9 + $0x320] ss:$16 sps:$4 sm:$0xff]  }
 0x23c   :  { %5197 = vmatpush1.bf16.msra.mxu0 %v6981_v10  ;;  %v7055_v0 = vld [vmem:[#allocation9 + $0x104] ss:$16 sps:$4 sm:$0xff]   ;;  %v7053_v3 = vld [vmem:[#allocation9 + $0x100] ss:$16 sps:$4 sm:$0xff]  }
 0x23d   :  { %5198 = vmatprep.subr.bf16.mxu0 %v6989_v27  ;;  %v7058_v13 = vld [vmem:[#allocation9 + $0x304] ss:$16 sps:$4 sm:$0xff]   ;;  %v7056_v4 = vld [vmem:[#allocation9 + $0x300] ss:$16 sps:$4 sm:$0xff]  }
 0x23e   :  { %5240 = vmatpush1.bf16.msra.mxu1 %v6984_v15  ;;  %v7061_v40 = vld [vmem:[#allocation9 + $0x4e4] ss:$16 sps:$4 sm:$0xff]   ;;  %v7059_v49 = vld [vmem:[#allocation9 + $0x4e0] ss:$16 sps:$4 sm:$0xff]  }
 0x23f   :  { %5241 = vmatprep.subr.bf16.mxu1 %v6992_v2  ;;  %v7121_v5 = vld [vmem:[#allocation9 + $0x6e4] ss:$16 sps:$4 sm:$0xff]   ;;  %v7119_v10 = vld [vmem:[#allocation9 + $0x6e0] ss:$16 sps:$4 sm:$0xff]  }
 0x240   :  { %5199 = vmatpush1.bf16.msra.mxu0 %v6987_v42  ;;  %v7064_v8 = vld [vmem:[#allocation9 + $0x4c4] ss:$16 sps:$4 sm:$0xff]   ;;  %v7062_v27 = vld [vmem:[#allocation9 + $0x4c0] ss:$16 sps:$4 sm:$0xff]  }
 0x241   :  { %5200 = vmatprep.subr.bf16.mxu0 %v6995_v20  ;;  %v7127_v15 = vld [vmem:[#allocation9 + $0x6c4] ss:$16 sps:$4 sm:$0xff]   ;;  %v7125_v42 = vld [vmem:[#allocation9 + $0x6c0] ss:$16 sps:$4 sm:$0xff]  }
 0x242   :  { %5242 = vmatpush1.bf16.msra.mxu1 %v6990_v19  ;;  %v7067_v2 = vld [vmem:[#allocation9 + $0x4a4] ss:$16 sps:$4 sm:$0xff]   ;;  %v7065_v20 = vld [vmem:[#allocation9 + $0x4a0] ss:$16 sps:$4 sm:$0xff]  }
 0x243   :  { %5243 = vmatprep.subr.bf16.mxu1 %v6998_v21  ;;  %v7133_v19 = vld [vmem:[#allocation9 + $0x6a4] ss:$16 sps:$4 sm:$0xff]  }
 0x244   :  { %5201 = vmatpush1.bf16.msra.mxu0 %v6993_v57  ;;  %v7070_v21 = vld [vmem:[#allocation9 + $0x484] ss:$16 sps:$4 sm:$0xff]   ;;  %v7131_v57 = vld [vmem:[#allocation9 + $0x6a0] ss:$16 sps:$4 sm:$0xff]  }
 0x245   :  { %5202 = vmatprep.subr.bf16.mxu0 %v7001_v32  ;;  %v7068_v32 = vld [vmem:[#allocation9 + $0x480] ss:$16 sps:$4 sm:$0xff]  }
 0x246   :  { %5244 = vmatpush1.bf16.msra.mxu1 %v6996_v1  ;;  %v7139_v1 = vld [vmem:[#allocation9 + $0x684] ss:$16 sps:$4 sm:$0xff]  }
 0x247   :  { %5245 = vmatprep.subr.bf16.mxu1 %v7004_v9  ;;  %v7073_v9 = vld [vmem:[#allocation9 + $0x464] ss:$16 sps:$4 sm:$0xff]  }
 0x248   :  { %5203 = vmatpush1.bf16.msra.mxu0 %v6999_v18  ;;  %v7137_v18 = vld [vmem:[#allocation9 + $0x680] ss:$16 sps:$4 sm:$0xff]  }
 0x249   :  { %5204 = vmatprep.subr.bf16.mxu0 %v7007_v25  ;;  %v7071_v25 = vld [vmem:[#allocation9 + $0x460] ss:$16 sps:$4 sm:$0xff]  }
 0x24a   :  { %5246 = vmatpush1.bf16.msra.mxu1 %v7002_v23  ;;  %v7145_v23 = vld [vmem:[#allocation9 + $0x664] ss:$16 sps:$4 sm:$0xff]  }
 0x24b   :  { %5247 = vmatprep.subr.bf16.mxu1 %v7010_v12  ;;  %v7076_v12 = vld [vmem:[#allocation9 + $0x444] ss:$16 sps:$4 sm:$0xff]  }
 0x24c   :  { %5205 = vmatpush1.bf16.msra.mxu0 %v7005_v60  ;;  %v7143_v60 = vld [vmem:[#allocation9 + $0x660] ss:$16 sps:$4 sm:$0xff]  }
 0x24d   :  { %5206 = vmatprep.subr.bf16.mxu0 %v7013_v28  ;;  %v7151_v28 = vld [vmem:[#allocation9 + $0x644] ss:$16 sps:$4 sm:$0xff]  }
 0x24e   :  { %5248 = vmatpush1.bf16.msra.mxu1 %v7008_v26 }
 0x24f   :  { %5249 = vmatprep.subr.bf16.mxu1 %v7016_v46  ;;  %v7074_v46 = vld [vmem:[#allocation9 + $0x440] ss:$16 sps:$4 sm:$0xff]  }
 0x250   :  { %5207 = vmatpush2.bf16.msra.mxu0 %v7011_v31  ;;  %v7874_v31 = vpop.f32.mrf.mxu0 }
 0x251   :  { %5208 = vmatprep.subr.bf16.mxu0 %v7019_v33  ;;  %v7872_v26 = vpop.f32.mrf.mxu1  ;;  %v7149_v33 = vld [vmem:[#allocation9 + $0x640] ss:$16 sps:$4 sm:$0xff]  }
 0x252   :  { %5250 = vmatpush2.bf16.msra.mxu1 %v7014_v17  ;;  %v7079_v17 = vld [vmem:[#allocation9 + $0x424] ss:$16 sps:$4 sm:$0xff]  }
 0x253   :  { %5251 = vmatprep.subr.bf16.mxu1 %v7022_v36  ;;  %v3311_v36 = vpop.f32.mrf.mxu1 }
 0x254   :  { %5209 = vmatpush2.bf16.msra.mxu0 %v7017_v34  ;;  %v7157_v34 = vld [vmem:[#allocation9 + $0x624] ss:$16 sps:$4 sm:$0xff]  }
 0x255   :  { %5210 = vmatprep.subr.bf16.mxu0 %v7025_v37  ;;  %v7077_v37 = vld [vmem:[#allocation9 + $0x420] ss:$16 sps:$4 sm:$0xff]  }
 0x256   :  { %5252 = vmatpush2.bf16.msra.mxu1 %v7020_v45  ;;  %v630_v45 = vsub.s32 5, %v7768_v7 }
 0x257   :  { %5253 = vmatprep.subr.bf16.mxu1 %v7028_v30  ;;  %v3268_v30 = vpop.f32.mrf.mxu0 }
 0x258   :  { %5211 = vmatpush2.bf16.msra.mxu0 %v7023_v39  ;;  %v7082_v39 = vld [vmem:[#allocation9 + $0x404] ss:$16 sps:$4 sm:$0xff]  }
 0x259   :  { %5212 = vmatprep.subr.bf16.mxu0 %v7031_v43  ;;  %v7877_v43 = vpop.f32.mrf.mxu1 }
 0x25a   :  { %5254 = vmatpush2.bf16.msra.mxu1 %v7026_v48  ;;  %v7155_v48 = vld [vmem:[#allocation9 + $0x620] ss:$16 sps:$4 sm:$0xff]  }
 0x25b   :  { %5255 = vmatprep.subr.bf16.mxu1 %v7034_v11  ;;  %v7163_v11 = vld [vmem:[#allocation9 + $0x604] ss:$16 sps:$4 sm:$0xff]  }
 0x25c   :  { %5213 = vmatpush2.bf16.msra.mxu0 %v7029_v44  ;;  %v631_v44 = vrot.slane %v7839_v41, %v630_v45 }
 0x25d   :  { %5214 = vmatprep.subr.bf16.mxu0 %v7037_v47  ;;  %v3270_v47 = vpop.f32.mrf.mxu0 }
 0x25e   :  { %5256 = vmatpush2.bf16.msra.mxu1 %v7032_v54  ;;  %v7080_v54 = vld [vmem:[#allocation9 + $0x400] ss:$16 sps:$4 sm:$0xff]  }
 0x25f   :  { %5257 = vmatprep.subr.bf16.mxu1 %v7040_v24  ;;  %v7085_v24 = vld [vmem:[#allocation9 + $0x5e4] ss:$16 sps:$4 sm:$0xff]  }
 0x260   :  { %5215 = vmatpush2.bf16.msra.mxu0 %v7035_v50  ;;  %v7161_v50 = vld [vmem:[#allocation9 + $0x600] ss:$16 sps:$4 sm:$0xff]  }
 0x261   :  { %5216 = vmatprep.subr.bf16.mxu0 %v7043_v29  ;;  %v7169_v29 = vld [vmem:[#allocation9 + $0x7e4] ss:$16 sps:$4 sm:$0xff]  }
 0x262   :  { %5258 = vmatpush2.bf16.msra.mxu1 %v7038_v51  ;;  %v3315_v51 = vpop.f32.mrf.mxu1 }
 0x263   :  { %5259 = vmatprep.subr.bf16.mxu1 %v7046_v52  ;;  %v3269_v52 = vadd.f32 %v3268_v30, %v631_v44  ;;  %v7095_v30 = vld [vmem:[#allocation9 + $0x560] ss:$16 sps:$4 sm:$0xff]  }
 0x264   :  { %5217 = vmatpush2.bf16.msra.mxu0 %v7041_v14 }
 0x265   :  { %5218 = vmatprep.subr.bf16.mxu0 %v7049_v55  ;;  %v3272_v55 = vpop.f32.mrf.mxu0 }
 0x266   :  { %5260 = vmatpush2.bf16.msra.mxu1 %v7044_v53  ;;  %v7083_v53 = vld [vmem:[#allocation9 + $0x5e0] ss:$16 sps:$4 sm:$0xff]  }
 0x267   :  { %5261 = vmatprep.subr.bf16.mxu1 %v7052_v59  ;;  %v7088_v59 = vld [vmem:[#allocation9 + $0x5c4] ss:$16 sps:$4 sm:$0xff]  }
 0x268   :  { %5219 = vmatpush2.bf16.msra.mxu0 %v7047_v58  ;;  %v7167_v58 = vld [vmem:[#allocation9 + $0x7e0] ss:$16 sps:$4 sm:$0xff]  }
 0x269   :  { %5220 = vmatprep.subr.bf16.mxu0 %v7055_v0 }
 0x26a   :  { %5262 = vmatpush2.bf16.msra.mxu1 %v7050_v61  ;;  %v7175_v61 = vld [vmem:[#allocation9 + $0x7c4] ss:$16 sps:$4 sm:$0xff]  }
 0x26b   :  { %5263 = vmatprep.subr.bf16.mxu1 %v7058_v13  ;;  %v3312_v13 = vadd.f32 %v3311_v36, %v3269_v52 }
 0x26c   :  { %5221 = vmatpush2.bf16.msra.mxu0 %v7053_v3 }
 0x26d   :  { %5276 = vmatprep.subr.bf16.mxu0 %v7061_v40  ;;  %v3273_v40 = vadd.f32 %v3272_v55, %v631_v44  ;;  %v7191_v44 = vld [vmem:[#allocation9 + $0x760] ss:$16 sps:$4 sm:$0xff]  }
 0x26e   :  { %5264 = vmatpush2.bf16.msra.mxu1 %v7056_v4  ;;  %v7086_v4 = vld [vmem:[#allocation9 + $0x5c0] ss:$16 sps:$4 sm:$0xff]  }
 0x26f   :  { %5319 = vmatprep.subr.bf16.mxu1 %v7121_v5  ;;  %5223 = vmatmul.mubr.bf16.vlgmr.msra.gmra.mxu0 %v7801_v6 }
 0x270   :  { %5277 = vmatpush1.bf16.msra.mxu0 %v7059_v49  ;;  %v7091_v49 = vld [vmem:[#allocation9 + $0x5a4] ss:$16 sps:$4 sm:$0xff]  }
 0x271   :  { %5266 = vmatmul.mubr.bf16.vlgmr.msra.gmra.mxu1 %v7848_v63  ;;  %5278 = vmatprep.subr.bf16.mxu0 %v7064_v8  ;;  %v7880_v14 = vpop.f32.mrf.mxu1  ;;  %v7173_v8 = vld [vmem:[#allocation9 + $0x7c0] ss:$16 sps:$4 sm:$0xff]  }
 0x272   :  { %5320 = vmatpush1.bf16.msra.mxu1 %v7119_v10  ;;  %v626_v10 = vsub.s32 4, %v7768_v7 }
 0x273   :  { %5321 = vmatprep.subr.bf16.mxu1 %v7127_v15  ;;  %v3397_v3 = vpop.f32.mrf.mxu1 }
 0x274   :  { %5279 = vmatpush1.bf16.msra.mxu0 %v7062_v27  ;;  %v7181_v27 = vld [vmem:[#allocation9 + $0x7a4] ss:$16 sps:$4 sm:$0xff]  }
 0x275   :  { %5280 = vmatprep.subr.bf16.mxu0 %v7067_v2 }
 0x276   :  { %5322 = vmatpush1.bf16.msra.mxu1 %v7125_v42  ;;  %v3399_v42 = vpop.f32.mrf.mxu1 }
 0x277   :  { %5323 = vmatprep.subr.bf16.mxu1 %v7133_v19  ;;  %v7089_v19 = vld [vmem:[#allocation9 + $0x5a0] ss:$16 sps:$4 sm:$0xff]  }
 0x278   :  { %5281 = vmatpush1.bf16.msra.mxu0 %v7065_v20  ;;  %v3316_v20 = vadd.f32 %v3315_v51, %v3273_v40  ;;  %v7103_v51 = vld [vmem:[#allocation9 + $0x524] ss:$16 sps:$4 sm:$0xff]   ;;  %v7209_v40 = vld [vmem:[#allocation9 + $0x700] ss:$16 sps:$4 sm:$0xff]  }
 0x279   :  { %5282 = vmatprep.subr.bf16.mxu0 %v7070_v21 }
 0x27a   :  { %5324 = vmatpush1.bf16.msra.mxu1 %v7131_v57 }
 0x27b   :  { %5325 = vmatprep.subr.bf16.mxu1 %v7139_v1  ;;  %v7094_v1 = vld [vmem:[#allocation9 + $0x584] ss:$16 sps:$4 sm:$0xff]  }
 0x27c   :  { %5283 = vmatpush1.bf16.msra.mxu0 %v7068_v32  ;;  %v7179_v32 = vld [vmem:[#allocation9 + $0x7a0] ss:$16 sps:$4 sm:$0xff]  }
 0x27d   :  { %5284 = vmatprep.subr.bf16.mxu0 %v7073_v9  ;;  %v627_v9 = vrot.slane %v7839_v41, %v626_v10 }
 0x27e   :  { %5326 = vmatpush1.bf16.msra.mxu1 %v7137_v18  ;;  %v7187_v18 = vld [vmem:[#allocation9 + $0x784] ss:$16 sps:$4 sm:$0xff]  }
 0x27f   :  { %5327 = vmatprep.subr.bf16.mxu1 %v7145_v23  ;;  %v3267_v36 = vadd.f32 %v7874_v31, %v627_v9  ;;  %v7199_v31 = vld [vmem:[#allocation9 + $0x744] ss:$16 sps:$4 sm:$0xff]  }
 0x280   :  { %5285 = vmatpush1.bf16.msra.mxu0 %v7071_v25  ;;  %v3271_v25 = vadd.f32 %v3270_v47, %v627_v9  ;;  %v7136_v9 = vld [vmem:[#allocation9 + $0x2c] ss:$16 sps:$4 sm:$0xff]  }
 0x281   :  { %5286 = vmatprep.subr.bf16.mxu0 %v7076_v12  ;;  %v3401_v12 = vpop.f32.mrf.mxu1 }
 0x282   :  { %5328 = vmatpush1.bf16.msra.mxu1 %v7143_v60  ;;  %v7092_v60 = vld [vmem:[#allocation9 + $0x580] ss:$16 sps:$4 sm:$0xff]  }
 0x283   :  { %5329 = vmatprep.subr.bf16.mxu1 %v7151_v28 }
 0x284   :  { %5287 = vmatpush1.bf16.msra.mxu0 %v7074_v46 }
 0x285   :  { %5288 = vmatprep.subr.bf16.mxu0 %v7079_v17  ;;  %v7097_v17 = vld [vmem:[#allocation9 + $0x564] ss:$16 sps:$4 sm:$0xff]  }
 0x286   :  { %5330 = vmatpush1.bf16.msra.mxu1 %v7149_v33  ;;  %v7185_v33 = vld [vmem:[#allocation9 + $0x780] ss:$16 sps:$4 sm:$0xff]  }
 0x287   :  { %5331 = vmatprep.subr.bf16.mxu1 %v7157_v34  ;;  %v7193_v34 = vld [vmem:[#allocation9 + $0x764] ss:$16 sps:$4 sm:$0xff]  }
 0x288   :  { %5289 = vmatpush1.bf16.msra.mxu0 %v7077_v37  ;;  %v3314_v37 = vadd.f32 %v7877_v43, %v3271_v25  ;;  %v7098_v43 = vld [vmem:[#allocation9 + $0x540] ss:$16 sps:$4 sm:$0xff]   ;;  %v7148_v25 = vld [vmem:[#allocation9 + $0x1ec] ss:$16 sps:$4 sm:$0xff]  }
 0x289   :  { %5290 = vmatprep.subr.bf16.mxu0 %v7082_v39 }
 0x28a   :  { %5332 = vmatpush1.bf16.msra.mxu1 %v7155_v48 }
 0x28b   :  { %5333 = vmatprep.subr.bf16.mxu1 %v7163_v11  ;;  %v7100_v11 = vld [vmem:[#allocation9 + $0x544] ss:$16 sps:$4 sm:$0xff]  }
 0x28c   :  { %5291 = vmatpush1.bf16.msra.mxu0 %v7080_v54  ;;  %v3310_v54 = vadd.f32 %v7872_v26, %v3267_v36  ;;  %v7101_v26 = vld [vmem:[#allocation9 + $0x520] ss:$16 sps:$4 sm:$0xff]   ;;  %v7164_v36 = vld [vmem:[#allocation9 + $0x188] ss:$16 sps:$4 sm:$0xff]  }
 0x28d   :  { %5292 = vmatprep.subr.bf16.mxu0 %v7085_v24 }
 0x28e   :  { %5334 = vmatpush1.bf16.msra.mxu1 %v7161_v50 }
 0x28f   :  { %5335 = vmatprep.subr.bf16.mxu1 %v7169_v29  ;;  %v3352_v0 = vpop.f32.mrf.mxu0  ;;  %v7197_v29 = vld [vmem:[#allocation9 + $0x740] ss:$16 sps:$4 sm:$0xff]  }
 0x290   :  { %5293 = vmatpush2.bf16.msra.mxu0 %v7083_v53  ;;  %v3353_v50 = vadd.f32 %v3352_v0, %v3310_v54  ;;  %v7205_v53 = vld [vmem:[#allocation9 + $0x724] ss:$16 sps:$4 sm:$0xff]  }
 0x291   :  { %v3354_v5 = vpop.f32.mrf.mxu0  ;;  %5294 = vmatprep.subr.bf16.mxu0 %v7088_v59  ;;  %v7106_v59 = vld [vmem:[#allocation9 + $0x504] ss:$16 sps:$4 sm:$0xff]  }
 0x292   :  { %5336 = vmatpush2.bf16.msra.mxu1 %v7167_v58  ;;  %v3355_v15 = vadd.f32 %v3354_v5, %v3312_v13  ;;  %v3396_v55 = vadd.f32 %v7880_v14, %v3353_v50  ;;  %v7203_v58 = vld [vmem:[#allocation9 + $0x720] ss:$16 sps:$4 sm:$0xff]   ;;  %v7211_v0 = vld [vmem:[#allocation9 + $0x704] ss:$16 sps:$4 sm:$0xff]   ;;  %v7217_v14 = vld [vmem:[#allocation9 + $0x2ec] ss:$16 sps:$4 sm:$0xff]  }
 0x293   :  { %5337 = vmatprep.subr.bf16.mxu1 %v7175_v61  ;;  %v3356_v2 = vpop.f32.mrf.mxu0  ;;  %v634_v50 = vsub.s32 6, %v7768_v7 }
 0x294   :  { %5295 = vmatpush2.bf16.msra.mxu0 %v7086_v4  ;;  %v3398_v21 = vadd.f32 %v3397_v3, %v3355_v15  ;;  %v3357_v47 = vadd.f32 %v3356_v2, %v3314_v37  ;;  %v3596_v13 = vmul.f32 0.2, %v3396_v55  ;;  %v7104_v3 = vld [vmem:[#allocation9 + $0x500] ss:$16 sps:$4 sm:$0xff]   ;;  %vm3580_vm11 = vcmp.gt.f32.partialorder %v3396_v55, 0.0 }
 0x295   :  { %v3358_v57 = vpop.f32.mrf.mxu0  ;;  %5296 = vmatprep.subr.bf16.mxu0 %v7091_v49  ;;  %v7109_v4 = vld [vmem:[#allocation9 + $0xec] ss:$16 sps:$4 sm:$0xff]  }
 0x296   :  { %5338 = vmatpush2.bf16.msra.mxu1 %v7173_v8  ;;  %v3359_v23 = vadd.f32 %v3358_v57, %v3316_v20  ;;  %v3597_v28 = vmul.f32 0.2, %v3398_v21  ;;  %vm3581_vm8 = vcmp.gt.f32.partialorder %v3398_v21, 0.0  ;;  %v3400_v52 = vadd.f32 %v3399_v42, %v3357_v47  ;;  %v7107_v8 = vld [vmem:[#allocation9 + $0xe8] ss:$16 sps:$4 sm:$0xff]  }
 0x297   :  { %5339 = vmatprep.subr.bf16.mxu1 %v7181_v27  ;;  %v3612_v49 = vsel %vm3580_vm11, %v3396_v55, %v3596_v13  ;;  %v7112_v15 = vld [vmem:[#allocation9 + $0xcc] ss:$16 sps:$4 sm:$0xff]   ;;  %v7110_v27 = vld [vmem:[#allocation9 + $0xc8] ss:$16 sps:$4 sm:$0xff]   ;;  %v635_v55 = vrot.slane %v7839_v41, %v634_v50 }
 0x298   :  { %5297 = vmatpush2.bf16.msra.mxu0 %v7089_v19  ;;  %v3402_v46 = vadd.f32 %v3401_v12, %v3359_v23  ;;  %v3613_v39 = vsel %vm3581_vm8, %v3398_v21, %v3597_v28  ;;  %v3604_v61 = vmul.f32 0.2, %v3400_v52  ;;  %vm3588_vm10 = vcmp.gt.f32.partialorder %v3400_v52, 0.0  ;;  %v7115_v2 = vld [vmem:[#allocation9 + $0xac] ss:$16 sps:$4 sm:$0xff]  }
 0x299   :  { %5298 = vmatprep.subr.bf16.mxu0 %v7094_v1  ;;  %v7113_v42 = vld [vmem:[#allocation9 + $0xa8] ss:$16 sps:$4 sm:$0xff]   ;;  %v7118_v19 = vld [vmem:[#allocation9 + $0x8c] ss:$16 sps:$4 sm:$0xff]  }
 0x29a   :  { %5340 = vmatpush2.bf16.msra.mxu1 %v7179_v32  ;;  %vm3589_vm9 = vcmp.gt.f32.partialorder %v3402_v46, 0.0  ;;  %v3605_v45 = vmul.f32 0.2, %v3402_v46  ;;  %v3620_v5 = vsel %vm3588_vm10, %v3400_v52, %v3604_v61  ;;  %v7116_v20 = vld [vmem:[#allocation9 + $0x88] ss:$16 sps:$4 sm:$0xff]  }
 0x29b   :  { %5341 = vmatprep.subr.bf16.mxu1 %v7187_v18  ;;  %v7891_v10 = vpack.c.bf16 %v3620_v5, %v3612_v49  ;;  %v7124_v21 = vld [vmem:[#allocation9 + $0x6c] ss:$16 sps:$4 sm:$0xff]   ;;  %v7122_v57 = vld [vmem:[#allocation9 + $0x68] ss:$16 sps:$4 sm:$0xff]  }
 0x29c   :  { %5299 = vmatpush2.bf16.msra.mxu0 %v7092_v60  ;;  %v3621_v48 = vsel %vm3589_vm9, %v3402_v46, %v3605_v45  ;;  %v7130_v1 = vld [vmem:[#allocation9 + $0x4c] ss:$16 sps:$4 sm:$0xff]   ;;  %v7128_v32 = vld [vmem:[#allocation9 + $0x48] ss:$16 sps:$4 sm:$0xff]  }
 0x29d   :  { %5300 = vmatprep.subr.bf16.mxu0 %v7097_v17  ;;  %v7887_v24 = vpack.c.bf16 %v3621_v48, %v3613_v39  ;;  %v7142_v18 = vld [vmem:[#allocation9 + $0xc] ss:$16 sps:$4 sm:$0xff]   ;;  %v7140_v23 = vld [vmem:[#allocation9 + $0x8] ss:$16 sps:$4 sm:$0xff]  }
 0x29e   :  { %5342 = vmatpush2.bf16.msra.mxu1 %v7185_v33  ;;  %v7146_v12 = vld [vmem:[#allocation9 + $0x1e8] ss:$16 sps:$4 sm:$0xff]   ;;  %v7154_v60 = vld [vmem:[#allocation9 + $0x1cc] ss:$16 sps:$4 sm:$0xff]  }
 0x29f   :  { %5343 = vmatprep.subr.bf16.mxu1 %v7193_v34  ;;  %5308 = vmatprep.mubr.bf16.mxu0 %v7887_v24  ;;  %v7152_v28 = vld [vmem:[#allocation9 + $0x1c8] ss:$16 sps:$4 sm:$0xff]   ;;  %v7160_v46 = vld [vmem:[#allocation9 + $0x1ac] ss:$16 sps:$4 sm:$0xff]  }
 0x2a0   :  { %5301 = vmatpush2.bf16.msra.mxu0 %v7095_v30  ;;  %v7158_v17 = vld [vmem:[#allocation9 + $0x1a8] ss:$16 sps:$4 sm:$0xff]   ;;  %v7166_v33 = vld [vmem:[#allocation9 + $0x18c] ss:$16 sps:$4 sm:$0xff]  }
 0x2a1   :  { %5302 = vmatprep.subr.bf16.mxu0 %v7100_v11  ;;  %v7172_v34 = vld [vmem:[#allocation9 + $0x16c] ss:$16 sps:$4 sm:$0xff]   ;;  %v7170_v45 = vld [vmem:[#allocation9 + $0x168] ss:$16 sps:$4 sm:$0xff]  }
 0x2a2   :  { %5344 = vmatpush2.bf16.msra.mxu1 %v7191_v44  ;;  %v7178_v37 = vld [vmem:[#allocation9 + $0x14c] ss:$16 sps:$4 sm:$0xff]   ;;  %v7176_v30 = vld [vmem:[#allocation9 + $0x148] ss:$16 sps:$4 sm:$0xff]  }
 0x2a3   :  { %5345 = vmatprep.subr.bf16.mxu1 %v7199_v31  ;;  %v7184_v48 = vld [vmem:[#allocation9 + $0x12c] ss:$16 sps:$4 sm:$0xff]   ;;  %v7182_v44 = vld [vmem:[#allocation9 + $0x128] ss:$16 sps:$4 sm:$0xff]  }
 0x2a4   :  { %5303 = vmatpush2.bf16.msra.mxu0 %v7098_v43  ;;  %v7190_v47 = vld [vmem:[#allocation9 + $0x10c] ss:$16 sps:$4 sm:$0xff]   ;;  %v638_v43 = vsub.s32 7, %v7768_v7  ;;  %v7200_v5 = vld [vmem:[#allocation9 + $0x4c8] ss:$16 sps:$4 sm:$0xff]  }
 0x2a5   :  { %5304 = vmatprep.subr.bf16.mxu0 %v7103_v51  ;;  %v7188_v51 = vld [vmem:[#allocation9 + $0x108] ss:$16 sps:$4 sm:$0xff]   ;;  %v7196_v52 = vld [vmem:[#allocation9 + $0x4ec] ss:$16 sps:$4 sm:$0xff]  }
 0x2a6   :  { %5346 = vmatpush2.bf16.msra.mxu1 %v7197_v29  ;;  %v7202_v61 = vld [vmem:[#allocation9 + $0x4cc] ss:$16 sps:$4 sm:$0xff]   ;;  %v7224_v50 = vld [vmem:[#allocation9 + $0x448] ss:$16 sps:$4 sm:$0xff]  }
 0x2a7   :  { %5347 = vmatprep.subr.bf16.mxu1 %v7205_v53 }
 0x2a8   :  { %5305 = vmatpush2.bf16.msra.mxu0 %v7101_v26  ;;  %v639_v26 = vrot.slane %v7839_v41, %v638_v43  ;;  %v7232_v43 = vld [vmem:[#allocation9 + $0x42c] ss:$16 sps:$4 sm:$0xff]  }
 0x2a9   :  { %5306 = vmatprep.subr.bf16.mxu0 %v7106_v59  ;;  %v7194_v59 = vld [vmem:[#allocation9 + $0x4e8] ss:$16 sps:$4 sm:$0xff]  }
 0x2aa   :  { %5348 = vmatpush2.bf16.msra.mxu1 %v7203_v58 }
 0x2ab   :  { %5349 = vmatprep.subr.bf16.mxu1 %v7211_v0 }
 0x2ac   :  { %5307 = vmatpush2.bf16.msra.mxu0 %v7104_v3 }
 0x2ad   :  { %5362 = vmatprep.subr.bf16.mxu0 %v7109_v4 }
 0x2ae   :  { %5350 = vmatpush2.bf16.msra.mxu1 %v7209_v40 }
 0x2af   :  { %5405 = vmatprep.subr.bf16.mxu1 %v7217_v14  ;;  %5309 = vmatmul.mubr.bf16.vlgmr.msra.gmra.mxu0 %v7891_v10 }
 0x2b0   :  { %5363 = vmatpush1.bf16.msra.mxu0 %v7107_v8  ;;  %5394 = vmatprep.mubr.bf16.mxu0 %v7863_v38  ;;  %v7134_v38 = vld [vmem:[#allocation9 + $0x28] ss:$16 sps:$4 sm:$0xff]  }
 0x2b1   :  { %5364 = vmatprep.subr.bf16.mxu0 %v7112_v15  ;;  %v3438_v11 = vpop.f32.mrf.mxu1  ;;  %v7208_v15 = vld [vmem:[#allocation9 + $0x4ac] ss:$16 sps:$4 sm:$0xff]  }
 0x2b2   :  { %v3439_v13 = vadd.f32 %v3438_v11, %v635_v55 }
 0x2b3   :  { %v3440_v31 = vpop.f32.mrf.mxu1 }
 0x2b4   :  { %5365 = vmatpush1.bf16.msra.mxu0 %v7110_v27  ;;  %v3441_v3 = vadd.f32 %v3440_v31, %v639_v26  ;;  %v7223_v31 = vld [vmem:[#allocation9 + $0x2cc] ss:$16 sps:$4 sm:$0xff]  }
 0x2b5   :  { %5366 = vmatprep.subr.bf16.mxu0 %v7115_v2  ;;  %v3442_v53 = vpop.f32.mrf.mxu1 }
 0x2b6   :  { %v3443_v14 = vadd.f32 %v3442_v53, %v635_v55  ;;  %v7238_v53 = vld [vmem:[#allocation9 + $0x40c] ss:$16 sps:$4 sm:$0xff]   ;;  %v7227_v55 = vld [vmem:[#allocation9 + $0x2a8] ss:$16 sps:$4 sm:$0xff]  }
 0x2b7   :  { %v3444_v0 = vpop.f32.mrf.mxu1 }
 0x2b8   :  { %5367 = vmatpush1.bf16.msra.mxu0 %v7113_v42 }
 0x2b9   :  { %5368 = vmatprep.subr.bf16.mxu0 %v7118_v19 }
 0x2bc   :  { %5369 = vmatpush1.bf16.msra.mxu0 %v7116_v20  ;;  %v3445_v20 = vadd.f32 %v3444_v0, %v639_v26  ;;  %v7235_v26 = vld [vmem:[#allocation9 + $0x28c] ss:$16 sps:$4 sm:$0xff]   ;;  %v7242_v0 = vld [vmem:[#allocation9 + $0x5e8] ss:$16 sps:$4 sm:$0xff]  }
 0x2bd   :  { %5370 = vmatprep.subr.bf16.mxu0 %v7124_v21 }
 0x2c0   :  { %5371 = vmatpush1.bf16.msra.mxu0 %v7122_v57  ;;  %v7206_v57 = vld [vmem:[#allocation9 + $0x4a8] ss:$16 sps:$4 sm:$0xff]  }
 0x2c1   :  { %5372 = vmatprep.subr.bf16.mxu0 %v7130_v1 }
 0x2c4   :  { %5373 = vmatpush1.bf16.msra.mxu0 %v7128_v32  ;;  %v7214_v32 = vld [vmem:[#allocation9 + $0x48c] ss:$16 sps:$4 sm:$0xff]  }
 0x2c5   :  { %5374 = vmatprep.subr.bf16.mxu0 %v7136_v9 }
 0x2c8   :  { %5375 = vmatpush1.bf16.msra.mxu0 %v7134_v38 }
 0x2c9   :  { %5376 = vmatprep.subr.bf16.mxu0 %v7142_v18 }
 0x2cc   :  { %5377 = vmatpush1.bf16.msra.mxu0 %v7140_v23 }
 0x2cd   :  { %5378 = vmatprep.subr.bf16.mxu0 %v7148_v25 }
 0x2cf   :  { %v3481_v39 = vpop.f32.mrf.mxu0 }
 0x2d0   :  { %5379 = vmatpush2.bf16.msra.mxu0 %v7146_v12  ;;  %v3482_v49 = vadd.f32 %v3481_v39, %v3439_v13  ;;  %v7212_v12 = vld [vmem:[#allocation9 + $0x488] ss:$16 sps:$4 sm:$0xff]   ;;  %v7250_v13 = vld [vmem:[#allocation9 + $0x5cc] ss:$16 sps:$4 sm:$0xff]  }
 0x2d1   :  { %5380 = vmatprep.subr.bf16.mxu0 %v7154_v60  ;;  %v3483_v54 = vpop.f32.mrf.mxu0 }
 0x2d2   :  { %v3484_v8 = vadd.f32 %v3483_v54, %v3441_v3  ;;  %v7215_v54 = vld [vmem:[#allocation9 + $0x2e8] ss:$16 sps:$4 sm:$0xff]  }
 0x2d3   :  { %v3485_v29 = vpop.f32.mrf.mxu0  ;;  %v7239_v3 = vld [vmem:[#allocation9 + $0x268] ss:$16 sps:$4 sm:$0xff]  }
 0x2d4   :  { %5381 = vmatpush2.bf16.msra.mxu0 %v7152_v28  ;;  %v3486_v2 = vadd.f32 %v3485_v29, %v3443_v14  ;;  %v7229_v29 = vld [vmem:[#allocation9 + $0x2ac] ss:$16 sps:$4 sm:$0xff]   ;;  %v7245_v14 = vld [vmem:[#allocation9 + $0x248] ss:$16 sps:$4 sm:$0xff]  }
 0x2d5   :  { %5382 = vmatprep.subr.bf16.mxu0 %v7160_v46  ;;  %v3487_v58 = vpop.f32.mrf.mxu0  ;;  %v7220_v46 = vld [vmem:[#allocation9 + $0x46c] ss:$16 sps:$4 sm:$0xff]  }
 0x2d8   :  { %5383 = vmatpush2.bf16.msra.mxu0 %v7158_v17 }
 0x2d9   :  { %5384 = vmatprep.subr.bf16.mxu0 %v7166_v33 }
 0x2dc   :  { %5385 = vmatpush2.bf16.msra.mxu0 %v7164_v36 }
 0x2dd   :  { %5386 = vmatprep.subr.bf16.mxu0 %v7172_v34 }
 0x2e0   :  { %5387 = vmatpush2.bf16.msra.mxu0 %v7170_v45  ;;  %v7218_v45 = vld [vmem:[#allocation9 + $0x468] ss:$16 sps:$4 sm:$0xff]  }
 0x2e1   :  { %5388 = vmatprep.subr.bf16.mxu0 %v7178_v37 }
 0x2e4   :  { %5389 = vmatpush2.bf16.msra.mxu0 %v7176_v30  ;;  %v7226_v30 = vld [vmem:[#allocation9 + $0x44c] ss:$16 sps:$4 sm:$0xff]  }
 0x2e5   :  { %5390 = vmatprep.subr.bf16.mxu0 %v7184_v48 }
 0x2e8   :  { %5391 = vmatpush2.bf16.msra.mxu0 %v7182_v44 }
 0x2e9   :  { %5392 = vmatprep.subr.bf16.mxu0 %v7190_v47 }
 0x2ec   :  { %5393 = vmatpush2.bf16.msra.mxu0 %v7188_v51  ;;  %v7221_v51 = vld [vmem:[#allocation9 + $0x2c8] ss:$16 sps:$4 sm:$0xff]  }
 0x2ed   :  { %5448 = vmatprep.subr.bf16.mxu0 %v7196_v52  ;;  %v7230_v52 = vld [vmem:[#allocation9 + $0x428] ss:$16 sps:$4 sm:$0xff]  }
 0x2ef   :  { %v3567_v4 = vpop.f32.mrf.mxu0  ;;  %5395 = vmatmul.mubr.bf16.vlgmr.msra.gmra.mxu0 %v7801_v6 }
 0x2f0   :  { %5449 = vmatpush1.bf16.msra.mxu0 %v7194_v59  ;;  %5480 = vmatprep.mubr.bf16.mxu0 %v7887_v24  ;;  %v3488_v24 = vadd.f32 %v3487_v58, %v3445_v20  ;;  %v7236_v59 = vld [vmem:[#allocation9 + $0x408] ss:$16 sps:$4 sm:$0xff]   ;;  %v7244_v58 = vld [vmem:[#allocation9 + $0x5ec] ss:$16 sps:$4 sm:$0xff]  }
 0x2f1   :  { %v3524_v40 = vpop.f32.mrf.mxu1  ;;  %v3569_v41 = vpop.f32.mrf.mxu0  ;;  %5450 = vmatprep.subr.bf16.mxu0 %v7202_v61  ;;  %v7233_v61 = vld [vmem:[#allocation9 + $0x288] ss:$16 sps:$4 sm:$0xff]   ;;  %v7265_v20 = vld [vmem:[#allocation9 + $0x3ec] ss:$16 sps:$4 sm:$0xff]  }
 0x2f2   :  { %v3525_v42 = vadd.f32 %v3524_v40, %v3482_v49  ;;  %v7248_v40 = vld [vmem:[#allocation9 + $0x5c8] ss:$16 sps:$4 sm:$0xff]   ;;  %v7253_v49 = vld [vmem:[#allocation9 + $0x22c] ss:$16 sps:$4 sm:$0xff]  }
 0x2f3   :  { %v3526_v27 = vpop.f32.mrf.mxu1  ;;  %v3571_v1 = vpop.f32.mrf.mxu0 }
 0x2f4   :  { %v3527_v19 = vadd.f32 %v3526_v27, %v3484_v8  ;;  %5451 = vmatpush1.bf16.msra.mxu0 %v7200_v5  ;;  %v3568_v18 = vadd.f32 %v3567_v4, %v3525_v42  ;;  %v7247_v4 = vld [vmem:[#allocation9 + $0x24c] ss:$16 sps:$4 sm:$0xff]   ;;  %v7254_v8 = vld [vmem:[#allocation9 + $0x5a8] ss:$16 sps:$4 sm:$0xff]  }
 0x2f5   :  { %v3528_v21 = vpop.f32.mrf.mxu1  ;;  %5452 = vmatprep.subr.bf16.mxu0 %v7208_v15  ;;  %v3573_v28 = vpop.f32.mrf.mxu0  ;;  %v7256_v5 = vld [vmem:[#allocation9 + $0x5ac] ss:$16 sps:$4 sm:$0xff]   ;;  %v7251_v15 = vld [vmem:[#allocation9 + $0x228] ss:$16 sps:$4 sm:$0xff]  }
 0x2f6   :  { %v3529_v6 = vadd.f32 %v3528_v21, %v3486_v2  ;;  %v3570_v9 = vadd.f32 %v3569_v41, %v3527_v19  ;;  %v3598_v36 = vmul.f32 0.2, %v3568_v18  ;;  %vm3582_vm14 = vcmp.gt.f32.partialorder %v3568_v18, 0.0  ;;  %v7262_v41 = vld [vmem:[#allocation9 + $0x58c] ss:$16 sps:$4 sm:$0xff]  }
 0x2f7   :  { %v3530_v38 = vpop.f32.mrf.mxu1  ;;  %v7259_v27 = vld [vmem:[#allocation9 + $0x20c] ss:$16 sps:$4 sm:$0xff]   ;;  %v7260_v2 = vld [vmem:[#allocation9 + $0x588] ss:$16 sps:$4 sm:$0xff]  }
 0x2f8   :  { %v3572_v23 = vadd.f32 %v3571_v1, %v3529_v6  ;;  %v3531_v25 = vadd.f32 %v3530_v38, %v3488_v24  ;;  %5453 = vmatpush1.bf16.msra.mxu0 %v7206_v57  ;;  %v3599_v17 = vmul.f32 0.2, %v3570_v9  ;;  %vm3583_vm13 = vcmp.gt.f32.partialorder %v3570_v9, 0.0  ;;  %v7268_v42 = vld [vmem:[#allocation9 + $0x56c] ss:$16 sps:$4 sm:$0xff]  }
 0x2f9   :  { %5454 = vmatprep.subr.bf16.mxu0 %v7214_v32  ;;  %v3614_v11 = vsel %vm3582_vm14, %v3568_v18, %v3598_v36  ;;  %v7257_v19 = vld [vmem:[#allocation9 + $0x208] ss:$16 sps:$4 sm:$0xff]   ;;  %v7274_v57 = vld [vmem:[#allocation9 + $0x54c] ss:$16 sps:$4 sm:$0xff]  }
 0x2fa   :  { %v3606_v60 = vmul.f32 0.2, %v3572_v23  ;;  %vm3590_vm12 = vcmp.gt.f32.partialorder %v3572_v23, 0.0  ;;  %v3574_v33 = vadd.f32 %v3573_v28, %v3531_v25  ;;  %v3615_v39 = vsel %vm3583_vm13, %v3570_v9, %v3599_v17  ;;  %v7266_v21 = vld [vmem:[#allocation9 + $0x568] ss:$16 sps:$4 sm:$0xff]  }
 0x2fb   :  { %v7263_v6 = vld [vmem:[#allocation9 + $0x3e8] ss:$16 sps:$4 sm:$0xff]   ;;  %v7271_v1 = vld [vmem:[#allocation9 + $0x3cc] ss:$16 sps:$4 sm:$0xff]  }
 0x2fc   :  { %vm3591_vm15 = vcmp.gt.f32.partialorder %v3574_v33, 0.0  ;;  %v3607_v34 = vmul.f32 0.2, %v3574_v33  ;;  %5455 = vmatpush1.bf16.msra.mxu0 %v7212_v12  ;;  %v3622_v37 = vsel %vm3590_vm12, %v3572_v23, %v3606_v60  ;;  %v7272_v32 = vld [vmem:[#allocation9 + $0x548] ss:$16 sps:$4 sm:$0xff]   ;;  %vm6154_vm12 = vcmask 122880  }
 0x2fd   :  { %5456 = vmatprep.subr.bf16.mxu0 %v7220_v46  ;;  %v7903_v47 = vpack.c.bf16 %v3622_v37, %v3614_v11  ;;  %v7280_v24 = vld [vmem:[#allocation9 + $0x52c] ss:$16 sps:$4 sm:$0xff]   ;;  %v7269_v9 = vld [vmem:[#allocation9 + $0x3c8] ss:$16 sps:$4 sm:$0xff]  }
 0x2fe   :  { %v3623_v48 = vsel %vm3591_vm15, %v3574_v33, %v3607_v34  ;;  %v7277_v38 = vld [vmem:[#allocation9 + $0x3ac] ss:$16 sps:$4 sm:$0xff]   ;;  %v7278_v18 = vld [vmem:[#allocation9 + $0x528] ss:$16 sps:$4 sm:$0xff]  }
 0x2ff   :  { %v7901_v44 = vpack.c.bf16 %v3623_v48, %v3615_v39  ;;  %v7286_v23 = vld [vmem:[#allocation9 + $0x50c] ss:$16 sps:$4 sm:$0xff]   ;;  %v7275_v25 = vld [vmem:[#allocation9 + $0x3a8] ss:$16 sps:$4 sm:$0xff]  }
 0x300   :  { %5457 = vmatpush1.bf16.msra.mxu0 %v7218_v45  ;;  %v7283_v12 = vld [vmem:[#allocation9 + $0x38c] ss:$16 sps:$4 sm:$0xff]   ;;  %v7284_v60 = vld [vmem:[#allocation9 + $0x508] ss:$16 sps:$4 sm:$0xff]  }
 0x301   :  { %5351 = vmatprep.mubr.bf16.mxu1 %v7901_v44  ;;  %5458 = vmatprep.subr.bf16.mxu0 %v7226_v30  ;;  %v7349_v28 = vld [vmem:[#allocation12 + $0x74] ss:$8 sps:$4 sm:$0xff]   ;;  %v7289_v17 = vld [vmem:[#allocation9 + $0x36c] ss:$16 sps:$4 sm:$0xff]   ;;  %v7352_v36 = vld [vmem:[#allocation12 + $0x64] ss:$8 sps:$4 sm:$0xff]  }
 0x302   :  { %5352 = vmatmul.mubr.bf16.vlgmr.msra.gmra.mxu1 %v7903_v47  ;;  %v7281_v46 = vld [vmem:[#allocation9 + $0x388] ss:$16 sps:$4 sm:$0xff]   ;;  %v7347_v33 = vld [vmem:[#allocation12 + $0x70] ss:$8 sps:$4 sm:$0xff]   ;;  %v7350_v37 = vld [vmem:[#allocation12 + $0x60] ss:$8 sps:$4 sm:$0xff]  }
 0x303   :  { %5406 = vmatpush1.bf16.msra.mxu1 %v7215_v54  ;;  %5437 = vmatprep.mubr.bf16.mxu1 %v7866_v62  ;;  %v7241_v62 = vld [vmem:[#allocation9 + $0x26c] ss:$16 sps:$4 sm:$0xff]   ;;  %v7287_v34 = vld [vmem:[#allocation9 + $0x368] ss:$16 sps:$4 sm:$0xff]  }
 0x304   :  { %5407 = vmatprep.subr.bf16.mxu1 %v7223_v31  ;;  %5459 = vmatpush1.bf16.msra.mxu0 %v7224_v50  ;;  %v7292_v45 = vld [vmem:[#allocation9 + $0x34c] ss:$16 sps:$4 sm:$0xff]   ;;  %v7355_v30 = vld [vmem:[#allocation12 + $0x54] ss:$8 sps:$4 sm:$0xff]   ;;  %v7358_v54 = vld [vmem:[#allocation12 + $0x44] ss:$8 sps:$4 sm:$0xff]  }
 0x305   :  { %5460 = vmatprep.subr.bf16.mxu0 %v7232_v43  ;;  %v7290_v39 = vld [vmem:[#allocation9 + $0x348] ss:$16 sps:$4 sm:$0xff]   ;;  %v7295_v48 = vld [vmem:[#allocation9 + $0x32c] ss:$16 sps:$4 sm:$0xff]  }
 0x306   :  { %v7353_v11 = vld [vmem:[#allocation12 + $0x50] ss:$8 sps:$4 sm:$0xff]   ;;  %v7293_v31 = vld [vmem:[#allocation9 + $0x328] ss:$16 sps:$4 sm:$0xff]  }
 0x307   :  { %5408 = vmatpush1.bf16.msra.mxu1 %v7221_v51  ;;  %v7298_v50 = vld [vmem:[#allocation9 + $0x30c] ss:$16 sps:$4 sm:$0xff]   ;;  %v7361_v43 = vld [vmem:[#allocation12 + $0x34] ss:$8 sps:$4 sm:$0xff]  }
 0x308   :  { %5409 = vmatprep.subr.bf16.mxu1 %v7229_v29  ;;  %5461 = vmatpush1.bf16.msra.mxu0 %v7230_v52  ;;  %v7296_v51 = vld [vmem:[#allocation9 + $0x308] ss:$16 sps:$4 sm:$0xff]   ;;  %v7301_v29 = vld [vmem:[#allocation9 + $0x6ec] ss:$16 sps:$4 sm:$0xff]  }
 0x309   :  { %5462 = vmatprep.subr.bf16.mxu0 %v7238_v53  ;;  %v7359_v52 = vld [vmem:[#allocation12 + $0x30] ss:$8 sps:$4 sm:$0xff]   ;;  %v7364_v53 = vld [vmem:[#allocation12 + $0x24] ss:$8 sps:$4 sm:$0xff]  }
 0x30b   :  { %5410 = vmatpush1.bf16.msra.mxu1 %v7227_v55  ;;  %v7299_v55 = vld [vmem:[#allocation9 + $0x6e8] ss:$16 sps:$4 sm:$0xff]  }
 0x30c   :  { %5411 = vmatprep.subr.bf16.mxu1 %v7235_v26  ;;  %5463 = vmatpush1.bf16.msra.mxu0 %v7236_v59  ;;  %v7304_v26 = vld [vmem:[#allocation9 + $0x6cc] ss:$16 sps:$4 sm:$0xff]  }
 0x30d   :  { %5464 = vmatprep.subr.bf16.mxu0 %v7244_v58  ;;  %v7362_v59 = vld [vmem:[#allocation12 + $0x20] ss:$8 sps:$4 sm:$0xff]   ;;  %v7367_v58 = vld [vmem:[#allocation12 + $0x14] ss:$8 sps:$4 sm:$0xff]  }
 0x30f   :  { %5412 = vmatpush1.bf16.msra.mxu1 %v7233_v61  ;;  %v7302_v61 = vld [vmem:[#allocation9 + $0x6c8] ss:$16 sps:$4 sm:$0xff]  }
 0x310   :  { %5413 = vmatprep.subr.bf16.mxu1 %v7241_v62  ;;  %5465 = vmatpush2.bf16.msra.mxu0 %v7242_v0  ;;  %v7307_v62 = vld [vmem:[#allocation9 + $0x6ac] ss:$16 sps:$4 sm:$0xff]  }
 0x311   :  { %5466 = vmatprep.subr.bf16.mxu0 %v7250_v13  ;;  %v7365_v0 = vld [vmem:[#allocation12 + $0x10] ss:$8 sps:$4 sm:$0xff]   ;;  %v7370_v13 = vld [vmem:[#allocation12 + $0x4] ss:$8 sps:$4 sm:$0xff]  }
 0x313   :  { %5414 = vmatpush1.bf16.msra.mxu1 %v7239_v3  ;;  %v7305_v3 = vld [vmem:[#allocation9 + $0x6a8] ss:$16 sps:$4 sm:$0xff]  }
 0x314   :  { %5415 = vmatprep.subr.bf16.mxu1 %v7247_v4  ;;  %5467 = vmatpush2.bf16.msra.mxu0 %v7248_v40  ;;  %v7310_v4 = vld [vmem:[#allocation9 + $0x68c] ss:$16 sps:$4 sm:$0xff]  }
 0x315   :  { %5468 = vmatprep.subr.bf16.mxu0 %v7256_v5  ;;  %v7368_v40 = vld [vmem:[#allocation12] ss:$8 sps:$4 sm:$0xff]   ;;  %v7373_v5 = vld [vmem:[#allocation12 + $0xf4] ss:$8 sps:$4 sm:$0xff]  }
 0x317   :  { %5416 = vmatpush1.bf16.msra.mxu1 %v7245_v14  ;;  %v7313_v14 = vld [vmem:[#allocation9 + $0x66c] ss:$16 sps:$4 sm:$0xff]  }
 0x318   :  { %5417 = vmatprep.subr.bf16.mxu1 %v7253_v49  ;;  %5469 = vmatpush2.bf16.msra.mxu0 %v7254_v8  ;;  %v7376_v49 = vld [vmem:[#allocation12 + $0xe4] ss:$8 sps:$4 sm:$0xff]  }
 0x319   :  { %5470 = vmatprep.subr.bf16.mxu0 %v7262_v41  ;;  %v7311_v8 = vld [vmem:[#allocation9 + $0x668] ss:$16 sps:$4 sm:$0xff]   ;;  %v7316_v41 = vld [vmem:[#allocation9 + $0x64c] ss:$16 sps:$4 sm:$0xff]  }
 0x31b   :  { %5418 = vmatpush1.bf16.msra.mxu1 %v7251_v15  ;;  %v7374_v15 = vld [vmem:[#allocation12 + $0xe0] ss:$8 sps:$4 sm:$0xff]  }
 0x31c   :  { %5419 = vmatprep.subr.bf16.mxu1 %v7259_v27  ;;  %5471 = vmatpush2.bf16.msra.mxu0 %v7260_v2  ;;  %v7379_v27 = vld [vmem:[#allocation12 + $0xd4] ss:$8 sps:$4 sm:$0xff]  }
 0x31d   :  { %5472 = vmatprep.subr.bf16.mxu0 %v7268_v42  ;;  %v7314_v2 = vld [vmem:[#allocation9 + $0x648] ss:$16 sps:$4 sm:$0xff]   ;;  %v7319_v42 = vld [vmem:[#allocation9 + $0x62c] ss:$16 sps:$4 sm:$0xff]  }
 0x31f   :  { %5420 = vmatpush1.bf16.msra.mxu1 %v7257_v19  ;;  %v7377_v19 = vld [vmem:[#allocation12 + $0xd0] ss:$8 sps:$4 sm:$0xff]  }
 0x320   :  { %5421 = vmatprep.subr.bf16.mxu1 %v7265_v20  ;;  %5473 = vmatpush2.bf16.msra.mxu0 %v7266_v21  ;;  %v7382_v20 = vld [vmem:[#allocation12 + $0xc4] ss:$8 sps:$4 sm:$0xff]  }
 0x321   :  { %5474 = vmatprep.subr.bf16.mxu0 %v7274_v57  ;;  %v7317_v21 = vld [vmem:[#allocation9 + $0x628] ss:$16 sps:$4 sm:$0xff]   ;;  %v7322_v57 = vld [vmem:[#allocation9 + $0x60c] ss:$16 sps:$4 sm:$0xff]  }
 0x323   :  { %5422 = vmatpush2.bf16.msra.mxu1 %v7263_v6  ;;  %v7380_v6 = vld [vmem:[#allocation12 + $0xc0] ss:$8 sps:$4 sm:$0xff]  }
 0x324   :  { %5423 = vmatprep.subr.bf16.mxu1 %v7271_v1  ;;  %5475 = vmatpush2.bf16.msra.mxu0 %v7272_v32  ;;  %v7385_v1 = vld [vmem:[#allocation12 + $0xb4] ss:$8 sps:$4 sm:$0xff]  }
 0x325   :  { %5476 = vmatprep.subr.bf16.mxu0 %v7280_v24  ;;  %v7320_v32 = vld [vmem:[#allocation9 + $0x608] ss:$16 sps:$4 sm:$0xff]   ;;  %v7325_v24 = vld [vmem:[#allocation9 + $0x7ec] ss:$16 sps:$4 sm:$0xff]  }
 0x327   :  { %5424 = vmatpush2.bf16.msra.mxu1 %v7269_v9  ;;  %v7383_v9 = vld [vmem:[#allocation12 + $0xb0] ss:$8 sps:$4 sm:$0xff]  }
 0x328   :  { %5425 = vmatprep.subr.bf16.mxu1 %v7277_v38  ;;  %5477 = vmatpush2.bf16.msra.mxu0 %v7278_v18  ;;  %v7388_v38 = vld [vmem:[#allocation12 + $0xa4] ss:$8 sps:$4 sm:$0xff]  }
 0x329   :  { %5478 = vmatprep.subr.bf16.mxu0 %v7286_v23  ;;  %v7323_v18 = vld [vmem:[#allocation9 + $0x7e8] ss:$16 sps:$4 sm:$0xff]   ;;  %v7328_v23 = vld [vmem:[#allocation9 + $0x7cc] ss:$16 sps:$4 sm:$0xff]  }
 0x32b   :  { %5426 = vmatpush2.bf16.msra.mxu1 %v7275_v25  ;;  %v7386_v25 = vld [vmem:[#allocation12 + $0xa0] ss:$8 sps:$4 sm:$0xff]  }
 0x32c   :  { %5427 = vmatprep.subr.bf16.mxu1 %v7283_v12  ;;  %5479 = vmatpush2.bf16.msra.mxu0 %v7284_v60  ;;  %v7391_v12 = vld [vmem:[#allocation12 + $0x94] ss:$8 sps:$4 sm:$0xff]  }
 0x32d   :  { %5958 = vmatprep.subr.bf16.mxu0 %v7349_v28  ;;  %v7326_v60 = vld [vmem:[#allocation9 + $0x7c8] ss:$16 sps:$4 sm:$0xff]   ;;  %v7331_v28 = vld [vmem:[#allocation9 + $0x7ac] ss:$16 sps:$4 sm:$0xff]  }
 0x32f   :  { %5428 = vmatpush2.bf16.msra.mxu1 %v7281_v46  ;;  %5481 = vmatmul.mubr.bf16.vlgmr.msra.gmra.mxu0 %v7891_v10  ;;  %v7356_v10 = vld [vmem:[#allocation12 + $0x40] ss:$8 sps:$4 sm:$0xff]   ;;  %v7389_v46 = vld [vmem:[#allocation12 + $0x90] ss:$8 sps:$4 sm:$0xff]  }
 0x330   :  { %5429 = vmatprep.subr.bf16.mxu1 %v7289_v17  ;;  %5959 = vmatpush1.bf16.msra.mxu0 %v7347_v33  ;;  %v7394_v17 = vld [vmem:[#allocation12 + $0x84] ss:$8 sps:$4 sm:$0xff]  }
 0x331   :  { %5960 = vmatprep.subr.bf16.mxu0 %v7352_v36  ;;  %v7329_v33 = vld [vmem:[#allocation9 + $0x7a8] ss:$16 sps:$4 sm:$0xff]   ;;  %v7334_v36 = vld [vmem:[#allocation9 + $0x78c] ss:$16 sps:$4 sm:$0xff]  }
 0x333   :  { %5430 = vmatpush2.bf16.msra.mxu1 %v7287_v34  ;;  %v7392_v34 = vld [vmem:[#allocation12 + $0x80] ss:$8 sps:$4 sm:$0xff]  }
 0x334   :  { %5431 = vmatprep.subr.bf16.mxu1 %v7292_v45  ;;  %5961 = vmatpush1.bf16.msra.mxu0 %v7350_v37  ;;  %v7332_v45 = vld [vmem:[#allocation9 + $0x788] ss:$16 sps:$4 sm:$0xff]   ;;  %v7337_v37 = vld [vmem:[#allocation9 + $0x76c] ss:$16 sps:$4 sm:$0xff]  }
 0x335   :  { %5962 = vmatprep.subr.bf16.mxu0 %v7355_v30  ;;  %v7335_v30 = vld [vmem:[#allocation9 + $0x768] ss:$16 sps:$4 sm:$0xff]  }
 0x337   :  { %5432 = vmatpush2.bf16.msra.mxu1 %v7290_v39  ;;  %v7340_v39 = vld [vmem:[#allocation9 + $0x74c] ss:$16 sps:$4 sm:$0xff]  }
 0x338   :  { %5433 = vmatprep.subr.bf16.mxu1 %v7295_v48  ;;  %5963 = vmatpush1.bf16.msra.mxu0 %v7353_v11  ;;  %v7338_v48 = vld [vmem:[#allocation9 + $0x748] ss:$16 sps:$4 sm:$0xff]   ;;  %v7343_v11 = vld [vmem:[#allocation9 + $0x72c] ss:$16 sps:$4 sm:$0xff]  }
 0x339   :  { %5964 = vmatprep.subr.bf16.mxu0 %v7358_v54  ;;  %v7341_v54 = vld [vmem:[#allocation9 + $0x728] ss:$16 sps:$4 sm:$0xff]  }
 0x33b   :  { %5434 = vmatpush2.bf16.msra.mxu1 %v7293_v31  ;;  %v7346_v31 = vld [vmem:[#allocation9 + $0x70c] ss:$16 sps:$4 sm:$0xff]  }
 0x33c   :  { %5435 = vmatprep.subr.bf16.mxu1 %v7298_v50  ;;  %5965 = vmatpush1.bf16.msra.mxu0 %v7356_v10  ;;  %v7344_v50 = vld [vmem:[#allocation9 + $0x708] ss:$16 sps:$4 sm:$0xff]   ;;  %v7395_v10 = vld [vmem:[#allocation12 + $0x170] ss:$8 sps:$4 sm:$0xff]  }
 0x33d   :  { %5966 = vmatprep.subr.bf16.mxu0 %v7361_v43  ;;  %v7397_v43 = vld [vmem:[#allocation12 + $0x174] ss:$8 sps:$4 sm:$0xff]  }
 0x33f   :  { %5436 = vmatpush2.bf16.msra.mxu1 %v7296_v51  ;;  %v7400_v51 = vld [vmem:[#allocation12 + $0x164] ss:$8 sps:$4 sm:$0xff]  }
 0x340   :  { %5491 = vmatprep.subr.bf16.mxu1 %v7301_v29  ;;  %5967 = vmatpush1.bf16.msra.mxu0 %v7359_v52  ;;  %v7398_v29 = vld [vmem:[#allocation12 + $0x160] ss:$8 sps:$4 sm:$0xff]   ;;  %v7403_v52 = vld [vmem:[#allocation12 + $0x154] ss:$8 sps:$4 sm:$0xff]  }
 0x341   :  { %5968 = vmatprep.subr.bf16.mxu0 %v7364_v53  ;;  %v7401_v53 = vld [vmem:[#allocation12 + $0x150] ss:$8 sps:$4 sm:$0xff]  }
 0x342   :  { %5438 = vmatmul.mubr.bf16.vlgmr.msra.gmra.mxu1 %v7848_v63  ;;  %v7308_v63 = vld [vmem:[#allocation9 + $0x688] ss:$16 sps:$4 sm:$0xff]  }
 0x343   :  { %5492 = vmatpush1.bf16.msra.mxu1 %v7299_v55  ;;  %5523 = vmatprep.mubr.bf16.mxu1 %v7901_v44  ;;  %v7371_v44 = vld [vmem:[#allocation12 + $0xf0] ss:$8 sps:$4 sm:$0xff]   ;;  %v7406_v55 = vld [vmem:[#allocation12 + $0x144] ss:$8 sps:$4 sm:$0xff]  }
 0x344   :  { %5493 = vmatprep.subr.bf16.mxu1 %v7304_v26  ;;  %5969 = vmatpush1.bf16.msra.mxu0 %v7362_v59  ;;  %v7404_v26 = vld [vmem:[#allocation12 + $0x140] ss:$8 sps:$4 sm:$0xff]   ;;  %v7409_v59 = vld [vmem:[#allocation12 + $0x134] ss:$8 sps:$4 sm:$0xff]  }
 0x345   :  { %5970 = vmatprep.subr.bf16.mxu0 %v7367_v58  ;;  %v7407_v58 = vld [vmem:[#allocation12 + $0x130] ss:$8 sps:$4 sm:$0xff]  }
 0x347   :  { %5494 = vmatpush1.bf16.msra.mxu1 %v7302_v61  ;;  %v7410_v61 = vld [vmem:[#allocation12 + $0x120] ss:$8 sps:$4 sm:$0xff]  }
 0x348   :  { %5495 = vmatprep.subr.bf16.mxu1 %v7307_v62  ;;  %5971 = vmatpush1.bf16.msra.mxu0 %v7365_v0  ;;  %v7415_v62 = vld [vmem:[#allocation12 + $0x114] ss:$8 sps:$4 sm:$0xff]   ;;  %v7413_v0 = vld [vmem:[#allocation12 + $0x110] ss:$8 sps:$4 sm:$0xff]  }
 0x349   :  { %5972 = vmatprep.subr.bf16.mxu0 %v7370_v13  ;;  %v7418_v13 = vld [vmem:[#allocation12 + $0x104] ss:$8 sps:$4 sm:$0xff]  }
 0x34b   :  { %5496 = vmatpush1.bf16.msra.mxu1 %v7305_v3  ;;  %v7416_v3 = vld [vmem:[#allocation12 + $0x100] ss:$8 sps:$4 sm:$0xff]  }
 0x34c   :  { %5497 = vmatprep.subr.bf16.mxu1 %v7310_v4  ;;  %5973 = vmatpush1.bf16.msra.mxu0 %v7368_v40  ;;  %v7421_v4 = vld [vmem:[#allocation12 + $0x1f4] ss:$8 sps:$4 sm:$0xff]   ;;  %v7419_v40 = vld [vmem:[#allocation12 + $0x1f0] ss:$8 sps:$4 sm:$0xff]  }
 0x34d   :  { %5974 = vmatprep.subr.bf16.mxu0 %v7373_v5  ;;  %v7424_v5 = vld [vmem:[#allocation12 + $0x1e4] ss:$8 sps:$4 sm:$0xff]  }
 0x34f   :  { %5498 = vmatpush1.bf16.msra.mxu1 %v7308_v63  ;;  %v5224_v63 = vpop.f32.mrf.mxu0 }
 0x350   :  { %5499 = vmatprep.subr.bf16.mxu1 %v7313_v14  ;;  %5975 = vmatpush2.bf16.msra.mxu0 %v7371_v44  ;;  %v7422_v14 = vld [vmem:[#allocation12 + $0x1e0] ss:$8 sps:$4 sm:$0xff]   ;;  %v7427_v44 = vld [vmem:[#allocation12 + $0x1d4] ss:$8 sps:$4 sm:$0xff]  }
 0x351   :  { %5976 = vmatprep.subr.bf16.mxu0 %v7376_v49  ;;  %v5226_v49 = vpop.f32.mrf.mxu0 }
 0x353   :  { %5500 = vmatpush1.bf16.msra.mxu1 %v7311_v8  ;;  %v7425_v8 = vld [vmem:[#allocation12 + $0x1d0] ss:$8 sps:$4 sm:$0xff]  }
 0x354   :  { %5501 = vmatprep.subr.bf16.mxu1 %v7316_v41  ;;  %5977 = vmatpush2.bf16.msra.mxu0 %v7374_v15  ;;  %v7430_v41 = vld [vmem:[#allocation12 + $0x1c4] ss:$8 sps:$4 sm:$0xff]   ;;  %v5228_v15 = vpop.f32.mrf.mxu0 }
 0x355   :  { %5978 = vmatprep.subr.bf16.mxu0 %v7379_v27  ;;  %v5267_v27 = vpop.f32.mrf.mxu1 }
 0x357   :  { %5502 = vmatpush1.bf16.msra.mxu1 %v7314_v2  ;;  %v7428_v2 = vld [vmem:[#allocation12 + $0x1c0] ss:$8 sps:$4 sm:$0xff]  }
 0x358   :  { %5503 = vmatprep.subr.bf16.mxu1 %v7319_v42  ;;  %5979 = vmatpush2.bf16.msra.mxu0 %v7377_v19  ;;  %v7433_v42 = vld [vmem:[#allocation12 + $0x1b4] ss:$8 sps:$4 sm:$0xff]   ;;  %v5230_v19 = vpop.f32.mrf.mxu0 }
 0x359   :  { %5980 = vmatprep.subr.bf16.mxu0 %v7382_v20  ;;  %v7912_v20 = vld [vmem:[#allocation11] sm:$0xf] }
 0x35b   :  { %5504 = vmatpush1.bf16.msra.mxu1 %v7317_v21  ;;  %v5269_v21 = vpop.f32.mrf.mxu1 }
 0x35c   :  { %5505 = vmatprep.subr.bf16.mxu1 %v7322_v57  ;;  %5981 = vmatpush2.bf16.msra.mxu0 %v7380_v6  ;;  %v7431_v6 = vld [vmem:[#allocation12 + $0x1b0] ss:$8 sps:$4 sm:$0xff]  }
 0x35d   :  { %5982 = vmatprep.subr.bf16.mxu0 %v7385_v1  ;;  %v3897_v1 = vrot.slane %v7912_v20, %v7835_v22 }
 0x35f   :  { %5506 = vmatpush1.bf16.msra.mxu1 %v7320_v32  ;;  %v3893_v32 = vrot.slane %v7912_v20, %v7771_v16 }
 0x360   :  { %5507 = vmatprep.subr.bf16.mxu1 %v7325_v24  ;;  %5983 = vmatpush2.bf16.msra.mxu0 %v7383_v9  ;;  %v5271_v24 = vpop.f32.mrf.mxu1 }
 0x361   :  { %5984 = vmatprep.subr.bf16.mxu0 %v7388_v38  ;;  %v5227_v38 = vadd.f32 %v5226_v49, %v3897_v1 }
 0x363   :  { %5508 = vmatpush2.bf16.msra.mxu1 %v7323_v18  ;;  %v5225_v18 = vadd.f32 %v5224_v63, %v3893_v32 }
 0x364   :  { %5509 = vmatprep.subr.bf16.mxu1 %v7328_v23  ;;  %5985 = vmatpush2.bf16.msra.mxu0 %v7386_v25  ;;  %v5229_v23 = vadd.f32 %v5228_v15, %v3893_v32  ;;  %v5273_v25 = vpop.f32.mrf.mxu1  ;;  %v3901_v15 = vrot.slane %v7912_v20, %v618_v56 }
 0x365   :  { %5986 = vmatprep.subr.bf16.mxu0 %v7391_v12 }
 0x367   :  { %5510 = vmatpush2.bf16.msra.mxu1 %v7326_v60  ;;  %v5270_v60 = vadd.f32 %v5269_v21, %v5227_v38 }
 0x368   :  { %5511 = vmatprep.subr.bf16.mxu1 %v7331_v28  ;;  %5987 = vmatpush2.bf16.msra.mxu0 %v7389_v46  ;;  %v5231_v28 = vadd.f32 %v5230_v19, %v3897_v1  ;;  %v5268_v46 = vadd.f32 %v5267_v27, %v5225_v18 }
 0x369   :  { %5988 = vmatprep.subr.bf16.mxu0 %v7394_v17 }
 0x36b   :  { %5512 = vmatpush2.bf16.msra.mxu1 %v7329_v33  ;;  %v5272_v33 = vadd.f32 %v5271_v24, %v5229_v23 }
 0x36c   :  { %5513 = vmatprep.subr.bf16.mxu1 %v7334_v36  ;;  %5989 = vmatpush2.bf16.msra.mxu0 %v7392_v34  ;;  %v7436_v34 = vld [vmem:[#allocation12 + $0x1a4] ss:$8 sps:$4 sm:$0xff]  }
 0x36f   :  { %5514 = vmatpush2.bf16.msra.mxu1 %v7332_v45  ;;  %v5310_v57 = vpop.f32.mrf.mxu0 }
 0x370   :  { %5515 = vmatprep.subr.bf16.mxu1 %v7337_v37  ;;  %v5311_v45 = vadd.f32 %v5310_v57, %v5268_v46 }
 0x371   :  { %v5312_v9 = vpop.f32.mrf.mxu0 }
 0x372   :  { %v5313_v36 = vadd.f32 %v5312_v9, %v5270_v60 }
 0x373   :  { %5516 = vmatpush2.bf16.msra.mxu1 %v7335_v30  ;;  %v5314_v12 = vpop.f32.mrf.mxu0 }
 0x374   :  { %5517 = vmatprep.subr.bf16.mxu1 %v7340_v39  ;;  %v7434_v39 = vld [vmem:[#allocation12 + $0x1a0] ss:$8 sps:$4 sm:$0xff]  }
 0x375   :  { %v5316_v37 = vpop.f32.mrf.mxu0 }
 0x377   :  { %5518 = vmatpush2.bf16.msra.mxu1 %v7338_v48  ;;  %v5274_v48 = vadd.f32 %v5273_v25, %v5231_v28 }
 0x378   :  { %5519 = vmatprep.subr.bf16.mxu1 %v7343_v11  ;;  %v5315_v11 = vadd.f32 %v5314_v12, %v5272_v33 }
 0x37b   :  { %5520 = vmatpush2.bf16.msra.mxu1 %v7341_v54 }
 0x37c   :  { %5521 = vmatprep.subr.bf16.mxu1 %v7346_v31 }
 0x37f   :  { %5522 = vmatpush2.bf16.msra.mxu1 %v7344_v50 }
 0x380   :  { %6001 = vmatprep.subr.bf16.mxu1 %v7397_v43 }
 0x382   :  { %5524 = vmatmul.mubr.bf16.vlgmr.msra.gmra.mxu1 %v7903_v47  ;;  %v7412_v47 = vld [vmem:[#allocation12 + $0x124] ss:$8 sps:$4 sm:$0xff]  }
 0x383   :  { %6002 = vmatpush1.bf16.msra.mxu1 %v7395_v10  ;;  %v5317_v10 = vadd.f32 %v5316_v37, %v5274_v48 }
 0x384   :  { %6003 = vmatprep.subr.bf16.mxu1 %v7400_v51  ;;  %v7439_v51 = vld [vmem:[#allocation12 + $0x194] ss:$8 sps:$4 sm:$0xff]  }
 0x387   :  { %6004 = vmatpush1.bf16.msra.mxu1 %v7398_v29 }
 0x388   :  { %6005 = vmatprep.subr.bf16.mxu1 %v7403_v52  ;;  %v7437_v52 = vld [vmem:[#allocation12 + $0x190] ss:$8 sps:$4 sm:$0xff]  }
 0x38b   :  { %6006 = vmatpush1.bf16.msra.mxu1 %v7401_v53 }
 0x38c   :  { %6007 = vmatprep.subr.bf16.mxu1 %v7406_v55 }
 0x38f   :  { %6008 = vmatpush1.bf16.msra.mxu1 %v7404_v26 }
 0x390   :  { %6009 = vmatprep.subr.bf16.mxu1 %v7409_v59 }
 0x393   :  { %6010 = vmatpush1.bf16.msra.mxu1 %v7407_v58 }
 0x394   :  { %6011 = vmatprep.subr.bf16.mxu1 %v7412_v47  ;;  %v7442_v47 = vld [vmem:[#allocation12 + $0x184] ss:$8 sps:$4 sm:$0xff]  }
 0x397   :  { %6012 = vmatpush1.bf16.msra.mxu1 %v7410_v61 }
 0x398   :  { %6013 = vmatprep.subr.bf16.mxu1 %v7415_v62  ;;  %v7440_v62 = vld [vmem:[#allocation12 + $0x180] ss:$8 sps:$4 sm:$0xff]  }
 0x39b   :  { %6014 = vmatpush1.bf16.msra.mxu1 %v7413_v0 }
 0x39c   :  { %6015 = vmatprep.subr.bf16.mxu1 %v7418_v13 }
 0x39f   :  { %6016 = vmatpush1.bf16.msra.mxu1 %v7416_v3 }
 0x3a0   :  { %6017 = vmatprep.subr.bf16.mxu1 %v7421_v4 }
 0x3a3   :  { %6018 = vmatpush2.bf16.msra.mxu1 %v7419_v40 }
 0x3a4   :  { %6019 = vmatprep.subr.bf16.mxu1 %v7424_v5 }
 0x3a7   :  { %6020 = vmatpush2.bf16.msra.mxu1 %v7422_v14 }
 0x3a8   :  { %6021 = vmatprep.subr.bf16.mxu1 %v7427_v44 }
 0x3ab   :  { %6022 = vmatpush2.bf16.msra.mxu1 %v7425_v8 }
 0x3ac   :  { %6023 = vmatprep.subr.bf16.mxu1 %v7430_v41  ;;  %v3905_v41 = vrot.slane %v7912_v20, %v622_v35 }
 0x3af   :  { %6024 = vmatpush2.bf16.msra.mxu1 %v7428_v2  ;;  %v5396_v5 = vpop.f32.mrf.mxu0 }
 0x3b0   :  { %6025 = vmatprep.subr.bf16.mxu1 %v7433_v42  ;;  %v5397_v19 = vadd.f32 %v5396_v5, %v3901_v15 }
 0x3b1   :  { %v5398_v63 = vpop.f32.mrf.mxu0 }
 0x3b2   :  { %v5399_v42 = vadd.f32 %v5398_v63, %v3905_v41 }
 0x3b3   :  { %6026 = vmatpush2.bf16.msra.mxu1 %v7431_v6  ;;  %v5400_v14 = vpop.f32.mrf.mxu0 }
 0x3b4   :  { %6027 = vmatprep.subr.bf16.mxu1 %v7436_v34  ;;  %v5401_v57 = vadd.f32 %v5400_v14, %v3901_v15 }
 0x3b5   :  { %v5402_v49 = vpop.f32.mrf.mxu0 }
 0x3b6   :  { %v5403_v24 = vadd.f32 %v5402_v49, %v3905_v41 }
 0x3b7   :  { %6028 = vmatpush2.bf16.msra.mxu1 %v7434_v39 }
 0x3b8   :  { %6029 = vmatprep.subr.bf16.mxu1 %v7439_v51  ;;  %v6057_v51 = vld [vmem:[#allocation2] sm:$0x1] }
 0x3b9   :  { %6060 = vperm.xlu0 %6962, %v6057_v51  }
 0x3bb   :  { %6030 = vmatpush2.bf16.msra.mxu1 %v7437_v52 }
 0x3bc   :  { %6031 = vmatprep.subr.bf16.mxu1 %v7442_v47 }
 0x3bf   :  { %6032 = vmatpush2.bf16.msra.mxu1 %v7440_v62 }
 0x3c2   :  { %v5353_v17 = vpop.f32.mrf.mxu1 }
 0x3c3   :  { %v5354_v31 = vadd.f32 %v5353_v17, %v5311_v45 }
 0x3c4   :  { %v5355_v30 = vpop.f32.mrf.mxu1 }
 0x3c5   :  { %v5356_v54 = vadd.f32 %v5355_v30, %v5313_v36  ;;  %v5542_v59 = vmul.f32 0.2, %v5354_v31  ;;  %vm5534_vm2 = vcmp.gt.f32.partialorder %v5354_v31, 0.0 }
 0x3c6   :  { %v5357_v50 = vpop.f32.mrf.mxu1 }
 0x3c7   :  { %v5358_v43 = vadd.f32 %v5357_v50, %v5315_v11  ;;  %v5543_v53 = vmul.f32 0.2, %v5356_v54  ;;  %vm5535_vm1 = vcmp.gt.f32.partialorder %v5356_v54, 0.0  ;;  %v5550_v3 = vsel %vm5534_vm2, %v5354_v31, %v5542_v59 }
 0x3c8   :  { %v5359_v29 = vpop.f32.mrf.mxu1 }
 0x3c9   :  { %vm5538_vm0 = vcmp.gt.f32.partialorder %v5358_v43, 0.0  ;;  %v5546_v55 = vmul.f32 0.2, %v5358_v43  ;;  %v5360_v26 = vadd.f32 %v5359_v29, %v5317_v10  ;;  %v5551_v0 = vsel %vm5535_vm1, %v5356_v54, %v5543_v53  ;;  %v6056_v10 = vld [vmem:[#allocation15] sm:$0x3] }
 0x3ca   :  { %v5626_v53 = vld [vmem:[#allocation14] sm:$0x3] }
 0x3cb   :  { %vm5539_vm3 = vcmp.gt.f32.partialorder %v5360_v26, 0.0  ;;  %v5547_v58 = vmul.f32 0.2, %v5360_v26  ;;  %v5554_v61 = vsel %vm5538_vm0, %v5358_v43, %v5546_v55  ;;  %v6075_v43 = vrot.slane %v6056_v10, %v7835_v22 }
 0x3cc   :  { %v5558_v40 = vpack.c.bf16 %v5554_v61, %v5550_v3 }
 0x3cd   :  { %v5555_v13 = vsel %vm5539_vm3, %v5360_v26, %v5547_v58  ;;  %v5635_v26 = vrot.slane %v5626_v53, %v7835_v22  ;;  %v5631_v58 = vrot.slane %v5626_v53, %v7771_v16 }
 0x3ce   :  { %v5559_v4 = vpack.c.bf16 %v5555_v13, %v5551_v0 }
 0x3d0   :  { %5990 = vmatprep.mubr.bf16.mxu0 %v5559_v4 }
 0x3d1   :  { %5991 = vmatmul.mubr.bf16.vlgmr.msra.gmra.mxu0 %v5558_v40 }
 0x3d2   :  { %6142 = vmatprep.mubr.f32.mxu0 %v6075_v43 }
 0x3ef   :  { %v5482_v27 = vpop.f32.mrf.mxu0 }
 0x3f1   :  { %v5484_v21 = vpop.f32.mrf.mxu0 }
 0x3f3   :  { %v5486_v38 = vpop.f32.mrf.mxu0 }
 0x3f5   :  { %v5488_v56 = vpop.f32.mrf.mxu0 }
 0x402   :  { %v5439_v44 = vpop.f32.mrf.mxu1 }
 0x403   :  { %v5440_v1 = vadd.f32 %v5439_v44, %v5397_v19  ;;  %v6071_v19 = vrot.slane %v6056_v10, %v7771_v16 }
 0x404   :  { %v5441_v8 = vpop.f32.mrf.mxu1 }
 0x405   :  { %v5442_v6 = vadd.f32 %v5441_v8, %v5399_v42  ;;  %v5483_v35 = vadd.f32 %v5482_v27, %v5440_v1 }
 0x406   :  { %v5443_v2 = vpop.f32.mrf.mxu1 }
 0x407   :  { %v5444_v9 = vadd.f32 %v5443_v2, %v5401_v57  ;;  %v5485_v25 = vadd.f32 %v5484_v21, %v5442_v6 }
 0x408   :  { %v5445_v32 = vpop.f32.mrf.mxu1 }
 0x409   :  { %v5446_v23 = vadd.f32 %v5445_v32, %v5403_v24  ;;  %v5487_v60 = vadd.f32 %v5486_v38, %v5444_v9 }
 0x40b   :  { %v5489_v17 = vadd.f32 %v5488_v56, %v5446_v23 }
 0x434   :  { %v6061_v21 = vpop.permute.xlu0 %6060 }
 0x435   :  { %v6066_v57 = vrot.slane %v6061_v21, %v7771_v16 }
 0x442   :  { %v5525_v18 = vpop.f32.mrf.mxu1 }
 0x443   :  { %v5526_v20 = vadd.f32 %v5525_v18, %v5483_v35 }
 0x444   :  { %v5527_v12 = vpop.f32.mrf.mxu1 }
 0x445   :  { %v5528_v7 = vadd.f32 %v5527_v12, %v5485_v25  ;;  %v5544_v37 = vmul.f32 0.2, %v5526_v20  ;;  %vm5536_vm6 = vcmp.gt.f32.partialorder %v5526_v20, 0.0 }
 0x446   :  { %v5529_v28 = vpop.f32.mrf.mxu1 }
 0x447   :  { %v5530_v46 = vadd.f32 %v5529_v28, %v5487_v60  ;;  %v5545_v36 = vmul.f32 0.2, %v5528_v7  ;;  %vm5537_vm5 = vcmp.gt.f32.partialorder %v5528_v7, 0.0  ;;  %v5552_v54 = vsel %vm5536_vm6, %v5526_v20, %v5544_v37 }
 0x448   :  { %v5531_v33 = vpop.f32.mrf.mxu1 }
 0x449   :  { %vm5540_vm4 = vcmp.gt.f32.partialorder %v5530_v46, 0.0  ;;  %v5548_v34 = vmul.f32 0.2, %v5530_v46  ;;  %v5532_v45 = vadd.f32 %v5531_v33, %v5489_v17  ;;  %v5553_v48 = vsel %vm5537_vm5, %v5528_v7, %v5545_v36 }
 0x44b   :  { %vm5541_vm7 = vcmp.gt.f32.partialorder %v5532_v45, 0.0  ;;  %v5549_v30 = vmul.f32 0.2, %v5532_v45  ;;  %v5556_v39 = vsel %vm5540_vm4, %v5530_v46, %v5548_v34 }
 0x44c   :  { %v5560_v50 = vpack.c.bf16 %v5556_v39, %v5552_v54 }
 0x44d   :  { %v5557_v11 = vsel %vm5541_vm7, %v5532_v45, %v5549_v30 }
 0x44e   :  { %v5561_v31 = vpack.c.bf16 %v5557_v11, %v5553_v48 }
 0x450   :  { %6033 = vmatprep.mubr.bf16.mxu1 %v5561_v31 }
 0x451   :  { %6034 = vmatmul.mubr.bf16.vlgmr.msra.gmra.mxu1 %v5560_v50 }
 0x491   :  { %v5992_v29 = vpop.f32.mrf.mxu0 }
 0x492   :  { %v5993_v5 = vadd.f32 %v5992_v29, %v5631_v58 }
 0x493   :  { %v5994_v52 = vpop.f32.mrf.mxu0 }
 0x494   :  { %v5995_v62 = vadd.f32 %v5994_v52, %v5635_v26 }
 0x495   :  { %v5996_v55 = vpop.f32.mrf.mxu0 }
 0x496   :  { %v5997_v0 = vadd.f32 %v5996_v55, %v5631_v58 }
 0x497   :  { %v5998_v47 = vpop.f32.mrf.mxu0 }
 0x498   :  { %v5999_v3 = vadd.f32 %v5998_v47, %v5635_v26 }
 0x511   :  { %v6035_v59 = vpop.f32.mrf.mxu1 }
 0x512   :  { %v6036_v44 = vadd.f32 %v6035_v59, %v5993_v5 }
 0x513   :  { %v6037_v61 = vpop.f32.mrf.mxu1 }
 0x514   :  { %v6038_v4 = vadd.f32 %v6037_v61, %v5995_v62  ;;  %v6048_v15 = vmul.f32 0.2, %v6036_v44  ;;  %vm6044_vm11 = vcmp.gt.f32.partialorder %v6036_v44, 0.0 }
 0x515   :  { %v6039_v13 = vpop.f32.mrf.mxu1 }
 0x516   :  { %v6040_v40 = vadd.f32 %v6039_v13, %v5997_v0  ;;  %v6049_v8 = vmul.f32 0.2, %v6038_v4  ;;  %vm6045_vm10 = vcmp.gt.f32.partialorder %v6038_v4, 0.0  ;;  %v6052_v42 = vsel %vm6044_vm11, %v6036_v44, %v6048_v15 }
 0x517   :  { %v6041_v63 = vpop.f32.mrf.mxu1 }
 0x518   :  { %v6042_v14 = vadd.f32 %v6041_v63, %v5999_v3  ;;  %v6050_v49 = vmul.f32 0.2, %v6040_v40  ;;  %vm6046_vm8 = vcmp.gt.f32.partialorder %v6040_v40, 0.0  ;;  %v6053_v2 = vsel %vm6045_vm10, %v6038_v4, %v6049_v8 }
 0x51a   :  { %v6051_v41 = vmul.f32 0.2, %v6042_v14  ;;  %vm6047_vm9 = vcmp.gt.f32.partialorder %v6042_v14, 0.0  ;;  %v6054_v27 = vsel %vm6046_vm8, %v6040_v40, %v6050_v49 }
 0x51c   :  { %v6055_v22 = vsel %vm6047_vm9, %v6042_v14, %v6051_v41 }
 0x51d   :  { %6106 = vmatprep.subr.mxu0 %v6055_v22 }
 0x51e   :  { %6107 = vmatpush1.xpose.msra.mxu0 %v6054_v27 }
 0x51f   :  { %6108 = vmatprep.subr.mxu0 %v6053_v2 }
 0x522   :  { %6109 = vmatpush1.xpose.msra.mxu0 %v6052_v42 }
 0x525   :  { %6143 = vmatmul.mubr.f32.vlgmr.msra.gmra.mxu0 %v6071_v19 }
 0x5e5   :  { %v6144_v6 = vpop.f32.mrf.mxu0 }
 0x5e6   :  { %v6145_v1 = vadd.f32 %v6144_v6, %v6066_v57 }
 0x5e7   :  { %v6146_v32 = vpop.f32.mrf.mxu0 }
 0x5e8   :  { %v6943_v24 = vmul.f32 -1.442695, %v6145_v1 }
 0x5ea   :  { %7443 = vpow2.f32 %v6943_v24 }
 0x5f7   :  { %v7444_v9 = vpop.eup %7443 }
 0x5f8   :  { %v6151_v38 = vadd.f32 1.0, %v7444_v9 }
 0x5fa   :  { %7445 = vrcp.f32 %v6151_v38 }
 0x607   :  { %v7446_v18 = vpop.eup %7445 }
 0x608   :  { %6155 = vst.msk [vmem:[#allocation17] sm:$0x1] %vm6154_vm12, %v7446_v18 }
 0x609   :  { %7619 = shalt.err (!%p7616_p2)
}
 0x60a   :  { %6165 = dma.vmem_to_hbm [thread:$0]  %s6163_s7, 16, %s7941_s9, [#allocation5]  }
 0x60b   :  { %7638 = dma.done.wait [#allocation5], 16  }
 0x60c   :  { %7639 = vsyncadd [#allocation5], 4294967280 }
 0x60d   :  { %6169 = vsyncpa [#allocation4], 1 }
 0x60e   :  { %6170 = vsyncpa [#allocation7], 1 }
 0x60f   :  { %6171 = vsyncpa [#allocation10], 1 }
 0x610   :  { %6172 = vsyncpa [#allocation13], 1 }
 0x611   :  { %6173 = vsyncpa [#allocation16], 1 }
 0x612   :  { %6174 = vsyncpa [#allocation5], 1 }

</bundles_post_ra>
